<compile_context>
chip_gen: v5e
topology: v5e:2x2
jax: 0.10.0
libtpu: 0.0.40
codegen_flags: <defaults>
</compile_context>

<pallas_src>
import math
import numpy as np
import jax
import jax.numpy as jnp
from jax.experimental import pallas as pl
from jax.experimental.pallas import tpu as pltpu

SR = 16000
N_FFT = 2048
HOP = 512
N_MELS = 128
N_MFCC = 40
N_FREQ = N_FFT // 2 + 1            # 1025 one-sided bins
N_FREQ_USED = N_FFT // 2           # 1024: Nyquist bin has exactly-zero mel weight -> dropped
N_FOLD = N_FFT // 2                # 1024 folded samples per frame (real-DFT symmetry)
FREQ_TILE = 512                    # 2 grid steps; cos/sin tiles (1024, 512) bf16 = 1 MiB each
N_TILES = N_FREQ_USED // FREQ_TILE
MIN_SAMPLES = 15360


# ---------------------------------------------------------------------------
# Pallas kernel
# ---------------------------------------------------------------------------
def _audio_kernel(c_ref, s_ref, cos_ref, sin_ref, fb_ref, dct_ref, w_ref, b_ref,
                  mel_ref, mfcc_ref):
    k = pl.program_id(0)

    # mel_ref's block index is constant over the reduction axis -> VMEM-resident;
    # use it directly as the f32 accumulator (no scratch buffer / extra copy).
    @pl.when(k == 0)
    def _():
        mel_ref[...] = jnp.zeros_like(mel_ref)

    # Folded real DFT for this frequency band (two MXU matmuls, f32 accumulation).
    re = jnp.dot(c_ref[...], cos_ref[...], preferred_element_type=jnp.float32)
    im = jnp.dot(s_ref[...], sin_ref[...], preferred_element_type=jnp.float32)
    power = (re * re + im * im).astype(jnp.bfloat16)          # |STFT|^2 for this band

    # Accumulate mel energies: (T, FREQ_TILE) @ (FREQ_TILE, N_MELS), f32 accum.
    mel_ref[...] += jnp.dot(power, fb_ref[...],
                            preferred_element_type=jnp.float32)

    @pl.when(k == pl.num_programs(0) - 1)
    def _():
        mel = mel_ref[...]                                     # raw mel energies (T, N_MELS)

        # 'mfcc' branch: AmplitudeToDB(power, top_db=80) -> DCT-II(ortho) ->
        #                nn.Linear(40, 128).  dct/W are bf16, zero-padded to 128 lanes.
        db = 10.0 * jnp.log10(jnp.maximum(mel, 1e-10))
        db = jnp.maximum(db, jnp.max(db) - 80.0)
        mfcc = jnp.dot(db.astype(jnp.bfloat16), dct_ref[...],
                       preferred_element_type=jnp.float32)
        proj = jnp.dot(mfcc.astype(jnp.bfloat16), w_ref[...],
                       preferred_element_type=jnp.float32) + b_ref[0:1, :]
        mfcc_ref[...] = proj.astype(mfcc_ref.dtype)

        # 'mel' branch: log2(mel + 1e-6)  (already time-major = permute(1, 0))
        mel_ref[...] = jnp.log2(mel + 1e-6).astype(mel_ref.dtype)


# ---------------------------------------------------------------------------
# Deterministic constant matrices (glue, numpy)
# ---------------------------------------------------------------------------
def _folded_dft_matrices():
    """Folded cos / -sin matrices, bf16 (N_FOLD, N_FREQ_USED) each.

    Row m' corresponds to folded sample index m = m'+1 (m = 1..1024); the x[0]
    term vanishes because the periodic Hann window is exactly 0 at n=0.
    """
    m = np.arange(1, N_FOLD + 1, dtype=np.int64)              # 1..1024
    k = np.arange(N_FREQ_USED, dtype=np.int64)                # bins 0..1023
    phase = 2.0 * np.pi * ((m[:, None] * k[None, :]) % N_FFT) / N_FFT
    cos_m = np.cos(phase)
    sin_m = -np.sin(phase)
    sin_m[-1, :] = 0.0                                         # m = N/2: sin(pi*k) == 0 exactly
    to_bf16 = lambda a: jnp.asarray(a.astype(np.float32)).astype(jnp.bfloat16)
    return to_bf16(cos_m), to_bf16(sin_m)


def _mel_fbanks():
    # torchaudio.functional.melscale_fbanks, htk scale, norm=None.
    # Row for the Nyquist bin (8000 Hz) is exactly zero -> safe to drop (1024 rows).
    all_freqs = np.linspace(0.0, SR / 2.0, N_FREQ)
    hz_to_mel = lambda f: 2595.0 * np.log10(1.0 + f / 700.0)
    mel_to_hz = lambda m: 700.0 * (10.0 ** (m / 2595.0) - 1.0)
    m_pts = np.linspace(hz_to_mel(0.0), hz_to_mel(SR / 2.0), N_MELS + 2)
    f_pts = mel_to_hz(m_pts)
    f_diff = f_pts[1:] - f_pts[:-1]
    slopes = f_pts[None, :] - all_freqs[:, None]
    down = -slopes[:, :-2] / f_diff[:-1]
    up = slopes[:, 2:] / f_diff[1:]
    fb = np.maximum(0.0, np.minimum(down, up))                 # (1025, 128)
    fb = fb[:N_FREQ_USED, :]                                   # drop zero Nyquist row
    return jnp.asarray(fb.astype(np.float32)).astype(jnp.bfloat16)


def _dct_matrix_padded():
    # torchaudio.functional.create_dct(n_mfcc, n_mels, norm='ortho') -> (n_mels, n_mfcc),
    # zero-padded to (n_mels, n_mels) for lane-dense epilogue matmuls; bf16.
    n = np.arange(N_MELS, dtype=np.float64)
    k = np.arange(N_MFCC, dtype=np.float64)
    dct = np.cos(np.pi / N_MELS * (n[:, None] + 0.5) * k[None, :])
    dct *= np.sqrt(2.0 / N_MELS)
    dct[:, 0] *= 1.0 / np.sqrt(2.0)
    dct_pad = np.zeros((N_MELS, N_MELS), np.float32)
    dct_pad[:, :N_MFCC] = dct
    return jnp.asarray(dct_pad).astype(jnp.bfloat16)


# ---------------------------------------------------------------------------
# Wrapper (framing + symmetry fold glue + pallas_call)
# ---------------------------------------------------------------------------
def audio_features(waveform, proj_w, proj_b):
    wav = jnp.asarray(waveform, jnp.float32).reshape(-1)
    L = int(wav.shape[0])
    if L < MIN_SAMPLES:                                        # repeat-to-min logic
        reps = int(math.ceil(MIN_SAMPLES / L))
        wav = jnp.tile(wav, reps)[:MIN_SAMPLES]
        L = MIN_SAMPLES

    # torch.stft(center=True, pad_mode='reflect'), hann window (periodic)
    pad = N_FFT // 2
    wav_p = jnp.pad(wav, (pad, pad), mode="reflect")
    T = 1 + L // HOP
    idx = jnp.arange(T)[:, None] * HOP + jnp.arange(N_FFT)[None, :]
    hann = 0.5 * (1.0 - jnp.cos(2.0 * jnp.pi * jnp.arange(N_FFT) / N_FFT))
    frames = wav_p[idx] * hann[None, :]                        # (T, 2048) f32

    # Real-DFT symmetry fold (hann[0] == 0 so the x[0] term vanishes exactly).
    fwd = frames[:, 1:N_FOLD + 1]                              # x[m],      m = 1..1024
    rev = jnp.flip(frames[:, N_FOLD + 1:], axis=1)             # x[2048-m], m = 1..1023
    rev = jnp.pad(rev, ((0, 0), (0, 1)))                       # m = 1024 slot -> 0
    c_frames = (fwd + rev).astype(jnp.bfloat16)                # (T, 1024)
    s_frames = (fwd - rev).astype(jnp.bfloat16)                # (T, 1024)

    # Pad T to a multiple of 16 (bf16 sublane packing).  Padded rows duplicate the
    # last real frame so the top_db global max and log stats are unchanged.
    T_pad = max(16, -(-T // 16) * 16)
    if T_pad > T:
        dup_c = jnp.broadcast_to(c_frames[-1:], (T_pad - T, N_FOLD))
        dup_s = jnp.broadcast_to(s_frames[-1:], (T_pad - T, N_FOLD))
        c_frames = jnp.concatenate([c_frames, dup_c], axis=0)
        s_frames = jnp.concatenate([s_frames, dup_s], axis=0)

    cos_m, sin_m = _folded_dft_matrices()                      # 2 x (1024, 1024) bf16 = 4 MiB
    fb = _mel_fbanks()                                         # (1024, 128) bf16
    dct_pad = _dct_matrix_padded()                             # (128, 128)  bf16
    # nn.Linear(40,128): W (128,40) -> W^T (40,128), zero-padded to (128,128), bf16
    w_pad = jnp.pad(jnp.asarray(proj_w, jnp.float32).T,
                    ((0, N_MELS - N_MFCC), (0, 0))).astype(jnp.bfloat16)
    # bias broadcast to an aligned (8,128) tile
    b_pad = jnp.broadcast_to(jnp.asarray(proj_b, jnp.float32).reshape(1, -1), (8, N_MELS))

    flops = (4 * T_pad * N_FOLD * N_FREQ_USED                  # cos + sin matmuls
             + 2 * T_pad * N_FREQ_USED * N_MELS                # mel filterbank
             + 4 * T_pad * N_MELS * N_MELS)                    # DCT + projection
    bytes_accessed = (2 * N_FOLD * N_FREQ_USED * 2             # cos + sin (bf16)
                      + N_FREQ_USED * N_MELS * 2               # fbank
                      + 2 * T_pad * N_FOLD * 2                 # folded frames
                      + 2 * N_MELS * N_MELS * 2                # dct + W^T
                      + 8 * N_MELS * 4                         # bias
                      + 2 * T_pad * N_MELS * 4)                # outputs

    mel_out, mfcc_out = pl.pallas_call(
        _audio_kernel,
        out_shape=(jax.ShapeDtypeStruct((T_pad, N_MELS), jnp.float32),
                   jax.ShapeDtypeStruct((T_pad, N_MELS), jnp.float32)),
        grid_spec=pltpu.PrefetchScalarGridSpec(
            num_scalar_prefetch=0,
            grid=(N_TILES,),
            in_specs=[
                pl.BlockSpec((T_pad, N_FOLD),      lambda k: (0, 0)),  # folded c frames (resident)
                pl.BlockSpec((T_pad, N_FOLD),      lambda k: (0, 0)),  # folded s frames (resident)
                pl.BlockSpec((N_FOLD, FREQ_TILE),  lambda k: (0, k)),  # folded cos tile
                pl.BlockSpec((N_FOLD, FREQ_TILE),  lambda k: (0, k)),  # folded -sin tile
                pl.BlockSpec((FREQ_TILE, N_MELS),  lambda k: (k, 0)),  # mel fbank tile
                pl.BlockSpec((N_MELS, N_MELS),     lambda k: (0, 0)),  # padded DCT (bf16)
                pl.BlockSpec((N_MELS, N_MELS),     lambda k: (0, 0)),  # padded proj W^T (bf16)
                pl.BlockSpec((8, N_MELS),          lambda k: (0, 0)),  # bias (sublane-padded)
            ],
            out_specs=[
                pl.BlockSpec((T_pad, N_MELS), lambda k: (0, 0)),       # mel (log2)
                pl.BlockSpec((T_pad, N_MELS), lambda k: (0, 0)),       # mfcc proj
            ],
        ),
        compiler_params=pltpu.CompilerParams(dimension_semantics=("arbitrary",)),
        cost_estimate=pl.CostEstimate(flops=flops,
                                      transcendentals=2 * T_pad * N_MELS,
                                      bytes_accessed=bytes_accessed),
    )(c_frames, s_frames, cos_m, sin_m, fb, dct_pad, w_pad, b_pad)

    mel_out = mel_out[:T]
    mfcc_out = mfcc_out[:T]

    # TODO(synk): VGGish is an external pretrained torch.hub CNN; its weights cannot
    # be constructed in-script, so we return the module's zero fallback.
    # TODO(synk): batch multiple clips along T (with a "parallel" per-clip grid axis
    # for v7x megacore) to amortize the 4 MiB constant stream; single-clip API kept
    # to match the module's forward signature.
    # TODO(synk): optional int8 per-column quantization of cos/sin for v5e/v6e
    # (bandwidth-starved); kept bf16 since the v7x MXU has no int8 path.
    # TODO(synk): cross-call DMA future to hide the first cos/sin tile prologue DMA
    # behind the XLA framing gather.
    vggish = jnp.zeros((1, 128), jnp.float32)
    return {"vggish": vggish, "mfcc": mfcc_out, "mel": mel_out}


if __name__ == "__main__":
    key = jax.random.PRNGKey(0)
    k_wav, k_w, k_b = jax.random.split(key, 3)

    # 1 second of synthetic audio at 16 kHz (>= min_samples=15360) -> T = 32 frames
    waveform = jax.random.normal(k_wav, (SR,), jnp.float32)

    # mfcc_proj = nn.Linear(40, 128): weight (128, 40), bias (128,)
    bound = 1.0 / np.sqrt(N_MFCC)
    proj_w = jax.random.uniform(k_w, (N_MELS, N_MFCC), jnp.float32, -bound, bound)
    proj_b = jax.random.uniform(k_b, (N_MELS,), jnp.float32, -bound, bound)

    feats = audio_features(waveform, proj_w, proj_b)
    jax.block_until_ready(feats)

    assert feats["mel"].shape == (32, 128)
    assert feats["mfcc"].shape == (32, 128)
    assert feats["vggish"].shape == (1, 128)
    assert bool(jnp.all(jnp.isfinite(feats["mel"]))) and bool(jnp.all(jnp.isfinite(feats["mfcc"])))
    print("KERNEL_OK")
</pallas_src>

<mosaic_0001>
module attributes {stable_mosaic.version = 11 : i64} {
  func.func @_audio_kernel(%arg0: i32, %arg1: memref<32x1024xbf16, #tpu.memory_space<vmem>>, %arg2: memref<32x1024xbf16, #tpu.memory_space<vmem>>, %arg3: memref<1024x512xbf16, #tpu.memory_space<vmem>>, %arg4: memref<1024x512xbf16, #tpu.memory_space<vmem>>, %arg5: memref<512x128xbf16, #tpu.memory_space<vmem>>, %arg6: memref<128x128xbf16, #tpu.memory_space<vmem>>, %arg7: memref<128x128xbf16, #tpu.memory_space<vmem>>, %arg8: memref<8x128xf32, #tpu.memory_space<vmem>>, %arg9: memref<32x128xf32, #tpu.memory_space<vmem>>, %arg10: memref<32x128xf32, #tpu.memory_space<vmem>>) attributes {dimension_semantics = [#tpu.dimension_semantics<arbitrary>], iteration_bounds = array<i64: 2>, scalar_prefetch = 0 : i64, scratch_operands = 0 : i64, tpu.core_type = #tpu.core_type<tc>, window_params = [{pipeline_mode = #tpu.pipeline_mode<synchronous>, transform_indices = @transform_0, window_bounds = array<i64: 32, 1024>}, {pipeline_mode = #tpu.pipeline_mode<synchronous>, transform_indices = @transform_1, window_bounds = array<i64: 32, 1024>}, {transform_indices = @transform_2, window_bounds = array<i64: 1024, 512>}, {transform_indices = @transform_3, window_bounds = array<i64: 1024, 512>}, {transform_indices = @transform_4, window_bounds = array<i64: 512, 128>}, {pipeline_mode = #tpu.pipeline_mode<synchronous>, transform_indices = @transform_5, window_bounds = array<i64: 128, 128>}, {pipeline_mode = #tpu.pipeline_mode<synchronous>, transform_indices = @transform_6, window_bounds = array<i64: 128, 128>}, {pipeline_mode = #tpu.pipeline_mode<synchronous>, transform_indices = @transform_7, window_bounds = array<i64: 8, 128>}, {pipeline_mode = #tpu.pipeline_mode<synchronous>, transform_indices = @transform_8, window_bounds = array<i64: 32, 128>}, {pipeline_mode = #tpu.pipeline_mode<synchronous>, transform_indices = @transform_9, window_bounds = array<i64: 32, 128>}]} {
    %c0_i32 = arith.constant 0 : i32
    %0 = arith.cmpi eq, %arg0, %c0_i32 : i32
    %1 = arith.extui %0 : i1 to i32
    %c0_i32_0 = arith.constant 0 : i32
    %2 = arith.cmpi ne, %1, %c0_i32_0 : i32
    scf.if %2 {
      %cst_17 = arith.constant 0.000000e+00 : f32
      %21 = vector.broadcast %cst_17 : f32 to vector<32x128xf32>
      %c0_18 = arith.constant 0 : index
      %c0_19 = arith.constant 0 : index
      %22 = vector.load %arg9[%c0_18, %c0_19] : memref<32x128xf32, #tpu.memory_space<vmem>>, vector<32x128xf32>
      tpu.vector_store %arg9[%c0_18, %c0_19], %21 {strides = array<i32>} : memref<32x128xf32, #tpu.memory_space<vmem>>, vector<32x128xf32>,
    } else {
    }
    %c0 = arith.constant 0 : index
    %c0_1 = arith.constant 0 : index
    %3 = vector.load %arg1[%c0, %c0_1] : memref<32x1024xbf16, #tpu.memory_space<vmem>>, vector<32x1024xbf16>
    %c0_2 = arith.constant 0 : index
    %c0_3 = arith.constant 0 : index
    %4 = vector.load %arg3[%c0_2, %c0_3] : memref<1024x512xbf16, #tpu.memory_space<vmem>>, vector<1024x512xbf16>
    %cst = arith.constant dense<0.000000e+00> : vector<32x512xf32>
    %5 = tpu.matmul %3, %4, %cst {dimension_numbers = #tpu.dot_dimension_numbers<[1], [0], [0], [1], [0, 0, 1, 1], [], []>} : vector<32x1024xbf16>, vector<1024x512xbf16>, vector<32x512xf32> -> vector<32x512xf32>
    %c0_4 = arith.constant 0 : index
    %c0_5 = arith.constant 0 : index
    %6 = vector.load %arg2[%c0_4, %c0_5] : memref<32x1024xbf16, #tpu.memory_space<vmem>>, vector<32x1024xbf16>
    %c0_6 = arith.constant 0 : index
    %c0_7 = arith.constant 0 : index
    %7 = vector.load %arg4[%c0_6, %c0_7] : memref<1024x512xbf16, #tpu.memory_space<vmem>>, vector<1024x512xbf16>
    %cst_8 = arith.constant dense<0.000000e+00> : vector<32x512xf32>
    %8 = tpu.matmul %6, %7, %cst_8 {dimension_numbers = #tpu.dot_dimension_numbers<[1], [0], [0], [1], [0, 0, 1, 1], [], []>} : vector<32x1024xbf16>, vector<1024x512xbf16>, vector<32x512xf32> -> vector<32x512xf32>
    %9 = arith.mulf %5, %5 : vector<32x512xf32>
    %10 = arith.mulf %8, %8 : vector<32x512xf32>
    %11 = arith.addf %9, %10 : vector<32x512xf32>
    %12 = arith.truncf %11 : vector<32x512xf32> to vector<32x512xbf16>
    %c0_9 = arith.constant 0 : index
    %c0_10 = arith.constant 0 : index
    %13 = vector.load %arg9[%c0_9, %c0_10] : memref<32x128xf32, #tpu.memory_space<vmem>>, vector<32x128xf32>
    %c0_11 = arith.constant 0 : index
    %c0_12 = arith.constant 0 : index
    %14 = vector.load %arg5[%c0_11, %c0_12] : memref<512x128xbf16, #tpu.memory_space<vmem>>, vector<512x128xbf16>
    %cst_13 = arith.constant dense<0.000000e+00> : vector<32x128xf32>
    %15 = tpu.matmul %12, %14, %cst_13 {dimension_numbers = #tpu.dot_dimension_numbers<[1], [0], [0], [1], [0, 0, 1, 1], [], []>} : vector<32x512xbf16>, vector<512x128xbf16>, vector<32x128xf32> -> vector<32x128xf32>
    %16 = arith.addf %13, %15 : vector<32x128xf32>
    %c0_14 = arith.constant 0 : index
    %c0_15 = arith.constant 0 : index
    %17 = vector.load %arg9[%c0_14, %c0_15] : memref<32x128xf32, #tpu.memory_space<vmem>>, vector<32x128xf32>
    tpu.vector_store %arg9[%c0_14, %c0_15], %16 {strides = array<i32>} : memref<32x128xf32, #tpu.memory_space<vmem>>, vector<32x128xf32>,
    %c1_i32 = arith.constant 1 : i32
    %18 = arith.cmpi eq, %arg0, %c1_i32 : i32
    %19 = arith.extui %18 : i1 to i32
    %c0_i32_16 = arith.constant 0 : i32
    %20 = arith.cmpi ne, %19, %c0_i32_16 : i32
    scf.if %20 {
      %c0_17 = arith.constant 0 : index
      %c0_18 = arith.constant 0 : index
      %21 = vector.load %arg9[%c0_17, %c0_18] : memref<32x128xf32, #tpu.memory_space<vmem>>, vector<32x128xf32>
      %cst_19 = arith.constant 1.000000e-10 : f32
      %22 = vector.broadcast %cst_19 : f32 to vector<32x128xf32>
      %23 = arith.maximumf %21, %22 : vector<32x128xf32>
      %24 = math.log %23 : vector<32x128xf32>
      %cst_20 = arith.constant 0.434294492 : f32
      %25 = vector.broadcast %cst_20 : f32 to vector<32x128xf32>
      %26 = arith.mulf %24, %25 : vector<32x128xf32>
      %cst_21 = arith.constant 1.000000e+01 : f32
      %27 = vector.broadcast %cst_21 : f32 to vector<32x128xf32>
      %28 = arith.mulf %27, %26 : vector<32x128xf32>
      %29 = vector.shape_cast %28 : vector<32x128xf32> to vector<1x32x128xf32>
      %cst_22 = arith.constant dense<0xFF800000> : vector<1xf32>
      %30 = vector.multi_reduction <maximumf>, %29, %cst_22 [1, 2] : vector<1x32x128xf32> to vector<1xf32>
      %31 = vector.shape_cast %30 : vector<1xf32> to vector<1x1x1xf32>
      %32 = vector.extract %31[0, 0, 0] : f32 from vector<1x1x1xf32>
      %cst_23 = arith.constant 8.000000e+01 : f32
      %33 = arith.subf %32, %cst_23 : f32
      %34 = vector.broadcast %33 : f32 to vector<32x128xf32>
      %35 = arith.maximumf %28, %34 : vector<32x128xf32>
      %36 = arith.truncf %35 : vector<32x128xf32> to vector<32x128xbf16>
      %c0_24 = arith.constant 0 : index
      %c0_25 = arith.constant 0 : index
      %37 = vector.load %arg6[%c0_24, %c0_25] : memref<128x128xbf16, #tpu.memory_space<vmem>>, vector<128x128xbf16>
      %cst_26 = arith.constant dense<0.000000e+00> : vector<32x128xf32>
      %38 = tpu.matmul %36, %37, %cst_26 {dimension_numbers = #tpu.dot_dimension_numbers<[1], [0], [0], [1], [0, 0, 1, 1], [], []>} : vector<32x128xbf16>, vector<128x128xbf16>, vector<32x128xf32> -> vector<32x128xf32>
      %39 = arith.truncf %38 : vector<32x128xf32> to vector<32x128xbf16>
      %c0_27 = arith.constant 0 : index
      %c0_28 = arith.constant 0 : index
      %40 = vector.load %arg7[%c0_27, %c0_28] : memref<128x128xbf16, #tpu.memory_space<vmem>>, vector<128x128xbf16>
      %cst_29 = arith.constant dense<0.000000e+00> : vector<32x128xf32>
      %41 = tpu.matmul %39, %40, %cst_29 {dimension_numbers = #tpu.dot_dimension_numbers<[1], [0], [0], [1], [0, 0, 1, 1], [], []>} : vector<32x128xbf16>, vector<128x128xbf16>, vector<32x128xf32> -> vector<32x128xf32>
      %c0_30 = arith.constant 0 : index
      %c0_31 = arith.constant 0 : index
      %42 = vector.load %arg8[%c0_30, %c0_31] : memref<8x128xf32, #tpu.memory_space<vmem>>, vector<1x128xf32>
      %43 = vector.broadcast %42 : vector<1x128xf32> to vector<32x128xf32>
      %44 = arith.addf %41, %43 : vector<32x128xf32>
      %c0_32 = arith.constant 0 : index
      %c0_33 = arith.constant 0 : index
      %45 = vector.load %arg10[%c0_32, %c0_33] : memref<32x128xf32, #tpu.memory_space<vmem>>, vector<32x128xf32>
      tpu.vector_store %arg10[%c0_32, %c0_33], %44 {strides = array<i32>} : memref<32x128xf32, #tpu.memory_space<vmem>>, vector<32x128xf32>,
      %cst_34 = arith.constant 9.99999997E-7 : f32
      %46 = vector.broadcast %cst_34 : f32 to vector<32x128xf32>
      %47 = arith.addf %21, %46 : vector<32x128xf32>
      %48 = math.log %47 : vector<32x128xf32>
      %cst_35 = arith.constant 2.000000e+00 : f32
      %49 = math.log %cst_35 : f32
      %50 = vector.broadcast %49 : f32 to vector<32x128xf32>
      %51 = arith.divf %48, %50 : vector<32x128xf32>
      %c0_36 = arith.constant 0 : index
      %c0_37 = arith.constant 0 : index
      %52 = vector.load %arg9[%c0_36, %c0_37] : memref<32x128xf32, #tpu.memory_space<vmem>>, vector<32x128xf32>
      tpu.vector_store %arg9[%c0_36, %c0_37], %51 {strides = array<i32>} : memref<32x128xf32, #tpu.memory_space<vmem>>, vector<32x128xf32>,
    } else {
    }
    return
  }
  func.func @transform_0(%arg0: i32) -> (i32, i32) {
    %c0_i32 = arith.constant 0 : i32
    %c0_i32_0 = arith.constant 0 : i32
    %c0_i32_1 = arith.constant 0 : i32
    return %c0_i32, %c0_i32_0 : i32, i32
  }
  func.func @transform_1(%arg0: i32) -> (i32, i32) {
    %c0_i32 = arith.constant 0 : i32
    %c0_i32_0 = arith.constant 0 : i32
    %c0_i32_1 = arith.constant 0 : i32
    return %c0_i32, %c0_i32_0 : i32, i32
  }
  func.func @transform_2(%arg0: i32) -> (i32, i32) {
    %c0_i32 = arith.constant 0 : i32
    %c0_i32_0 = arith.constant 0 : i32
    return %c0_i32, %arg0 : i32, i32
  }
  func.func @transform_3(%arg0: i32) -> (i32, i32) {
    %c0_i32 = arith.constant 0 : i32
    %c0_i32_0 = arith.constant 0 : i32
    return %c0_i32, %arg0 : i32, i32
  }
  func.func @transform_4(%arg0: i32) -> (i32, i32) {
    %c0_i32 = arith.constant 0 : i32
    %c0_i32_0 = arith.constant 0 : i32
    return %arg0, %c0_i32 : i32, i32
  }
  func.func @transform_5(%arg0: i32) -> (i32, i32) {
    %c0_i32 = arith.constant 0 : i32
    %c0_i32_0 = arith.constant 0 : i32
    %c0_i32_1 = arith.constant 0 : i32
    return %c0_i32, %c0_i32_0 : i32, i32
  }
  func.func @transform_6(%arg0: i32) -> (i32, i32) {
    %c0_i32 = arith.constant 0 : i32
    %c0_i32_0 = arith.constant 0 : i32
    %c0_i32_1 = arith.constant 0 : i32
    return %c0_i32, %c0_i32_0 : i32, i32
  }
  func.func @transform_7(%arg0: i32) -> (i32, i32) {
    %c0_i32 = arith.constant 0 : i32
    %c0_i32_0 = arith.constant 0 : i32
    %c0_i32_1 = arith.constant 0 : i32
    return %c0_i32, %c0_i32_0 : i32, i32
  }
  func.func @transform_8(%arg0: i32) -> (i32, i32) {
    %c0_i32 = arith.constant 0 : i32
    %c0_i32_0 = arith.constant 0 : i32
    %c0_i32_1 = arith.constant 0 : i32
    return %c0_i32, %c0_i32_0 : i32, i32
  }
  func.func @transform_9(%arg0: i32) -> (i32, i32) {
    %c0_i32 = arith.constant 0 : i32
    %c0_i32_0 = arith.constant 0 : i32
    %c0_i32_1 = arith.constant 0 : i32
    return %c0_i32, %c0_i32_0 : i32, i32
  }
}

</mosaic_0001>

<bundles_post_ra>
// kernel: tpu_custom_call.1
= control target key start
LH: loop header
LB: loop body
LE: loop exit
PB: predicated region body
PF: predicated region fallthrough
CT: control target
= control target key end

     0   :  { %s11073_s0 = inlined_call_operand.hbm [shape: bf16[32,1024], index: 0, kind: input, shape index: {}]   ;;  %s11074_s1 = inlined_call_operand.hbm [shape: bf16[32,1024], index: 1, kind: input, shape index: {}]   ;;  %s11075_s2 = inlined_call_operand.hbm [shape: bf16[1024,1024], index: 2, kind: input, shape index: {}]   ;;  %s11076_s3 = inlined_call_operand.hbm [shape: bf16[1024,1024], index: 3, kind: input, shape index: {}]   ;;  %s11077_s4 = inlined_call_operand.hbm [shape: bf16[1024,128], index: 4, kind: input, shape index: {}]   ;;  %s11078_s5 = inlined_call_operand.hbm [shape: bf16[128,128], index: 5, kind: input, shape index: {}]   ;;  %s11079_s6 = inlined_call_operand.hbm [shape: bf16[128,128], index: 6, kind: input, shape index: {}]   ;;  %s11080_s7 = inlined_call_operand.hbm [shape: f32[8,128], index: 7, kind: input, shape index: {}]   ;;  %s11081_s8 = inlined_call_operand.hbm [shape: f32[32,128], index: 8, kind: output, shape index: {0}]   ;;  %s11082_s9 = inlined_call_operand.hbm [shape: f32[32,128], index: 9, kind: output, shape index: {1}]  }
   0x1   :  { %11092 = sst [smem:[#allocation28_spill]] %s11073_s0 }
   0x2   :  { %11093 = sst [smem:[#allocation29_spill]] %s11074_s1 }
   0x3   :  { %11094 = sst [smem:[#allocation30_spill]] %s11075_s2 }
   0x4   :  { %11095 = sst [smem:[#allocation31_spill]] %s11081_s8 }
   0x5   :  { %11096 = sst [smem:[#allocation32_spill]] %s11082_s9 }
   0x6   :  { %15 = vsyncpa [#allocation3], 0 }
   0x7   :  { %16 = vsyncpa [#allocation6], 0 }
   0x8   :  { %17 = vsyncpa [#allocation12], 0 }
   0x9   :  { %18 = vsyncpa [#allocation4], 0 }
   0xa   :  { %19 = vsyncpa [#allocation16], 0  ;;  %s9392_s30 = smov 0   ;;  %s9394_s10 = smov 0  }
   0xb   :  { %s9396_s11 = smov 0   ;;  %s9398_s12 = smov 0  }
   0xc LB: > { %s9411_s13 = sadd.s32 4294967295, %s9323_s12   ;;  %p87_p0 = scmp.ne.s32.totalorder %s9315_s10, %s9311_s30  ;;  %s9323_s12 = sphi %s9398_s12, %s11118_s12   ;;  %s9319_s11 = sphi %s9396_s11, %s11122_s11   ;;  %s9315_s10 = sphi %s9394_s10, %s11121_s10   ;;  %s9311_s30 = sphi %s9392_s30, %s11120_s30  }
   0xd   : > { %p88_p1 = scmp.eq.s32.totalorder %s9411_s13, 0  ;;  %p5811_p2 = scmp.ge.s32.totalorder %s9323_s12, 1 }
   0xe   : > { %p255_p3 = scmp.lt.s32.totalorder %s9323_s12, 3  ;;  %p5812_p4 = scmp.ne.s32.totalorder %s9411_s13, 0 }
   0xf   : > { %p9420_p5 = por %p88_p1, %p87_p0  ;;  %s11098_s0 = sld [smem:[#allocation28_spill]] }
  0x10   : > { %p9427_p6 = pnand %p5811_p2, %p255_p3  ;;  %s9325_s19 = smov [#allocation2]  }
  0x11   : > { %s268_s20 = sshll.u32 %s9325_s19, 4  ;;  %s9440_s22 = sadd.s32 1, %s9323_s12   ;;  %s269_s20 = int_to_ptr.vmem [resolvable:$true] %s268_s20 }
  0x12   : > { %p8860_p7 = pneg %p9427_p6  ;;  %11101 = sst [smem:[#allocation24_spill]] %s9440_s22 }
  0x13   : > { %s11084_s23 = smov 512   ;;  %s11083_s24 = smov 32  }
  0x14   : > { %p9435_p8 = pnand %p8860_p7, %p88_p1  ;;  %s71_s25 = ssub.s32 %s9323_s12, %s9440_s22 }
  0x15   : > { %s266_s17 = sshll.u32 %s11098_s0, 4  ;;  %s74_s26 = sadd.s32 1, %s9319_s11  ;;  %s267_s17 = int_to_ptr.hbm [resolvable:$true] %s266_s17 }
  0x16   : > { %8863 = dma.hbm_to_vmem [thread:$0]  (!%p9435_p8), %s267_s17, 2048, %s269_s20, [#allocation3], %s11084_s23, %s11084_s23, %s11083_s24  }
  0x17   : > { %p72_p9 = scmp.eq.s32.totalorder %s71_s25, 0  ;;  %p81_p10 = scmp.ne.s32.totalorder %s9319_s11, %s9315_s10 }
  0x18   : > { %p82_p11 = scmp.eq.s32.totalorder %s9323_s12, 0  ;;  %p8891_p12 = scmp.lt.s32.totalorder %s9323_s12, 2 }
  0x19   : > { %s9455_s27 = scalar_select %p72_p9, %s9319_s11, %s74_s26  }
  0x1a   : > { %p83_p13 = por %p82_p11, %p81_p10  ;;  %s336_s28 = sand.u32 1, %s9323_s12  }
  0x1b   : > { %11102 = sst [smem:[#allocation25_spill]] %s9455_s27  ;;  %s11086_s29 = sand.u32 1, %s9319_s11  }
  0x1c   : > { %s9461_s30 = sshll.u32 %s11086_s29, 11  ;;  %s11087_s15 = sshll.u32 %s9323_s12, 4 }
  0x1d   : > { %s11103_s2 = sld [smem:[#allocation30_spill]]  ;;  %s340_s25 = scalar_lea.vmem [#allocation7], %s9461_s30 }
  0x1e   : > { %s348_s24 = sshll.u32 %s340_s25, 4  ;;  %p9472_p0 = pnand %p8891_p12, %p83_p13  ;;  %s349_s24 = int_to_ptr.vmem [resolvable:$true] %s348_s24 }
  0x1f   : > { %s11105_s1 = sld [smem:[#allocation29_spill]]  ;;  %s9479_s27 = scalar_lea.sflag [#allocation3], %s336_s28 }
  0x20   : > { %p9003_p3 = pneg %p9472_p0 }
  0x23   : > { %s345_s19 = scalar_lea.hbm %s11103_s2, %s11087_s15  ;;  %s9006_s23 = scalar_lea.hbm %s11103_s2, 4096 }
  0x24   : > { %s346_s20 = sshll.u32 %s345_s19, 4  ;;  %s347_s20 = int_to_ptr.hbm [resolvable:$true] %s346_s20 }
  0x25   : > { %s280_s0 = sshll.u32 %s11105_s1, 4  ;;  %s8999_s16 = sshra.s32 %s347_s20, 4  ;;  %s281_s0 = int_to_ptr.hbm [resolvable:$true] %s280_s0  ;;  %s9000_s16 = int_to_ptr.hbm [resolvable:$true] %s8999_s16 }
  0x26   : > { %s9001_s17 = scalar_lea.hbm %s9000_s16, 2048  ;;  %p9007_p10 = scmp.lt.s32.totalorder %s9000_s16, %s11103_s2 }
  0x27   : > { %p9002_p2 = scmp.ne.s32.totalorder %s9000_s16, %s9001_s17  ;;  %p9008_p11 = scmp.lt.s32.totalorder %s9006_s23, %s9001_s17 }
  0x29   : > { %p9004_p7 = pnand %p9003_p3, %p9002_p2  ;;  %p9009_p12 = por %p9008_p11, %p9007_p10 }
  0x2b   : > { %p9005_p9 = pneg %p9004_p7 }
  0x2d   : > { %p9010_p13 = pnand %p9009_p12, %p9005_p9 }
  0x2f   : > { %9013 = shalt.err (!%p9010_p13)
}
  0x30   : > { %s11090_s28 = smov 256   ;;  %s11091_s1 = smov 16  }
  0x31   : > { %s11106_s19 = smov 512   ;;  %s9330_s25 = smov [#allocation5]  }
  0x32   : > { %8879 = dma.hbm_to_vmem [thread:$0]  (!%p9472_p0), %s347_s20, 32768, %s349_s24, %s9479_s27, %s11106_s19, %s11090_s28, %s11091_s1  }
  0x33   : > { %s282_s15 = sshll.u32 %s9330_s25, 4  ;;  %s308_s23 = sshll.u32 %s11079_s6, 4  ;;  %s283_s15 = int_to_ptr.vmem [resolvable:$true] %s282_s15  ;;  %s309_s23 = int_to_ptr.hbm [resolvable:$true] %s308_s23 }
  0x34   : > { %s11107_s29 = smov 32   ;;  %s9331_s2 = smov [#allocation11]  }
  0x35   : > { %8866 = dma.hbm_to_vmem [thread:$0]  (!%p9435_p8), %s281_s0, 2048, %s283_s15, [#allocation6], %s11106_s19, %s11106_s19, %s11107_s29  }
  0x36   : > { %s310_s22 = sshll.u32 %s9331_s2, 4  ;;  %s11108_s9 = sshll.u32 %s9323_s12, 4  ;;  %s311_s22 = int_to_ptr.vmem [resolvable:$true] %s310_s22 }
  0x37   : > { %s367_s20 = scalar_lea.hbm %s11076_s3, %s11108_s9  ;;  %s9332_s25 = smov 64  }
  0x38   : > { %s9333_s28 = smov 4   ;;  %s368_s16 = sshll.u32 %s367_s20, 4  ;;  %s369_s16 = int_to_ptr.hbm [resolvable:$true] %s368_s16 }
  0x39   : > { %8872 = dma.hbm_to_vmem [thread:$0]  (!%p9435_p8), %s309_s23, 1024, %s311_s22, [#allocation12], %s9332_s25, %s9332_s25, %s9333_s28  }
  0x3a   : > { %s362_s17 = scalar_lea.vmem [#allocation8], %s9461_s30  ;;  %s9089_s15 = sshra.s32 %s369_s16, 4  ;;  %s9090_s15 = int_to_ptr.hbm [resolvable:$true] %s9089_s15 }
  0x3b   : > { %s370_s0 = sshll.u32 %s362_s17, 4  ;;  %s9091_s2 = scalar_lea.hbm %s9090_s15, 2048  ;;  %s371_s0 = int_to_ptr.vmem [resolvable:$true] %s370_s0 }
  0x3c   : > { %p9092_p2 = scmp.ne.s32.totalorder %s9090_s15, %s9091_s2  ;;  %s9096_s29 = scalar_lea.hbm %s11076_s3, 4096 }
  0x3d   : > { %p9097_p10 = scmp.lt.s32.totalorder %s9090_s15, %s11076_s3  ;;  %p9098_p11 = scmp.lt.s32.totalorder %s9096_s29, %s9091_s2 }
  0x3e   : > { %p9094_p7 = pnand %p9092_p2, %p9003_p3 }
  0x3f   : > { %p9099_p12 = por %p9098_p11, %p9097_p10 }
  0x40   : > { %p9095_p9 = pneg %p9094_p7 }
  0x42   : > { %p9100_p13 = pnand %p9099_p12, %p9095_p9 }
  0x44   : > { %9103 = shalt.err (!%p9100_p13)
}
  0x45   : > { %s11109_s22 = smov 16   ;;  %s11110_s30 = smov 256  }
  0x46   : > { %8882 = dma.hbm_to_vmem [thread:$0]  (!%p9472_p0), %s369_s16, 32768, %s371_s0, %s9479_s27, %s11106_s19, %s11110_s30, %s11109_s22  }
  0x47   : > { %s294_s1 = sshll.u32 %s11078_s5, 4  ;;  %s9334_s17 = smov [#allocation10]   ;;  %s295_s1 = int_to_ptr.hbm [resolvable:$true] %s294_s1 }
  0x48   : > { %s296_s15 = sshll.u32 %s9334_s17, 4  ;;  %s323_s9 = sshll.u32 %s11080_s7, 4  ;;  %s297_s15 = int_to_ptr.vmem [resolvable:$true] %s296_s15  ;;  %s324_s9 = int_to_ptr.hbm [resolvable:$true] %s323_s9 }
  0x49   : > { %8869 = dma.hbm_to_vmem [thread:$0]  (!%p9435_p8), %s295_s1, 1024, %s297_s15, [#allocation6], %s9332_s25, %s9332_s25, %s9333_s28  }
  0x4a   : > { %s9335_s29 = smov [#allocation13]   ;;  %s11111_s16 = sand.u32 1, %s9319_s11  }
  0x4b   : > { %s325_s19 = sshll.u32 %s9335_s29, 4  ;;  %s5824_s0 = sshll.u32 %s11111_s16, 8  ;;  %s326_s19 = int_to_ptr.vmem [resolvable:$true] %s325_s19 }
  0x4c   : > { %8875 = dma.hbm_to_vmem [thread:$0]  (!%p9435_p8), %s324_s9, 128, %s326_s19, [#allocation12]  }
  0x4d   : > { %s8215_s24 = sshll.u32 %s9323_s12, 8  ;;  %s384_s22 = scalar_lea.vmem [#allocation9], %s5824_s0 }
  0x4e   : > { %s392_s30 = sshll.u32 %s384_s22, 4  ;;  %s389_s17 = scalar_lea.hbm %s11077_s4, %s8215_s24  ;;  %s393_s30 = int_to_ptr.vmem [resolvable:$true] %s392_s30 }
  0x4f   : > { %s390_s2 = sshll.u32 %s389_s17, 4  ;;  %s9186_s12 = scalar_lea.hbm %s11077_s4, 512  ;;  %s391_s2 = int_to_ptr.hbm [resolvable:$true] %s390_s2 }
  0x50   : > { %s9179_s1 = sshra.s32 %s391_s2, 4  ;;  %s9180_s1 = int_to_ptr.hbm [resolvable:$true] %s9179_s1 }
  0x51   : > { %s9181_s15 = scalar_lea.hbm %s9180_s1, 256  ;;  %p9187_p8 = scmp.lt.s32.totalorder %s9180_s1, %s11077_s4 }
  0x52   : > { %p9182_p2 = scmp.ne.s32.totalorder %s9180_s1, %s9181_s15  ;;  %p9188_p10 = scmp.lt.s32.totalorder %s9186_s12, %s9181_s15 }
  0x54   : > { %p9184_p7 = pnand %p9182_p2, %p9003_p3  ;;  %p9189_p11 = por %p9188_p10, %p9187_p8 }
  0x56   : > { %p9185_p9 = pneg %p9184_p7 }
  0x58   : > { %p9190_p12 = pnand %p9189_p11, %p9185_p9 }
  0x5a   : > { %9193 = shalt.err (!%p9190_p12)
}
  0x5b   : > { %8885 = dma.hbm_to_vmem [thread:$0]  (!%p9472_p0), %s391_s2, 4096, %s393_s30, %s9479_s27, %s9332_s25, %s9332_s25, %s9333_s28  }
  0x5c   : > { %404 = sbr.rel (%p9427_p6) target bundleno = 1464 (0x5b8), region = 52 }
  0x61   : > { %9282 = dma.done.wait (%p88_p1), [#allocation3], 2048  }
  0x62   : > { %9284 = vsyncadd (%p88_p1), [#allocation3], 4294965248 }
  0x63   : > { %9286 = dma.done.wait (%p88_p1), [#allocation6], 2048  }
  0x64   : > { %9288 = vsyncadd (%p88_p1), [#allocation6], 4294965248  ;;  %s416_s26 = sand.u32 1, %s9411_s13   ;;  %s418_s27 = sand.u32 1, %s9315_s10  }
  0x65   : > { %s5830_s28 = sshll.u32 %s418_s27, 11  ;;  %s417_s18 = scalar_lea.sflag [#allocation3], %s416_s26 }
  0x66   : > { %s9578_s25 = scalar_lea.vmem [#allocation7], %s5830_s28 }
  0x67   : > { %9290 = dma.done.wait (%p9420_p5), %s417_s18, 69632  }
  0x68   : > { %9292 = vsyncadd (%p9420_p5), %s417_s18, 4294897664  ;;  %s5832_s19 = sshll.u32 %s418_s27, 8  ;;  %s9584_s16 = scalar_lea.vmem [#allocation8], %s5830_s28 }
  0x69   : > { %s9586_s0 = scalar_lea.vmem [#allocation9], %s5832_s19 }
  0x6a   : > { %9294 = dma.done.wait (%p88_p1), [#allocation6], 1024  }
  0x6b   : > { %9296 = vsyncadd (%p88_p1), [#allocation6], 4294966272 }
  0x6c   : > { %9298 = dma.done.wait (%p88_p1), [#allocation12], 1152  }
  0x6d   : > { %9300 = vsyncadd (%p88_p1), [#allocation12], 4294966144  ;;  %502 = sbr.rel (%p5812_p4) target bundleno = 119 (0x77), region = 88 }
  0x72   : > { %v9336_v0 = vmov 0.0  }
  0x73   : > { %503 = vst [vmem:[#allocation14] sm:$0xff] %v9336_v0 }
  0x74   : > { %504 = vst [vmem:[#allocation14 + $0x8] sm:$0xff] %v9336_v0 }
  0x75   : > { %505 = vst [vmem:[#allocation14 + $0x10] sm:$0xff] %v9336_v0 }
  0x76   : > { %506 = vst [vmem:[#allocation14 + $0x18] sm:$0xff] %v9336_v0 }
  0x77 PF: > { %v6015_v1 = vld [vmem:[%s9578_s25 + $0xe0] sm:$0xf]  ;;  %v8262_v2 = vld [vmem:[%s9578_s25 + $0xec] sm:$0xf0]  ;;  %p8141_p1 = scmp.ne.s32.totalorder %s9411_s13, 1 }
  0x78   : > { %v6143_v3 = vld [vmem:[%s9578_s25 + $0x1e0] sm:$0xf]  ;;  %v6016_v4 = vor.u32 %v8262_v2, %v6015_v1  ;;  %v8294_v5 = vld [vmem:[%s9578_s25 + $0x1ec] sm:$0xf0] }
  0x79   : > { %v6271_v6 = vld [vmem:[%s9578_s25 + $0x2e0] sm:$0xf]  ;;  %v8326_v7 = vld [vmem:[%s9578_s25 + $0x2ec] sm:$0xf0]  ;;  %v6144_v8 = vor.u32 %v8294_v5, %v6143_v3 }
  0x7a   : > { %v6272_v9 = vor.u32 %v8326_v7, %v6271_v6  ;;  %v6399_v10 = vld [vmem:[%s9578_s25 + $0x3e0] sm:$0xf]  ;;  %v8358_v11 = vld [vmem:[%s9578_s25 + $0x3ec] sm:$0xf0]  ;;  %2139 = vmatpush.bf16.msra.mxu0 %v6016_v4 }
  0x7b   : > { %v5999_v12 = vld [vmem:[%s9578_s25 + $0xc0] sm:$0xf]  ;;  %v6400_v13 = vor.u32 %v8358_v11, %v6399_v10  ;;  %v8258_v14 = vld [vmem:[%s9578_s25 + $0xcc] sm:$0xf0]  ;;  %2158 = vmatpush.bf16.msra.mxu1 %v6144_v8 }
  0x7c   : > { %v6127_v15 = vld [vmem:[%s9578_s25 + $0x1c0] sm:$0xf]  ;;  %v8290_v16 = vld [vmem:[%s9578_s25 + $0x1cc] sm:$0xf0]  ;;  %2177 = vmatpush.bf16.msra.mxu2 %v6272_v9  ;;  %v6000_v17 = vor.u32 %v8258_v14, %v5999_v12 }
  0x7d   : > { %v6128_v18 = vor.u32 %v8290_v16, %v6127_v15  ;;  %v6255_v19 = vld [vmem:[%s9578_s25 + $0x2c0] sm:$0xf]  ;;  %v8322_v20 = vld [vmem:[%s9578_s25 + $0x2cc] sm:$0xf0]  ;;  %2196 = vmatpush.bf16.msra.mxu3 %v6400_v13 }
  0x7e   : > { %v6383_v21 = vld [vmem:[%s9578_s25 + $0x3c0] sm:$0xf]  ;;  %v6256_v22 = vor.u32 %v8322_v20, %v6255_v19  ;;  %v8354_v23 = vld [vmem:[%s9578_s25 + $0x3cc] sm:$0xf0]  ;;  %2140 = vmatpush.bf16.msra.mxu0 %v6000_v17 }
  0x7f   : > { %v5983_v24 = vld [vmem:[%s9578_s25 + $0xa0] sm:$0xf]  ;;  %v8254_v25 = vld [vmem:[%s9578_s25 + $0xac] sm:$0xf0]  ;;  %v6384_v26 = vor.u32 %v8354_v23, %v6383_v21  ;;  %2159 = vmatpush.bf16.msra.mxu1 %v6128_v18 }
  0x80   : > { %v6111_v27 = vld [vmem:[%s9578_s25 + $0x1a0] sm:$0xf]  ;;  %v8286_v28 = vld [vmem:[%s9578_s25 + $0x1ac] sm:$0xf0]  ;;  %v5984_v30 = vor.u32 %v8254_v25, %v5983_v24  ;;  %2178 = vmatpush.bf16.msra.mxu2 %v6256_v22 }
  0x81   : > { %v6239_v29 = vld [vmem:[%s9578_s25 + $0x2a0] sm:$0xf]  ;;  %v8318_v31 = vld [vmem:[%s9578_s25 + $0x2ac] sm:$0xf0]  ;;  %v6112_v34 = vor.u32 %v8286_v28, %v6111_v27  ;;  %2197 = vmatpush.bf16.msra.mxu3 %v6384_v26 }
  0x82   : > { %v6367_v32 = vld [vmem:[%s9578_s25 + $0x3a0] sm:$0xf]  ;;  %v8350_v33 = vld [vmem:[%s9578_s25 + $0x3ac] sm:$0xf0]  ;;  %v6240_v35 = vor.u32 %v8318_v31, %v6239_v29  ;;  %2141 = vmatpush.bf16.msra.mxu0 %v5984_v30  ;;  %v8216_v31 = vld [vmem:[#allocation2 + $0x4] sm:$0xf] }
  0x83   : > { %v5967_v36 = vld [vmem:[%s9578_s25 + $0x80] sm:$0xf]  ;;  %v8250_v37 = vld [vmem:[%s9578_s25 + $0x8c] sm:$0xf0]  ;;  %v6368_v39 = vor.u32 %v8350_v33, %v6367_v32  ;;  %2160 = vmatpush.bf16.msra.mxu1 %v6112_v34  ;;  %v5841_v32 = vld [vmem:[#allocation2 + $0x20] sm:$0xf0] }
  0x84   : > { %v6095_v38 = vld [vmem:[%s9578_s25 + $0x180] sm:$0xf]  ;;  %v8282_v40 = vld [vmem:[%s9578_s25 + $0x18c] sm:$0xf0]  ;;  %v5968_v45 = vor.u32 %v8250_v37, %v5967_v36  ;;  %2179 = vmatpush.bf16.msra.mxu2 %v6240_v35  ;;  %v5847_v36 = vld [vmem:[#allocation2 + $0x8] sm:$0xf] }
  0x85   : > { %v6223_v41 = vld [vmem:[%s9578_s25 + $0x280] sm:$0xf]  ;;  %v8314_v42 = vld [vmem:[%s9578_s25 + $0x28c] sm:$0xf0]  ;;  %v6096_v46 = vor.u32 %v8282_v40, %v6095_v38  ;;  %2198 = vmatpush.bf16.msra.mxu3 %v6368_v39 }
  0x86   : > { %v6351_v43 = vld [vmem:[%s9578_s25 + $0x380] sm:$0xf]  ;;  %v8346_v44 = vld [vmem:[%s9578_s25 + $0x38c] sm:$0xf0]  ;;  %v6224_v47 = vor.u32 %v8314_v42, %v6223_v41  ;;  %2142 = vmatpush.bf16.msra.mxu0 %v5968_v45  ;;  %v8221_v41 = vld [vmem:[#allocation2 + $0x24] sm:$0xf0] }
  0x87   : > { %v5951_v48 = vld [vmem:[%s9578_s25 + $0x60] sm:$0xf]  ;;  %v8246_v49 = vld [vmem:[%s9578_s25 + $0x6c] sm:$0xf0]  ;;  %v6352_v51 = vor.u32 %v8346_v44, %v6351_v43  ;;  %2161 = vmatpush.bf16.msra.mxu1 %v6096_v46  ;;  %v8217_v42 = vld [vmem:[#allocation2 + $0xc] sm:$0xf] }
  0x88   : > { %v6079_v50 = vld [vmem:[%s9578_s25 + $0x160] sm:$0xf]  ;;  %v8278_v52 = vld [vmem:[%s9578_s25 + $0x16c] sm:$0xf0]  ;;  %v5952_v57 = vor.u32 %v8246_v49, %v5951_v48  ;;  %2180 = vmatpush.bf16.msra.mxu2 %v6224_v47  ;;  %v5849_v43 = vld [vmem:[#allocation2 + $0x28] sm:$0xf0] }
  0x89   : > { %v6207_v53 = vld [vmem:[%s9578_s25 + $0x260] sm:$0xf]  ;;  %v8310_v54 = vld [vmem:[%s9578_s25 + $0x26c] sm:$0xf0]  ;;  %v6080_v58 = vor.u32 %v8278_v52, %v6079_v50  ;;  %2199 = vmatpush.bf16.msra.mxu3 %v6352_v51 }
  0x8a   : > { %v6335_v55 = vld [vmem:[%s9578_s25 + $0x360] sm:$0xf]  ;;  %v8342_v56 = vld [vmem:[%s9578_s25 + $0x36c] sm:$0xf0]  ;;  %v6208_v59 = vor.u32 %v8310_v54, %v6207_v53  ;;  %2143 = vmatpush.bf16.msra.mxu0 %v5952_v57  ;;  %v9674_v54 = vor.u32 %v8216_v31, %v5841_v32 }
  0x8b   : > { %v5935_v60 = vld [vmem:[%s9578_s25 + $0x40] sm:$0xf]  ;;  %v8242_v61 = vld [vmem:[%s9578_s25 + $0x4c] sm:$0xf0]  ;;  %v6336_v63 = vor.u32 %v8342_v56, %v6335_v55  ;;  %2162 = vmatpush.bf16.msra.mxu1 %v6080_v58  ;;  %v9676_v55 = vor.u32 %v8221_v41, %v5847_v36  ;;  %v9680_v58 = vor.u32 %v8217_v42, %v5849_v43 }
  0x8c   : > { %v6063_v62 = vld [vmem:[%s9578_s25 + $0x140] sm:$0xf]  ;;  %v8274_v0 = vld [vmem:[%s9578_s25 + $0x14c] sm:$0xf0]  ;;  %v5936_v5 = vor.u32 %v8242_v61, %v5935_v60  ;;  %2181 = vmatpush.bf16.msra.mxu2 %v6208_v59 }
  0x8d   : > { %v6191_v1 = vld [vmem:[%s9578_s25 + $0x240] sm:$0xf]  ;;  %v8306_v2 = vld [vmem:[%s9578_s25 + $0x24c] sm:$0xf0]  ;;  %v6064_v6 = vor.u32 %v8274_v0, %v6063_v62  ;;  %2200 = vmatpush.bf16.msra.mxu3 %v6336_v63 }
  0x8e   : > { %v6319_v3 = vld [vmem:[%s9578_s25 + $0x340] sm:$0xf]  ;;  %v8338_v4 = vld [vmem:[%s9578_s25 + $0x34c] sm:$0xf0]  ;;  %v6192_v7 = vor.u32 %v8306_v2, %v6191_v1  ;;  %2144 = vmatpush.bf16.msra.mxu0 %v5936_v5 }
  0x8f   : > { %v5919_v8 = vld [vmem:[%s9578_s25 + $0x20] sm:$0xf]  ;;  %v8238_v9 = vld [vmem:[%s9578_s25 + $0x2c] sm:$0xf0]  ;;  %v6320_v11 = vor.u32 %v8338_v4, %v6319_v3  ;;  %2163 = vmatpush.bf16.msra.mxu1 %v6064_v6 }
  0x90   : > { %v6047_v10 = vld [vmem:[%s9578_s25 + $0x120] sm:$0xf]  ;;  %v8270_v12 = vld [vmem:[%s9578_s25 + $0x12c] sm:$0xf0]  ;;  %v5920_v18 = vor.u32 %v8238_v9, %v5919_v8  ;;  %2182 = vmatpush.bf16.msra.mxu2 %v6192_v7 }
  0x91   : > { %v6175_v13 = vld [vmem:[%s9578_s25 + $0x220] sm:$0xf]  ;;  %v8302_v14 = vld [vmem:[%s9578_s25 + $0x22c] sm:$0xf0]  ;;  %v6048_v22 = vor.u32 %v8270_v12, %v6047_v10  ;;  %2201 = vmatpush.bf16.msra.mxu3 %v6320_v11 }
  0x92   : > { %v6303_v15 = vld [vmem:[%s9578_s25 + $0x320] sm:$0xf]  ;;  %v8334_v16 = vld [vmem:[%s9578_s25 + $0x32c] sm:$0xf0]  ;;  %v6176_v23 = vor.u32 %v8302_v14, %v6175_v13  ;;  %2145 = vmatpush.bf16.msra.mxu0 %v5920_v18 }
  0x93   : > { %v5903_v17 = vld [vmem:[%s9578_s25] sm:$0xf]  ;;  %v8234_v19 = vld [vmem:[%s9578_s25 + $0xc] sm:$0xf0]  ;;  %v6304_v27 = vor.u32 %v8334_v16, %v6303_v15  ;;  %2164 = vmatpush.bf16.msra.mxu1 %v6048_v22 }
  0x94   : > { %v6031_v20 = vld [vmem:[%s9578_s25 + $0x100] sm:$0xf]  ;;  %v8266_v21 = vld [vmem:[%s9578_s25 + $0x10c] sm:$0xf0]  ;;  %v5904_v35 = vor.u32 %v8234_v19, %v5903_v17  ;;  %2183 = vmatpush.bf16.msra.mxu2 %v6176_v23 }
  0x95   : > { %v6159_v24 = vld [vmem:[%s9578_s25 + $0x200] sm:$0xf]  ;;  %v8298_v25 = vld [vmem:[%s9578_s25 + $0x20c] sm:$0xf0]  ;;  %v6032_v39 = vor.u32 %v8266_v21, %v6031_v20  ;;  %2202 = vmatpush.bf16.msra.mxu3 %v6304_v27 }
  0x96   : > { %v6287_v26 = vld [vmem:[%s9578_s25 + $0x300] sm:$0xf]  ;;  %v8330_v28 = vld [vmem:[%s9578_s25 + $0x30c] sm:$0xf0]  ;;  %v6160_v40 = vor.u32 %v8298_v25, %v6159_v24  ;;  %2146 = vmatpush.bf16.msra.mxu0 %v5904_v35 }
  0x97   : > { %v5839_v29 = vld [vmem:[#allocation2] sm:$0xf]  ;;  %v8454_v34 = vld [vmem:[%s9578_s25 + $0x6ec] sm:$0xf0]  ;;  %v6288_v44 = vor.u32 %v8330_v28, %v6287_v26  ;;  %2165 = vmatpush.bf16.msra.mxu1 %v6032_v39  ;;  %v5881_v39 = vld [vmem:[#allocation2 + $0x68] sm:$0xf0] }
  0x98   : > { %v8220_v30 = vld [vmem:[#allocation2 + $0x1c] sm:$0xf0]  ;;  %v8422_v38 = vld [vmem:[%s9578_s25 + $0x5ec] sm:$0xf0]  ;;  %2184 = vmatpush.bf16.msra.mxu2 %v6160_v40 }
  0x99   : > { %v6783_v33 = vld [vmem:[%s9578_s25 + $0x6e0] sm:$0xf]  ;;  %v8390_v47 = vld [vmem:[%s9578_s25 + $0x4ec] sm:$0xf0]  ;;  %v9669_v49 = vor.u32 %v8220_v30, %v5839_v29  ;;  %2203 = vmatpush.bf16.msra.mxu3 %v6288_v44  ;;  %v8224_v29 = vld [vmem:[#allocation2 + $0x44] sm:$0xf] }
  0x9a   : > { %v6655_v37 = vld [vmem:[%s9578_s25 + $0x5e0] sm:$0xf]  ;;  %v6784_v45 = vor.u32 %v8454_v34, %v6783_v33  ;;  %v8486_v51 = vld [vmem:[%s9578_s25 + $0x7ec] sm:$0xf0]  ;;  %2166 = vmatmul.bf16.vlgmr.msra.gmra.mxu1 %v9674_v54  ;;  %v5873_v30 = vld [vmem:[#allocation2 + $0x60] sm:$0xf0] }
  0x9b   : > { %v6527_v46 = vld [vmem:[%s9578_s25 + $0x4e0] sm:$0xf]  ;;  %v6656_v50 = vor.u32 %v8422_v38, %v6655_v37  ;;  %v8450_v53 = vld [vmem:[%s9578_s25 + $0x6cc] sm:$0xf0]  ;;  %2147 = vmatmul.bf16.vlgmr.msra.gmra.mxu0 %v9669_v49  ;;  %2185 = vmatmul.bf16.vlgmr.msra.gmra.mxu2 %v9676_v55  ;;  %v5879_v33 = vld [vmem:[#allocation2 + $0x48] sm:$0xf] }
  0x9c   : > { %v6911_v48 = vld [vmem:[%s9578_s25 + $0x7e0] sm:$0xf]  ;;  %v8418_v57 = vld [vmem:[%s9578_s25 + $0x5cc] sm:$0xf0]  ;;  %v6528_v59 = vor.u32 %v8390_v47, %v6527_v46  ;;  %2253 = vmatpush.bf16.msrb.mxu2 %v6784_v45  ;;  %2204 = vmatmul.bf16.vlgmr.msra.gmra.mxu3 %v9680_v58  ;;  %v8229_v37 = vld [vmem:[#allocation2 + $0x64] sm:$0xf0] }
  0x9d   : > { %v6767_v52 = vld [vmem:[%s9578_s25 + $0x6c0] sm:$0xf]  ;;  %v6912_v60 = vor.u32 %v8486_v51, %v6911_v48  ;;  %v8386_v63 = vld [vmem:[%s9578_s25 + $0x4cc] sm:$0xf0]  ;;  %2234 = vmatpush.bf16.msrb.mxu1 %v6656_v50  ;;  %v8225_v38 = vld [vmem:[#allocation2 + $0x4c] sm:$0xf]  ;;  %v9718_v51 = vor.u32 %v8224_v29, %v5873_v30 }
  0x9e   : > { %v6639_v56 = vld [vmem:[%s9578_s25 + $0x5c0] sm:$0xf]  ;;  %v6768_v61 = vor.u32 %v8450_v53, %v6767_v52  ;;  %v8482_v2 = vld [vmem:[%s9578_s25 + $0x7cc] sm:$0xf0]  ;;  %2215 = vmatpush.bf16.msrb.mxu0 %v6528_v59  ;;  %v9720_v52 = vor.u32 %v8229_v37, %v5879_v33  ;;  %v8218_v33 = vld [vmem:[#allocation2 + $0x14] sm:$0xf] }
  0x9f   : > { %v6511_v62 = vld [vmem:[%s9578_s25 + $0x4c0] sm:$0xf]  ;;  %v6640_v1 = vor.u32 %v8418_v57, %v6639_v56  ;;  %v8446_v4 = vld [vmem:[%s9578_s25 + $0x6ac] sm:$0xf0]  ;;  %2272 = vmatpush.bf16.msrb.mxu3 %v6912_v60  ;;  %v9724_v57 = vor.u32 %v8225_v38, %v5881_v39  ;;  %v6017_v37 = vld [vmem:[%s9578_s25 + $0xf0] sm:$0xf0] }
  0xa0   : > { %v6895_v0 = vld [vmem:[%s9578_s25 + $0x7c0] sm:$0xf]  ;;  %v8414_v6 = vld [vmem:[%s9578_s25 + $0x5ac] sm:$0xf0]  ;;  %v6512_v7 = vor.u32 %v8386_v63, %v6511_v62  ;;  %2254 = vmatpush.bf16.msrb.mxu2 %v6768_v61  ;;  %v8356_v38 = vld [vmem:[%s9578_s25 + $0x3e4] sm:$0xf] }
  0xa1   : > { %v6751_v3 = vld [vmem:[%s9578_s25 + $0x6a0] sm:$0xf]  ;;  %v6896_v8 = vor.u32 %v8482_v2, %v6895_v0  ;;  %v8382_v11 = vld [vmem:[%s9578_s25 + $0x4ac] sm:$0xf0]  ;;  %2235 = vmatpush.bf16.msrb.mxu1 %v6640_v1 }
  0xa2   : > { %v6623_v5 = vld [vmem:[%s9578_s25 + $0x5a0] sm:$0xf]  ;;  %v6752_v9 = vor.u32 %v8446_v4, %v6751_v3  ;;  %v8478_v14 = vld [vmem:[%s9578_s25 + $0x7ac] sm:$0xf0]  ;;  %2216 = vmatpush.bf16.msrb.mxu0 %v6512_v7 }
  0xa3   : > { %v6495_v10 = vld [vmem:[%s9578_s25 + $0x4a0] sm:$0xf]  ;;  %v6624_v13 = vor.u32 %v8414_v6, %v6623_v5  ;;  %v8442_v16 = vld [vmem:[%s9578_s25 + $0x68c] sm:$0xf0]  ;;  %2273 = vmatpush.bf16.msrb.mxu3 %v6896_v8 }
  0xa4   : > { %v6879_v12 = vld [vmem:[%s9578_s25 + $0x7a0] sm:$0xf]  ;;  %v8410_v18 = vld [vmem:[%s9578_s25 + $0x58c] sm:$0xf0]  ;;  %v6496_v19 = vor.u32 %v8382_v11, %v6495_v10  ;;  %2255 = vmatpush.bf16.msrb.mxu2 %v6752_v9 }
  0xa5   : > { %v6735_v15 = vld [vmem:[%s9578_s25 + $0x680] sm:$0xf]  ;;  %v8378_v21 = vld [vmem:[%s9578_s25 + $0x48c] sm:$0xf0]  ;;  %v6880_v23 = vor.u32 %v8478_v14, %v6879_v12  ;;  %2236 = vmatpush.bf16.msrb.mxu1 %v6624_v13 }
  0xa6   : > { %v6607_v17 = vld [vmem:[%s9578_s25 + $0x580] sm:$0xf]  ;;  %v6736_v24 = vor.u32 %v8442_v16, %v6735_v15  ;;  %v8474_v25 = vld [vmem:[%s9578_s25 + $0x78c] sm:$0xf0]  ;;  %2217 = vmatpush.bf16.msrb.mxu0 %v6496_v19  ;;  %v8324_v19 = vld [vmem:[%s9578_s25 + $0x2e4] sm:$0xf] }
  0xa7   : > { %v6479_v20 = vld [vmem:[%s9578_s25 + $0x480] sm:$0xf]  ;;  %v6608_v28 = vor.u32 %v8410_v18, %v6607_v17  ;;  %v8438_v32 = vld [vmem:[%s9578_s25 + $0x66c] sm:$0xf0]  ;;  %2274 = vmatpush.bf16.msrb.mxu3 %v6880_v23  ;;  %v8292_v23 = vld [vmem:[%s9578_s25 + $0x1e4] sm:$0xf] }
  0xa8   : > { %v6863_v22 = vld [vmem:[%s9578_s25 + $0x780] sm:$0xf]  ;;  %v8406_v35 = vld [vmem:[%s9578_s25 + $0x56c] sm:$0xf0]  ;;  %v6480_v36 = vor.u32 %v8378_v21, %v6479_v20  ;;  %2256 = vmatpush.bf16.msrb.mxu2 %v6736_v24  ;;  %v6273_v20 = vld [vmem:[%s9578_s25 + $0x2f0] sm:$0xf0] }
  0xa9   : > { %v5871_v26 = vld [vmem:[#allocation2 + $0x40] sm:$0xf]  ;;  %v6864_v40 = vor.u32 %v8474_v25, %v6863_v22  ;;  %v8374_v43 = vld [vmem:[%s9578_s25 + $0x46c] sm:$0xf0]  ;;  %2237 = vmatpush.bf16.msrb.mxu1 %v6608_v28  ;;  %v6145_v24 = vld [vmem:[%s9578_s25 + $0x1f0] sm:$0xf0] }
  0xaa   : > { %v8228_v27 = vld [vmem:[#allocation2 + $0x5c] sm:$0xf0]  ;;  %v8470_v47 = vld [vmem:[%s9578_s25 + $0x76c] sm:$0xf0]  ;;  %2218 = vmatpush.bf16.msrb.mxu0 %v6480_v36  ;;  %2171 = vmatmul.bf16.gmra.mxu1 %v9718_v51  ;;  %v8260_v36 = vld [vmem:[%s9578_s25 + $0xe4] sm:$0xf]  ;;  %v6148_v39 = vor.u32 %v8292_v23, %v6145_v24 }
  0xab   : > { %v6719_v31 = vld [vmem:[%s9578_s25 + $0x660] sm:$0xf]  ;;  %v9713_v45 = vor.u32 %v8228_v27, %v5871_v26  ;;  %v8434_v50 = vld [vmem:[%s9578_s25 + $0x64c] sm:$0xf0]  ;;  %2275 = vmatpush.bf16.msrb.mxu3 %v6864_v40  ;;  %2190 = vmatmul.bf16.gmra.mxu2 %v9720_v52  ;;  %v6401_v40 = vld [vmem:[%s9578_s25 + $0x3f0] sm:$0xf0] }
  0xac   : > { %v6591_v34 = vld [vmem:[%s9578_s25 + $0x560] sm:$0xf]  ;;  %v6720_v41 = vor.u32 %v8438_v32, %v6719_v31  ;;  %v8402_v56 = vld [vmem:[%s9578_s25 + $0x54c] sm:$0xf0]  ;;  %2209 = vmatmul.bf16.gmra.mxu3 %v9724_v57  ;;  %v5969_v23 = vld [vmem:[%s9578_s25 + $0x90] sm:$0xf0] }
  0xad   : > { %v6463_v42 = vld [vmem:[%s9578_s25 + $0x460] sm:$0xf]  ;;  %v6592_v46 = vor.u32 %v8406_v35, %v6591_v34  ;;  %v8370_v63 = vld [vmem:[%s9578_s25 + $0x44c] sm:$0xf0]  ;;  %2152 = vmatmul.bf16.gmra.mxu0 %v9713_v45  ;;  %v5857_v34 = vld [vmem:[#allocation2 + $0x30] sm:$0xf0]  ;;  %v6276_v35 = vor.u32 %v8324_v19, %v6273_v20 }
  0xae   : > { %v6847_v44 = vld [vmem:[%s9578_s25 + $0x760] sm:$0xf]  ;;  %v6464_v59 = vor.u32 %v8374_v43, %v6463_v42  ;;  %2257 = vmatpush.bf16.msrb.mxu2 %v6720_v41  ;;  %v8466_v2 = vld [vmem:[%s9578_s25 + $0x74c] sm:$0xf0]  ;;  %v8320_v41 = vld [vmem:[%s9578_s25 + $0x2c4] sm:$0xf] }
  0xaf   : > { %v6703_v48 = vld [vmem:[%s9578_s25 + $0x640] sm:$0xf]  ;;  %v6848_v60 = vor.u32 %v8470_v47, %v6847_v44  ;;  %2238 = vmatpush.bf16.msrb.mxu1 %v6592_v46  ;;  %v8430_v4 = vld [vmem:[%s9578_s25 + $0x62c] sm:$0xf0]  ;;  %v6257_v42 = vld [vmem:[%s9578_s25 + $0x2d0] sm:$0xf0] }
  0xb0   : > { %v6575_v53 = vld [vmem:[%s9578_s25 + $0x540] sm:$0xf]  ;;  %v6704_v61 = vor.u32 %v8434_v50, %v6703_v48  ;;  %v8398_v6 = vld [vmem:[%s9578_s25 + $0x52c] sm:$0xf0]  ;;  %2219 = vmatpush.bf16.msrb.mxu0 %v6464_v59  ;;  %v5863_v44 = vld [vmem:[#allocation2 + $0x18] sm:$0xf] }
  0xb1   : > { %v6447_v62 = vld [vmem:[%s9578_s25 + $0x440] sm:$0xf]  ;;  %v6576_v1 = vor.u32 %v8402_v56, %v6575_v53  ;;  %2276 = vmatpush.bf16.msrb.mxu3 %v6848_v60  ;;  %v8366_v11 = vld [vmem:[%s9578_s25 + $0x42c] sm:$0xf0]  ;;  %v8223_v46 = vld [vmem:[#allocation2 + $0x34] sm:$0xf0]  ;;  %v6020_v53 = vor.u32 %v8260_v36, %v6017_v37  ;;  %v6404_v60 = vor.u32 %v8356_v38, %v6401_v40 }
  0xb2   : > { %v6831_v0 = vld [vmem:[%s9578_s25 + $0x740] sm:$0xf]  ;;  %v6448_v7 = vor.u32 %v8370_v63, %v6447_v62  ;;  %2258 = vmatpush.bf16.msrb.mxu2 %v6704_v61  ;;  %v8462_v13 = vld [vmem:[%s9578_s25 + $0x72c] sm:$0xf0]  ;;  %v8219_v47 = vld [vmem:[#allocation2 + $0x1c] sm:$0xf]  ;;  %v6260_v61 = vor.u32 %v8320_v41, %v6257_v42 }
  0xb3   : > { %v6687_v3 = vld [vmem:[%s9578_s25 + $0x620] sm:$0xf]  ;;  %v6832_v9 = vor.u32 %v8466_v2, %v6831_v0  ;;  %2239 = vmatpush.bf16.msrb.mxu1 %v6576_v1  ;;  %v8426_v16 = vld [vmem:[%s9578_s25 + $0x60c] sm:$0xf0]  ;;  %v5865_v50 = vld [vmem:[#allocation2 + $0x38] sm:$0xf0]  ;;  %v9767_v2 = vor.u32 %v8218_v33, %v5857_v34 }
  0xb4   : > { %v6559_v5 = vld [vmem:[%s9578_s25 + $0x520] sm:$0xf]  ;;  %v6688_v10 = vor.u32 %v8430_v4, %v6687_v3  ;;  %v8394_v18 = vld [vmem:[%s9578_s25 + $0x50c] sm:$0xf0]  ;;  %2220 = vmatpush.bf16.msrb.mxu0 %v6448_v7  ;;  %v8256_v56 = vld [vmem:[%s9578_s25 + $0xc4] sm:$0xf]  ;;  %v9774_v7 = vor.u32 %v8219_v47, %v5865_v50 }
  0xb5   : > { %v6431_v8 = vld [vmem:[%s9578_s25 + $0x420] sm:$0xf]  ;;  %v6560_v14 = vor.u32 %v8398_v6, %v6559_v5  ;;  %2277 = vmatpush.bf16.msrb.mxu3 %v6832_v9  ;;  %v8362_v27 = vld [vmem:[%s9578_s25 + $0x40c] sm:$0xf0]  ;;  %v6001_v59 = vld [vmem:[%s9578_s25 + $0xd0] sm:$0xf0]  ;;  %v9772_v6 = vor.u32 %v8223_v46, %v5863_v44 }
  0xb6   : > { %v6815_v12 = vld [vmem:[%s9578_s25 + $0x720] sm:$0xf]  ;;  %v6432_v21 = vor.u32 %v8366_v11, %v6431_v8  ;;  %2259 = vmatpush.bf16.msrb.mxu2 %v6688_v10  ;;  %v8458_v29 = vld [vmem:[%s9578_s25 + $0x70c] sm:$0xf0]  ;;  %v8288_v62 = vld [vmem:[%s9578_s25 + $0x1c4] sm:$0xf]  ;;  %v6004_v8 = vor.u32 %v8256_v56, %v6001_v59 }
  0xb7   : > { %v6671_v15 = vld [vmem:[%s9578_s25 + $0x600] sm:$0xf]  ;;  %v6816_v25 = vor.u32 %v8462_v13, %v6815_v12  ;;  %2240 = vmatpush.bf16.msrb.mxu1 %v6560_v14  ;;  %v5855_v31 = vld [vmem:[#allocation2 + $0x10] sm:$0xf]  ;;  %v6129_v63 = vld [vmem:[%s9578_s25 + $0x1d0] sm:$0xf0] }
  0xb8   : > { %v6543_v17 = vld [vmem:[%s9578_s25 + $0x500] sm:$0xf]  ;;  %v6672_v26 = vor.u32 %v8426_v16, %v6671_v15  ;;  %v8222_v32 = vld [vmem:[#allocation2 + $0x2c] sm:$0xf0]  ;;  %2221 = vmatpush.bf16.msrb.mxu0 %v6432_v21  ;;  %v8352_v0 = vld [vmem:[%s9578_s25 + $0x3c4] sm:$0xf]  ;;  %v6132_v9 = vor.u32 %v8288_v62, %v6129_v63 }
  0xb9   : > { %v6415_v22 = vld [vmem:[%s9578_s25 + $0x400] sm:$0xf]  ;;  %v6544_v30 = vor.u32 %v8394_v18, %v6543_v17  ;;  %2278 = vmatpush.bf16.msrb.mxu3 %v6816_v25  ;;  %v9765_v1 = vor.u32 %v8222_v32, %v5855_v31  ;;  %v6385_v3 = vld [vmem:[%s9578_s25 + $0x3d0] sm:$0xf0]  ;;  %v8316_v4 = vld [vmem:[%s9578_s25 + $0x2a4] sm:$0xf] }
  0xba   : > { %v6799_v28 = vld [vmem:[%s9578_s25 + $0x700] sm:$0xf]  ;;  %v6416_v43 = vor.u32 %v8362_v27, %v6415_v22  ;;  %2260 = vmatpush.bf16.msrb.mxu2 %v6672_v26  ;;  %v6241_v5 = vld [vmem:[%s9578_s25 + $0x2b0] sm:$0xf0]  ;;  %v8252_v10 = vld [vmem:[%s9578_s25 + $0xa4] sm:$0xf]  ;;  %v6388_v12 = vor.u32 %v8352_v0, %v6385_v3 }
  0xbb   : > { %v6800_v48 = vor.u32 %v8458_v29, %v6799_v28  ;;  %2241 = vmatpush.bf16.msrb.mxu1 %v6544_v30  ;;  %v5985_v11 = vld [vmem:[%s9578_s25 + $0xb0] sm:$0xf0]  ;;  %v6244_v13 = vor.u32 %v8316_v4, %v6241_v5  ;;  %v8284_v14 = vld [vmem:[%s9578_s25 + $0x1a4] sm:$0xf]  ;;  %v5887_v37 = vld [vmem:[#allocation2 + $0x50] sm:$0xf] }
  0xbc   : > { %2222 = vmatpush.bf16.msrb.mxu0 %v6416_v43  ;;  %v6113_v15 = vld [vmem:[%s9578_s25 + $0x1b0] sm:$0xf0]  ;;  %v8348_v16 = vld [vmem:[%s9578_s25 + $0x3a4] sm:$0xf]  ;;  %v5988_v20 = vor.u32 %v8252_v10, %v5985_v11  ;;  %v8230_v38 = vld [vmem:[#allocation2 + $0x6c] sm:$0xf0] }
  0xbd   : > { %2279 = vmatpush.bf16.msrb.mxu3 %v6800_v48  ;;  %v6369_v17 = vld [vmem:[%s9578_s25 + $0x3b0] sm:$0xf0]  ;;  %v8312_v18 = vld [vmem:[%s9578_s25 + $0x284] sm:$0xf]  ;;  %2261 = vmatmul.bf16.vlgmr.msrb.gmra.mxu2 %v9772_v6  ;;  %v6116_v21 = vor.u32 %v8284_v14, %v6113_v15  ;;  %v5895_v50 = vld [vmem:[#allocation2 + $0x58] sm:$0xf] }
  0xbe   : > { %2329 = vmatpush.bf16.msra.mxu2 %v6276_v35  ;;  %2242 = vmatmul.bf16.vlgmr.msrb.gmra.mxu1 %v9767_v2  ;;  %v6225_v19 = vld [vmem:[%s9578_s25 + $0x290] sm:$0xf0]  ;;  %v8248_v22 = vld [vmem:[%s9578_s25 + $0x84] sm:$0xf]  ;;  %v6372_v24 = vor.u32 %v8348_v16, %v6369_v17  ;;  %v8227_v56 = vld [vmem:[#allocation2 + $0x5c] sm:$0xf] }
  0xbf   : > { %2310 = vmatpush.bf16.msra.mxu1 %v6148_v39  ;;  %2223 = vmatmul.bf16.vlgmr.msrb.gmra.mxu0 %v9765_v1  ;;  %v6228_v25 = vor.u32 %v8312_v18, %v6225_v19  ;;  %v8280_v26 = vld [vmem:[%s9578_s25 + $0x184] sm:$0xf]  ;;  %v6097_v27 = vld [vmem:[%s9578_s25 + $0x190] sm:$0xf0]  ;;  %v5972_v32 = vor.u32 %v8248_v22, %v5969_v23  ;;  %v5897_v59 = vld [vmem:[#allocation2 + $0x78] sm:$0xf0] }
  0xc0   : > { %2291 = vmatpush.bf16.msra.mxu0 %v6020_v53  ;;  %2280 = vmatmul.bf16.vlgmr.msrb.gmra.mxu3 %v9774_v7  ;;  %v8344_v28 = vld [vmem:[%s9578_s25 + $0x384] sm:$0xf]  ;;  %v6353_v29 = vld [vmem:[%s9578_s25 + $0x390] sm:$0xf0]  ;;  %v6100_v33 = vor.u32 %v8280_v26, %v6097_v27  ;;  %v8231_v53 = vld [vmem:[#allocation2 + $0x74] sm:$0xf0]  ;;  %v9818_v15 = vor.u32 %v8227_v56, %v5897_v59 }
  0xc1   : > { %2348 = vmatpush.bf16.msra.mxu3 %v6404_v60  ;;  %v8308_v30 = vld [vmem:[%s9578_s25 + $0x264] sm:$0xf]  ;;  %v6209_v31 = vld [vmem:[%s9578_s25 + $0x270] sm:$0xf0]  ;;  %v6356_v36 = vor.u32 %v8344_v28, %v6353_v29  ;;  %v9816_v14 = vor.u32 %v8231_v53, %v5895_v50 }
  0xc2   : > { %2330 = vmatpush.bf16.msra.mxu2 %v6260_v61  ;;  %v8244_v34 = vld [vmem:[%s9578_s25 + $0x64] sm:$0xf]  ;;  %v5953_v35 = vld [vmem:[%s9578_s25 + $0x70] sm:$0xf0]  ;;  %v6212_v41 = vor.u32 %v8308_v30, %v6209_v31 }
  0xc3   : > { %2311 = vmatpush.bf16.msra.mxu1 %v6132_v9  ;;  %v8226_v39 = vld [vmem:[#allocation2 + $0x54] sm:$0xf]  ;;  %v8276_v42 = vld [vmem:[%s9578_s25 + $0x164] sm:$0xf]  ;;  %v5956_v60 = vor.u32 %v8244_v34, %v5953_v35  ;;  %v9809_v9 = vor.u32 %v8230_v38, %v5887_v37 }
  0xc4   : > { %2292 = vmatpush.bf16.msra.mxu0 %v6004_v8  ;;  %v5889_v40 = vld [vmem:[#allocation2 + $0x70] sm:$0xf0]  ;;  %v8340_v44 = vld [vmem:[%s9578_s25 + $0x364] sm:$0xf] }
  0xc5   : > { %2349 = vmatpush.bf16.msra.mxu3 %v6388_v12  ;;  %v6081_v43 = vld [vmem:[%s9578_s25 + $0x170] sm:$0xf0]  ;;  %v8304_v47 = vld [vmem:[%s9578_s25 + $0x244] sm:$0xf]  ;;  %v9811_v10 = vor.u32 %v8226_v39, %v5889_v40 }
  0xc6   : > { %2331 = vmatpush.bf16.msra.mxu2 %v6244_v13  ;;  %v6337_v46 = vld [vmem:[%s9578_s25 + $0x370] sm:$0xf0]  ;;  %v6084_v61 = vor.u32 %v8276_v42, %v6081_v43  ;;  %v8240_v62 = vld [vmem:[%s9578_s25 + $0x44] sm:$0xf] }
  0xc7   : > { %2312 = vmatpush.bf16.msra.mxu1 %v6116_v21  ;;  %v6193_v48 = vld [vmem:[%s9578_s25 + $0x250] sm:$0xf0]  ;;  %v6340_v0 = vor.u32 %v8340_v44, %v6337_v46  ;;  %v8272_v4 = vld [vmem:[%s9578_s25 + $0x144] sm:$0xf] }
  0xc8   : > { %2293 = vmatpush.bf16.msra.mxu0 %v5988_v20  ;;  %v5937_v63 = vld [vmem:[%s9578_s25 + $0x50] sm:$0xf0]  ;;  %v6196_v3 = vor.u32 %v8304_v47, %v6193_v48  ;;  %v8336_v8 = vld [vmem:[%s9578_s25 + $0x344] sm:$0xf] }
  0xc9   : > { %2350 = vmatpush.bf16.msra.mxu3 %v6372_v24  ;;  %v6065_v5 = vld [vmem:[%s9578_s25 + $0x150] sm:$0xf0]  ;;  %v8300_v12 = vld [vmem:[%s9578_s25 + $0x224] sm:$0xf]  ;;  %v5940_v16 = vor.u32 %v8240_v62, %v5937_v63 }
  0xca   : > { %2332 = vmatpush.bf16.msra.mxu2 %v6228_v25  ;;  %v6321_v11 = vld [vmem:[%s9578_s25 + $0x350] sm:$0xf0]  ;;  %v6068_v17 = vor.u32 %v8272_v4, %v6065_v5  ;;  %v8236_v18 = vld [vmem:[%s9578_s25 + $0x24] sm:$0xf] }
  0xcb   : > { %2313 = vmatpush.bf16.msra.mxu1 %v6100_v33  ;;  %v6177_v13 = vld [vmem:[%s9578_s25 + $0x230] sm:$0xf0]  ;;  %v6324_v20 = vor.u32 %v8336_v8, %v6321_v11  ;;  %v8268_v22 = vld [vmem:[%s9578_s25 + $0x124] sm:$0xf] }
  0xcc   : > { %2294 = vmatpush.bf16.msra.mxu0 %v5972_v32  ;;  %v5921_v19 = vld [vmem:[%s9578_s25 + $0x30] sm:$0xf0]  ;;  %v6180_v21 = vor.u32 %v8300_v12, %v6177_v13  ;;  %v8332_v24 = vld [vmem:[%s9578_s25 + $0x324] sm:$0xf] }
  0xcd   : > { %2351 = vmatpush.bf16.msra.mxu3 %v6356_v36  ;;  %v6049_v23 = vld [vmem:[%s9578_s25 + $0x130] sm:$0xf0]  ;;  %v8296_v26 = vld [vmem:[%s9578_s25 + $0x204] sm:$0xf]  ;;  %2266 = vmatmul.bf16.gmra.mxu2 %v9816_v14  ;;  %v5924_v30 = vor.u32 %v8236_v18, %v5921_v19 }
  0xce   : > { %2333 = vmatpush.bf16.msra.mxu2 %v6212_v41  ;;  %2247 = vmatmul.bf16.gmra.mxu1 %v9811_v10  ;;  %v6305_v25 = vld [vmem:[%s9578_s25 + $0x330] sm:$0xf0]  ;;  %v8452_v28 = vld [vmem:[%s9578_s25 + $0x6e4] sm:$0xf]  ;;  %v6052_v31 = vor.u32 %v8268_v22, %v6049_v23 }
  0xcf   : > { %2314 = vmatpush.bf16.msra.mxu1 %v6084_v61  ;;  %2228 = vmatmul.bf16.gmra.mxu0 %v9809_v9  ;;  %v6161_v27 = vld [vmem:[%s9578_s25 + $0x210] sm:$0xf0]  ;;  %v8232_v32 = vld [vmem:[%s9578_s25 + $0x4] sm:$0xf]  ;;  %v6308_v35 = vor.u32 %v8332_v24, %v6305_v25 }
  0xd0   : > { %2295 = vmatpush.bf16.msra.mxu0 %v5956_v60  ;;  %2285 = vmatmul.bf16.gmra.mxu3 %v9818_v15  ;;  %v6785_v29 = vld [vmem:[%s9578_s25 + $0x6f0] sm:$0xf0]  ;;  %v8264_v34 = vld [vmem:[%s9578_s25 + $0x104] sm:$0xf]  ;;  %v6164_v36 = vor.u32 %v8296_v26, %v6161_v27 }
  0xd1   : > { %2352 = vmatpush.bf16.msra.mxu3 %v6340_v0  ;;  %v5905_v33 = vld [vmem:[%s9578_s25 + $0x10] sm:$0xf0]  ;;  %v8328_v38 = vld [vmem:[%s9578_s25 + $0x304] sm:$0xf]  ;;  %v6788_v40 = vor.u32 %v8452_v28, %v6785_v29 }
  0xd2   : > { %2334 = vmatpush.bf16.msra.mxu2 %v6196_v3  ;;  %v6033_v37 = vld [vmem:[%s9578_s25 + $0x110] sm:$0xf0]  ;;  %v8388_v41 = vld [vmem:[%s9578_s25 + $0x4e4] sm:$0xf]  ;;  %v5908_v48 = vor.u32 %v8232_v32, %v5905_v33 }
  0xd3   : > { %2315 = vmatpush.bf16.msra.mxu1 %v6068_v17  ;;  %v6289_v39 = vld [vmem:[%s9578_s25 + $0x310] sm:$0xf0]  ;;  %v8420_v43 = vld [vmem:[%s9578_s25 + $0x5e4] sm:$0xf]  ;;  %v6036_v50 = vor.u32 %v8264_v34, %v6033_v37 }
  0xd4   : > { %2296 = vmatpush.bf16.msra.mxu0 %v5940_v16  ;;  %v6529_v42 = vld [vmem:[%s9578_s25 + $0x4f0] sm:$0xf0]  ;;  %v8484_v46 = vld [vmem:[%s9578_s25 + $0x7e4] sm:$0xf]  ;;  %v6292_v59 = vor.u32 %v8328_v38, %v6289_v39 }
  0xd5   : > { %2353 = vmatpush.bf16.msra.mxu3 %v6324_v20  ;;  %v6657_v44 = vld [vmem:[%s9578_s25 + $0x5f0] sm:$0xf0]  ;;  %v8448_v53 = vld [vmem:[%s9578_s25 + $0x6c4] sm:$0xf]  ;;  %v6532_v60 = vor.u32 %v8388_v41, %v6529_v42 }
  0xd6   : > { %2335 = vmatpush.bf16.msra.mxu2 %v6180_v21  ;;  %v6913_v47 = vld [vmem:[%s9578_s25 + $0x7f0] sm:$0xf0]  ;;  %v6660_v61 = vor.u32 %v8420_v43, %v6657_v44  ;;  %v8384_v63 = vld [vmem:[%s9578_s25 + $0x4c4] sm:$0xf] }
  0xd7   : > { %2316 = vmatpush.bf16.msra.mxu1 %v6052_v31  ;;  %v6769_v56 = vld [vmem:[%s9578_s25 + $0x6d0] sm:$0xf0]  ;;  %v6916_v62 = vor.u32 %v8484_v46, %v6913_v47  ;;  %v8416_v4 = vld [vmem:[%s9578_s25 + $0x5c4] sm:$0xf] }
  0xd8   : > { %2297 = vmatpush.bf16.msra.mxu0 %v5924_v30  ;;  %v6513_v0 = vld [vmem:[%s9578_s25 + $0x4d0] sm:$0xf0]  ;;  %v6772_v3 = vor.u32 %v8448_v53, %v6769_v56  ;;  %v8480_v11 = vld [vmem:[%s9578_s25 + $0x7c4] sm:$0xf] }
  0xd9   : > { %2354 = vmatpush.bf16.msra.mxu3 %v6308_v35  ;;  %v6641_v5 = vld [vmem:[%s9578_s25 + $0x5d0] sm:$0xf0]  ;;  %v6516_v8 = vor.u32 %v8384_v63, %v6513_v0  ;;  %v8444_v13 = vld [vmem:[%s9578_s25 + $0x6a4] sm:$0xf] }
  0xda   : > { %2336 = vmatpush.bf16.msra.mxu2 %v6164_v36  ;;  %v6897_v12 = vld [vmem:[%s9578_s25 + $0x7d0] sm:$0xf0]  ;;  %v8380_v17 = vld [vmem:[%s9578_s25 + $0x4a4] sm:$0xf]  ;;  %v6644_v19 = vor.u32 %v8416_v4, %v6641_v5 }
  0xdb   : > { %2317 = vmatpush.bf16.msra.mxu1 %v6036_v50  ;;  %v6753_v16 = vld [vmem:[%s9578_s25 + $0x6b0] sm:$0xf0]  ;;  %v6900_v20 = vor.u32 %v8480_v11, %v6897_v12  ;;  %v8412_v21 = vld [vmem:[%s9578_s25 + $0x5a4] sm:$0xf] }
  0xdc   : > { %2298 = vmatpush.bf16.msra.mxu0 %v5908_v48  ;;  %v6497_v18 = vld [vmem:[%s9578_s25 + $0x4b0] sm:$0xf0]  ;;  %v6756_v23 = vor.u32 %v8444_v13, %v6753_v16  ;;  %v8476_v25 = vld [vmem:[%s9578_s25 + $0x7a4] sm:$0xf] }
  0xdd   : > { %2355 = vmatpush.bf16.msra.mxu3 %v6292_v59  ;;  %v6625_v22 = vld [vmem:[%s9578_s25 + $0x5b0] sm:$0xf0]  ;;  %v6500_v24 = vor.u32 %v8380_v17, %v6497_v18  ;;  %v8440_v27 = vld [vmem:[%s9578_s25 + $0x684] sm:$0xf]  ;;  %2337 = vmatmul.bf16.vlgmr.msra.gmra.mxu2 %v9676_v55 }
  0xde   : > { %2405 = vmatpush.bf16.msrb.mxu2 %v6788_v40  ;;  %v6881_v26 = vld [vmem:[%s9578_s25 + $0x7b0] sm:$0xf0]  ;;  %2318 = vmatmul.bf16.vlgmr.msra.gmra.mxu1 %v9674_v54  ;;  %v8376_v29 = vld [vmem:[%s9578_s25 + $0x484] sm:$0xf]  ;;  %v6628_v31 = vor.u32 %v8412_v21, %v6625_v22 }
  0xdf   : > { %2386 = vmatpush.bf16.msrb.mxu1 %v6660_v61  ;;  %2299 = vmatmul.bf16.vlgmr.msra.gmra.mxu0 %v9669_v49  ;;  %v6737_v28 = vld [vmem:[%s9578_s25 + $0x690] sm:$0xf0]  ;;  %v6884_v32 = vor.u32 %v8476_v25, %v6881_v26  ;;  %v8408_v33 = vld [vmem:[%s9578_s25 + $0x584] sm:$0xf] }
  0xe0   : > { %2367 = vmatpush.bf16.msrb.mxu0 %v6532_v60  ;;  %v6481_v30 = vld [vmem:[%s9578_s25 + $0x490] sm:$0xf0]  ;;  %2356 = vmatmul.bf16.vlgmr.msra.gmra.mxu3 %v9680_v58  ;;  %v6740_v35 = vor.u32 %v8440_v27, %v6737_v28  ;;  %v8472_v37 = vld [vmem:[%s9578_s25 + $0x784] sm:$0xf] }
  0xe1   : > { %2424 = vmatpush.bf16.msrb.mxu3 %v6916_v62  ;;  %v6609_v34 = vld [vmem:[%s9578_s25 + $0x590] sm:$0xf0]  ;;  %v6484_v36 = vor.u32 %v8376_v29, %v6481_v30  ;;  %v8436_v39 = vld [vmem:[%s9578_s25 + $0x664] sm:$0xf] }
  0xe2   : > { %2406 = vmatpush.bf16.msrb.mxu2 %v6772_v3  ;;  %v6865_v38 = vld [vmem:[%s9578_s25 + $0x790] sm:$0xf0]  ;;  %v8372_v41 = vld [vmem:[%s9578_s25 + $0x464] sm:$0xf]  ;;  %v6612_v43 = vor.u32 %v8408_v33, %v6609_v34  ;;  %v6023_v33 = vld [vmem:[%s9578_s25 + $0xe8] sm:$0xf] }
  0xe3   : > { %2387 = vmatpush.bf16.msrb.mxu1 %v6644_v19  ;;  %v6721_v40 = vld [vmem:[%s9578_s25 + $0x670] sm:$0xf0]  ;;  %v6868_v44 = vor.u32 %v8472_v37, %v6865_v38  ;;  %v8404_v46 = vld [vmem:[%s9578_s25 + $0x564] sm:$0xf]  ;;  %v8263_v34 = vld [vmem:[%s9578_s25 + $0xf4] sm:$0xf0] }
  0xe4   : > { %2368 = vmatpush.bf16.msrb.mxu0 %v6516_v8  ;;  %v6465_v42 = vld [vmem:[%s9578_s25 + $0x470] sm:$0xf0]  ;;  %v6724_v48 = vor.u32 %v8436_v39, %v6721_v40  ;;  %v8468_v53 = vld [vmem:[%s9578_s25 + $0x764] sm:$0xf] }
  0xe5   : > { %2425 = vmatpush.bf16.msrb.mxu3 %v6900_v20  ;;  %v6593_v47 = vld [vmem:[%s9578_s25 + $0x570] sm:$0xf0]  ;;  %v6468_v50 = vor.u32 %v8372_v41, %v6465_v42  ;;  %v8432_v59 = vld [vmem:[%s9578_s25 + $0x644] sm:$0xf] }
  0xe6   : > { %2407 = vmatpush.bf16.msrb.mxu2 %v6756_v23  ;;  %v6849_v56 = vld [vmem:[%s9578_s25 + $0x770] sm:$0xf0]  ;;  %v8368_v61 = vld [vmem:[%s9578_s25 + $0x444] sm:$0xf]  ;;  %v6596_v63 = vor.u32 %v8404_v46, %v6593_v47  ;;  %v6024_v47 = vor.u32 %v8263_v34, %v6023_v33  ;;  %v6103_v33 = vld [vmem:[%s9578_s25 + $0x188] sm:$0xf] }
  0xe7   : > { %2388 = vmatpush.bf16.msrb.mxu1 %v6628_v31  ;;  %v6705_v60 = vld [vmem:[%s9578_s25 + $0x650] sm:$0xf0]  ;;  %v6852_v0 = vor.u32 %v8468_v53, %v6849_v56  ;;  %v8400_v3 = vld [vmem:[%s9578_s25 + $0x544] sm:$0xf]  ;;  %v6279_v31 = vld [vmem:[%s9578_s25 + $0x2e8] sm:$0xf] }
  0xe8   : > { %2369 = vmatpush.bf16.msrb.mxu0 %v6500_v24  ;;  %v6449_v62 = vld [vmem:[%s9578_s25 + $0x450] sm:$0xf0]  ;;  %v6708_v5 = vor.u32 %v8432_v59, %v6705_v60  ;;  %v8464_v11 = vld [vmem:[%s9578_s25 + $0x744] sm:$0xf]  ;;  %v6263_v53 = vld [vmem:[%s9578_s25 + $0x2c8] sm:$0xf] }
  0xe9   : > { %2426 = vmatpush.bf16.msrb.mxu3 %v6884_v32  ;;  %v6577_v4 = vld [vmem:[%s9578_s25 + $0x550] sm:$0xf0]  ;;  %v6452_v8 = vor.u32 %v8368_v61, %v6449_v62  ;;  %v8428_v13 = vld [vmem:[%s9578_s25 + $0x624] sm:$0xf]  ;;  %v8327_v32 = vld [vmem:[%s9578_s25 + $0x2f4] sm:$0xf0] }
  0xea   : > { %2408 = vmatpush.bf16.msrb.mxu2 %v6740_v35  ;;  %v6833_v12 = vld [vmem:[%s9578_s25 + $0x750] sm:$0xf0]  ;;  %v8364_v17 = vld [vmem:[%s9578_s25 + $0x424] sm:$0xf]  ;;  %v6580_v19 = vor.u32 %v8400_v3, %v6577_v4  ;;  %v6280_v46 = vor.u32 %v8327_v32, %v6279_v31  ;;  %v8323_v56 = vld [vmem:[%s9578_s25 + $0x2d4] sm:$0xf0] }
  0xeb   : > { %2389 = vmatpush.bf16.msrb.mxu1 %v6612_v43  ;;  %v6689_v16 = vld [vmem:[%s9578_s25 + $0x630] sm:$0xf0]  ;;  %v6836_v20 = vor.u32 %v8464_v11, %v6833_v12  ;;  %v8396_v21 = vld [vmem:[%s9578_s25 + $0x524] sm:$0xf]  ;;  %v6151_v43 = vld [vmem:[%s9578_s25 + $0x1e8] sm:$0xf]  ;;  %v6264_v4 = vor.u32 %v8323_v56, %v6263_v53 }
  0xec   : > { %2370 = vmatpush.bf16.msrb.mxu0 %v6484_v36  ;;  %v6433_v18 = vld [vmem:[%s9578_s25 + $0x430] sm:$0xf0]  ;;  %v8460_v23 = vld [vmem:[%s9578_s25 + $0x724] sm:$0xf]  ;;  %v6692_v24 = vor.u32 %v8428_v13, %v6689_v16  ;;  %v6007_v59 = vld [vmem:[%s9578_s25 + $0xc8] sm:$0xf] }
  0xed   : > { %2427 = vmatpush.bf16.msrb.mxu3 %v6868_v44  ;;  %v6561_v22 = vld [vmem:[%s9578_s25 + $0x530] sm:$0xf0]  ;;  %v6436_v25 = vor.u32 %v8364_v17, %v6433_v18  ;;  %v8424_v27 = vld [vmem:[%s9578_s25 + $0x604] sm:$0xf]  ;;  %2342 = vmatmul.bf16.gmra.mxu2 %v9720_v52  ;;  %v8295_v44 = vld [vmem:[%s9578_s25 + $0x1f4] sm:$0xf0] }
  0xee   : > { %2409 = vmatpush.bf16.msrb.mxu2 %v6724_v48  ;;  %v6817_v26 = vld [vmem:[%s9578_s25 + $0x730] sm:$0xf0]  ;;  %2323 = vmatmul.bf16.gmra.mxu1 %v9718_v51  ;;  %v8360_v29 = vld [vmem:[%s9578_s25 + $0x404] sm:$0xf]  ;;  %v6564_v35 = vor.u32 %v8396_v21, %v6561_v22  ;;  %v6407_v48 = vld [vmem:[%s9578_s25 + $0x3e8] sm:$0xf] }
  0xef   : > { %2390 = vmatpush.bf16.msrb.mxu1 %v6596_v63  ;;  %v6673_v28 = vld [vmem:[%s9578_s25 + $0x610] sm:$0xf0]  ;;  %2304 = vmatmul.bf16.gmra.mxu0 %v9713_v45  ;;  %v6820_v36 = vor.u32 %v8460_v23, %v6817_v26  ;;  %v8392_v37 = vld [vmem:[%s9578_s25 + $0x504] sm:$0xf]  ;;  %v8259_v60 = vld [vmem:[%s9578_s25 + $0xd4] sm:$0xf0]  ;;  %v6152_v63 = vor.u32 %v8295_v44, %v6151_v43 }
  0xf0   : > { %2371 = vmatpush.bf16.msrb.mxu0 %v6468_v50  ;;  %v6417_v30 = vld [vmem:[%s9578_s25 + $0x410] sm:$0xf0]  ;;  %2361 = vmatmul.bf16.gmra.mxu3 %v9724_v57  ;;  %v8456_v39 = vld [vmem:[%s9578_s25 + $0x704] sm:$0xf]  ;;  %v6676_v40 = vor.u32 %v8424_v27, %v6673_v28  ;;  %v8359_v50 = vld [vmem:[%s9578_s25 + $0x3f4] sm:$0xf0] }
  0xf1   : > { %2428 = vmatpush.bf16.msrb.mxu3 %v6852_v0  ;;  %v6545_v38 = vld [vmem:[%s9578_s25 + $0x510] sm:$0xf0]  ;;  %v6420_v41 = vor.u32 %v8360_v29, %v6417_v30  ;;  %v6408_v0 = vor.u32 %v8359_v50, %v6407_v48  ;;  %v6135_v3 = vld [vmem:[%s9578_s25 + $0x1c8] sm:$0xf]  ;;  %v8355_v12 = vld [vmem:[%s9578_s25 + $0x3d4] sm:$0xf0] }
  0xf2   : > { %2410 = vmatpush.bf16.msrb.mxu2 %v6708_v5  ;;  %v6801_v42 = vld [vmem:[%s9578_s25 + $0x710] sm:$0xf0]  ;;  %v6548_v61 = vor.u32 %v8392_v37, %v6545_v38  ;;  %v6008_v5 = vor.u32 %v8259_v60, %v6007_v59  ;;  %v6391_v11 = vld [vmem:[%s9578_s25 + $0x3c8] sm:$0xf]  ;;  %v8319_v16 = vld [vmem:[%s9578_s25 + $0x2b4] sm:$0xf0] }
  0xf3   : > { %2391 = vmatpush.bf16.msrb.mxu1 %v6580_v19  ;;  %v6804_v62 = vor.u32 %v8456_v39, %v6801_v42  ;;  %v6247_v13 = vld [vmem:[%s9578_s25 + $0x2a8] sm:$0xf]  ;;  %v6392_v18 = vor.u32 %v8355_v12, %v6391_v11  ;;  %v8287_v22 = vld [vmem:[%s9578_s25 + $0x1b4] sm:$0xf0] }
  0xf4   : > { %2372 = vmatpush.bf16.msrb.mxu0 %v6452_v8  ;;  %v8291_v8 = vld [vmem:[%s9578_s25 + $0x1d4] sm:$0xf0]  ;;  %v5991_v19 = vld [vmem:[%s9578_s25 + $0xa8] sm:$0xf] }
  0xf5   : > { %2429 = vmatpush.bf16.msrb.mxu3 %v6836_v20  ;;  %v6136_v17 = vor.u32 %v8291_v8, %v6135_v3  ;;  %v8255_v20 = vld [vmem:[%s9578_s25 + $0xb4] sm:$0xf0]  ;;  %v6119_v21 = vld [vmem:[%s9578_s25 + $0x1a8] sm:$0xf] }
  0xf6   : > { %2411 = vmatpush.bf16.msrb.mxu2 %v6692_v24  ;;  %v6375_v23 = vld [vmem:[%s9578_s25 + $0x3a8] sm:$0xf]  ;;  %v8351_v24 = vld [vmem:[%s9578_s25 + $0x3b4] sm:$0xf0]  ;;  %v5992_v26 = vor.u32 %v8255_v20, %v5991_v19  ;;  %v6120_v29 = vor.u32 %v8287_v22, %v6119_v21 }
  0xf7   : > { %2392 = vmatpush.bf16.msrb.mxu1 %v6564_v35  ;;  %v6231_v27 = vld [vmem:[%s9578_s25 + $0x288] sm:$0xf]  ;;  %v8315_v28 = vld [vmem:[%s9578_s25 + $0x294] sm:$0xf0]  ;;  %v6376_v30 = vor.u32 %v8351_v24, %v6375_v23 }
  0xf8   : > { %2373 = vmatpush.bf16.msrb.mxu0 %v6436_v25  ;;  %v6248_v25 = vor.u32 %v8319_v16, %v6247_v13  ;;  %v5975_v31 = vld [vmem:[%s9578_s25 + $0x88] sm:$0xf]  ;;  %v8251_v32 = vld [vmem:[%s9578_s25 + $0x94] sm:$0xf0]  ;;  %v6232_v37 = vor.u32 %v8315_v28, %v6231_v27 }
  0xf9   : > { %2430 = vmatpush.bf16.msrb.mxu3 %v6820_v36  ;;  %v8283_v34 = vld [vmem:[%s9578_s25 + $0x194] sm:$0xf0]  ;;  %v6359_v35 = vld [vmem:[%s9578_s25 + $0x388] sm:$0xf]  ;;  %v5976_v38 = vor.u32 %v8251_v32, %v5975_v31 }
  0xfa   : > { %2412 = vmatpush.bf16.msrb.mxu2 %v6676_v40  ;;  %v8347_v36 = vld [vmem:[%s9578_s25 + $0x394] sm:$0xf0]  ;;  %v6215_v39 = vld [vmem:[%s9578_s25 + $0x268] sm:$0xf] }
  0xfb   : > { %2393 = vmatpush.bf16.msrb.mxu1 %v6548_v61  ;;  %v8311_v40 = vld [vmem:[%s9578_s25 + $0x274] sm:$0xf0]  ;;  %v6360_v42 = vor.u32 %v8347_v36, %v6359_v35  ;;  %v5959_v43 = vld [vmem:[%s9578_s25 + $0x68] sm:$0xf] }
  0xfc   : > { %2374 = vmatpush.bf16.msrb.mxu0 %v6420_v41  ;;  %v6104_v41 = vor.u32 %v8283_v34, %v6103_v33  ;;  %v8247_v44 = vld [vmem:[%s9578_s25 + $0x74] sm:$0xf0]  ;;  %v6343_v48 = vld [vmem:[%s9578_s25 + $0x368] sm:$0xf]  ;;  %v6216_v53 = vor.u32 %v8311_v40, %v6215_v39 }
  0xfd   : > { %2431 = vmatpush.bf16.msrb.mxu3 %v6804_v62  ;;  %2413 = vmatmul.bf16.vlgmr.msrb.gmra.mxu2 %v9772_v6  ;;  %v8343_v50 = vld [vmem:[%s9578_s25 + $0x374] sm:$0xf0]  ;;  %v5960_v56 = vor.u32 %v8247_v44, %v5959_v43  ;;  %v6199_v59 = vld [vmem:[%s9578_s25 + $0x248] sm:$0xf] }
  0xfe   : > { %2481 = vmatpush.bf16.msra.mxu2 %v6280_v46  ;;  %2394 = vmatmul.bf16.vlgmr.msrb.gmra.mxu1 %v9767_v2  ;;  %v6087_v46 = vld [vmem:[%s9578_s25 + $0x168] sm:$0xf]  ;;  %v8307_v60 = vld [vmem:[%s9578_s25 + $0x254] sm:$0xf0]  ;;  %v6344_v62 = vor.u32 %v8343_v50, %v6343_v48 }
  0xff   : > { %2462 = vmatpush.bf16.msra.mxu1 %v6152_v63  ;;  %2375 = vmatmul.bf16.vlgmr.msrb.gmra.mxu0 %v9765_v1  ;;  %v5943_v63 = vld [vmem:[%s9578_s25 + $0x48] sm:$0xf]  ;;  %v8339_v8 = vld [vmem:[%s9578_s25 + $0x354] sm:$0xf0]  ;;  %v6200_v11 = vor.u32 %v8307_v60, %v6199_v59 }
 0x100   : > { %2443 = vmatpush.bf16.msra.mxu0 %v6024_v47  ;;  %2432 = vmatmul.bf16.vlgmr.msrb.gmra.mxu3 %v9774_v7  ;;  %v8279_v47 = vld [vmem:[%s9578_s25 + $0x174] sm:$0xf0]  ;;  %v6071_v3 = vld [vmem:[%s9578_s25 + $0x148] sm:$0xf] }
 0x101   : > { %2500 = vmatpush.bf16.msra.mxu3 %v6408_v0  ;;  %v6088_v61 = vor.u32 %v8279_v47, %v6087_v46  ;;  %v8243_v0 = vld [vmem:[%s9578_s25 + $0x54] sm:$0xf0]  ;;  %v6183_v13 = vld [vmem:[%s9578_s25 + $0x228] sm:$0xf] }
 0x102   : > { %2482 = vmatpush.bf16.msra.mxu2 %v6264_v4  ;;  %v8275_v4 = vld [vmem:[%s9578_s25 + $0x154] sm:$0xf0]  ;;  %v5944_v12 = vor.u32 %v8243_v0, %v5943_v63  ;;  %v5927_v19 = vld [vmem:[%s9578_s25 + $0x28] sm:$0xf] }
 0x103   : > { %2463 = vmatpush.bf16.msra.mxu1 %v6136_v17  ;;  %v8303_v16 = vld [vmem:[%s9578_s25 + $0x234] sm:$0xf0]  ;;  %v6072_v17 = vor.u32 %v8275_v4, %v6071_v3  ;;  %v6055_v21 = vld [vmem:[%s9578_s25 + $0x128] sm:$0xf] }
 0x104   : > { %2444 = vmatpush.bf16.msra.mxu0 %v6008_v5  ;;  %v6327_v5 = vld [vmem:[%s9578_s25 + $0x348] sm:$0xf]  ;;  %v8239_v20 = vld [vmem:[%s9578_s25 + $0x34] sm:$0xf0] }
 0x105   : > { %2501 = vmatpush.bf16.msra.mxu3 %v6392_v18  ;;  %v6328_v18 = vor.u32 %v8339_v8, %v6327_v5  ;;  %v8271_v22 = vld [vmem:[%s9578_s25 + $0x134] sm:$0xf0]  ;;  %v6311_v23 = vld [vmem:[%s9578_s25 + $0x328] sm:$0xf]  ;;  %v5928_v27 = vor.u32 %v8239_v20, %v5927_v19 }
 0x106   : > { %2483 = vmatpush.bf16.msra.mxu2 %v6248_v25  ;;  %v8335_v24 = vld [vmem:[%s9578_s25 + $0x334] sm:$0xf0]  ;;  %v6167_v25 = vld [vmem:[%s9578_s25 + $0x208] sm:$0xf]  ;;  %v6056_v31 = vor.u32 %v8271_v22, %v6055_v21 }
 0x107   : > { %2464 = vmatpush.bf16.msra.mxu1 %v6120_v29  ;;  %v8299_v28 = vld [vmem:[%s9578_s25 + $0x214] sm:$0xf0]  ;;  %v5911_v29 = vld [vmem:[%s9578_s25 + $0x8] sm:$0xf]  ;;  %v6312_v32 = vor.u32 %v8335_v24, %v6311_v23 }
 0x108   : > { %2445 = vmatpush.bf16.msra.mxu0 %v5992_v26  ;;  %v6184_v26 = vor.u32 %v8303_v16, %v6183_v13  ;;  %v6039_v33 = vld [vmem:[%s9578_s25 + $0x108] sm:$0xf]  ;;  %v8267_v34 = vld [vmem:[%s9578_s25 + $0x114] sm:$0xf0] }
 0x109   : > { %2502 = vmatpush.bf16.msra.mxu3 %v6376_v30  ;;  %v8235_v30 = vld [vmem:[%s9578_s25 + $0x14] sm:$0xf0]  ;;  %v6295_v35 = vld [vmem:[%s9578_s25 + $0x308] sm:$0xf]  ;;  %v6040_v48 = vor.u32 %v8267_v34, %v6039_v33 }
 0x10a   : > { %2484 = vmatpush.bf16.msra.mxu2 %v6232_v37  ;;  %v8331_v36 = vld [vmem:[%s9578_s25 + $0x314] sm:$0xf0]  ;;  %v6791_v37 = vld [vmem:[%s9578_s25 + $0x6e8] sm:$0xf]  ;;  %v5912_v43 = vor.u32 %v8235_v30, %v5911_v29 }
 0x10b   : > { %2465 = vmatpush.bf16.msra.mxu1 %v6104_v41  ;;  %v6535_v39 = vld [vmem:[%s9578_s25 + $0x4e8] sm:$0xf]  ;;  %v8391_v40 = vld [vmem:[%s9578_s25 + $0x4f4] sm:$0xf0]  ;;  %v6296_v50 = vor.u32 %v8331_v36, %v6295_v35 }
 0x10c   : > { %2446 = vmatpush.bf16.msra.mxu0 %v5976_v38  ;;  %v8455_v38 = vld [vmem:[%s9578_s25 + $0x6f4] sm:$0xf0]  ;;  %v6663_v41 = vld [vmem:[%s9578_s25 + $0x5e8] sm:$0xf] }
 0x10d   : > { %2503 = vmatpush.bf16.msra.mxu3 %v6360_v42  ;;  %2418 = vmatmul.bf16.gmra.mxu2 %v9816_v14  ;;  %v6168_v42 = vor.u32 %v8299_v28, %v6167_v25  ;;  %v8423_v44 = vld [vmem:[%s9578_s25 + $0x5f4] sm:$0xf0]  ;;  %v6919_v46 = vld [vmem:[%s9578_s25 + $0x7e8] sm:$0xf] }
 0x10e   : > { %2485 = vmatpush.bf16.msra.mxu2 %v6216_v53  ;;  %2399 = vmatmul.bf16.gmra.mxu1 %v9811_v10  ;;  %v8487_v47 = vld [vmem:[%s9578_s25 + $0x7f4] sm:$0xf0]  ;;  %v6792_v53 = vor.u32 %v8455_v38, %v6791_v37  ;;  %v6775_v59 = vld [vmem:[%s9578_s25 + $0x6c8] sm:$0xf] }
 0x10f   : > { %2466 = vmatpush.bf16.msra.mxu1 %v6088_v61  ;;  %2380 = vmatmul.bf16.gmra.mxu0 %v9809_v9  ;;  %v8451_v60 = vld [vmem:[%s9578_s25 + $0x6d4] sm:$0xf0]  ;;  %v6664_v61 = vor.u32 %v8423_v44, %v6663_v41  ;;  %v6519_v63 = vld [vmem:[%s9578_s25 + $0x4c8] sm:$0xf] }
 0x110   : > { %2447 = vmatpush.bf16.msra.mxu0 %v5960_v56  ;;  %2437 = vmatmul.bf16.gmra.mxu3 %v9818_v15  ;;  %v6536_v56 = vor.u32 %v8391_v40, %v6535_v39  ;;  %v8387_v0 = vld [vmem:[%s9578_s25 + $0x4d4] sm:$0xf0]  ;;  %v6647_v3 = vld [vmem:[%s9578_s25 + $0x5c8] sm:$0xf] }
 0x111   : > { %2504 = vmatpush.bf16.msra.mxu3 %v6344_v62  ;;  %v6920_v62 = vor.u32 %v8487_v47, %v6919_v46  ;;  %v8419_v4 = vld [vmem:[%s9578_s25 + $0x5d4] sm:$0xf0]  ;;  %v6903_v5 = vld [vmem:[%s9578_s25 + $0x7c8] sm:$0xf] }
 0x112   : > { %2486 = vmatpush.bf16.msra.mxu2 %v6200_v11  ;;  %v8483_v8 = vld [vmem:[%s9578_s25 + $0x7d4] sm:$0xf0]  ;;  %v6776_v11 = vor.u32 %v8451_v60, %v6775_v59  ;;  %v6648_v13 = vor.u32 %v8419_v4, %v6647_v3  ;;  %v6503_v19 = vld [vmem:[%s9578_s25 + $0x4a8] sm:$0xf] }
 0x113   : > { %2467 = vmatpush.bf16.msra.mxu1 %v6072_v17  ;;  %v6904_v16 = vor.u32 %v8483_v8, %v6903_v5  ;;  %v6759_v17 = vld [vmem:[%s9578_s25 + $0x6a8] sm:$0xf]  ;;  %v8383_v20 = vld [vmem:[%s9578_s25 + $0x4b4] sm:$0xf0] }
 0x114   : > { %2448 = vmatpush.bf16.msra.mxu0 %v5944_v12  ;;  %v6520_v12 = vor.u32 %v8387_v0, %v6519_v63  ;;  %v6631_v21 = vld [vmem:[%s9578_s25 + $0x5a8] sm:$0xf]  ;;  %v8415_v23 = vld [vmem:[%s9578_s25 + $0x5b4] sm:$0xf0]  ;;  %v6504_v29 = vor.u32 %v8383_v20, %v6503_v19 }
 0x115   : > { %2505 = vmatpush.bf16.msra.mxu3 %v6328_v18  ;;  %v8447_v18 = vld [vmem:[%s9578_s25 + $0x6b4] sm:$0xf0]  ;;  %v6887_v24 = vld [vmem:[%s9578_s25 + $0x7a8] sm:$0xf] }
 0x116   : > { %2487 = vmatpush.bf16.msra.mxu2 %v6184_v26  ;;  %v8479_v25 = vld [vmem:[%s9578_s25 + $0x7b4] sm:$0xf0]  ;;  %v6760_v28 = vor.u32 %v8447_v18, %v6759_v17  ;;  %v6743_v30 = vld [vmem:[%s9578_s25 + $0x688] sm:$0xf] }
 0x117   : > { %2468 = vmatpush.bf16.msra.mxu1 %v6056_v31  ;;  %v2167_v26 = vpop.f32.mrf.mxu1  ;;  %v8443_v31 = vld [vmem:[%s9578_s25 + $0x694] sm:$0xf0]  ;;  %v6888_v33 = vor.u32 %v8479_v25, %v6887_v24  ;;  %v6487_v34 = vld [vmem:[%s9578_s25 + $0x488] sm:$0xf] }
 0x118   : > { %2449 = vmatpush.bf16.msra.mxu0 %v5928_v27  ;;  %v2148_v22 = vpop.f32.mrf.mxu0  ;;  %v8379_v35 = vld [vmem:[%s9578_s25 + $0x494] sm:$0xf0]  ;;  %v6615_v36 = vld [vmem:[%s9578_s25 + $0x588] sm:$0xf]  ;;  %v6744_v40 = vor.u32 %v8443_v31, %v6743_v30 }
 0x119   : > { %2506 = vmatpush.bf16.msra.mxu3 %v6312_v32  ;;  %v2168_v27 = vadd.f32 %v2167_v26, %v2148_v22  ;;  %v6632_v32 = vor.u32 %v8415_v23, %v6631_v21  ;;  %v8411_v37 = vld [vmem:[%s9578_s25 + $0x594] sm:$0xf0]  ;;  %v6871_v38 = vld [vmem:[%s9578_s25 + $0x788] sm:$0xf]  ;;  %v6488_v41 = vor.u32 %v8379_v35, %v6487_v34 }
 0x11a   : > { %2488 = vmatpush.bf16.msra.mxu2 %v6168_v42  ;;  %v8475_v39 = vld [vmem:[%s9578_s25 + $0x794] sm:$0xf0]  ;;  %v6727_v42 = vld [vmem:[%s9578_s25 + $0x668] sm:$0xf]  ;;  %v6616_v46 = vor.u32 %v8411_v37, %v6615_v36 }
 0x11b   : > { %2469 = vmatpush.bf16.msra.mxu1 %v6040_v48  ;;  %v6872_v47 = vor.u32 %v8475_v39, %v6871_v38  ;;  %v6471_v48 = vld [vmem:[%s9578_s25 + $0x468] sm:$0xf]  ;;  %v8471_v63 = vld [vmem:[%s9578_s25 + $0x774] sm:$0xf0] }
 0x11c   : > { %2450 = vmatpush.bf16.msra.mxu0 %v5912_v43  ;;  %v8439_v43 = vld [vmem:[%s9578_s25 + $0x674] sm:$0xf0]  ;;  %v6455_v17 = vld [vmem:[%s9578_s25 + $0x448] sm:$0xf] }
 0x11d   : > { %2507 = vmatpush.bf16.msra.mxu3 %v6296_v50  ;;  %2489 = vmatmul.bf16.vlgmr.msra.gmra.mxu2 %v9676_v55  ;;  %v8375_v50 = vld [vmem:[%s9578_s25 + $0x474] sm:$0xf0]  ;;  %v6728_v3 = vor.u32 %v8439_v43, %v6727_v42  ;;  %v6583_v19 = vld [vmem:[%s9578_s25 + $0x548] sm:$0xf] }
 0x11e   : > { %2557 = vmatpush.bf16.msrb.mxu2 %v6792_v53  ;;  %2470 = vmatmul.bf16.vlgmr.msra.gmra.mxu1 %v9674_v54  ;;  %v2186_v44 = vpop.f32.mrf.mxu2  ;;  %v6599_v53 = vld [vmem:[%s9578_s25 + $0x568] sm:$0xf]  ;;  %v6472_v8 = vor.u32 %v8375_v50, %v6471_v48  ;;  %v8371_v18 = vld [vmem:[%s9578_s25 + $0x454] sm:$0xf0] }
 0x11f   : > { %2538 = vmatpush.bf16.msrb.mxu1 %v6664_v61  ;;  %2451 = vmatmul.bf16.vlgmr.msra.gmra.mxu0 %v9669_v49  ;;  %v2205_v59 = vpop.f32.mrf.mxu3  ;;  %v8407_v61 = vld [vmem:[%s9578_s25 + $0x574] sm:$0xf0]  ;;  %v2169_v0 = vpop.f32.mrf.mxu1  ;;  %v6839_v21 = vld [vmem:[%s9578_s25 + $0x748] sm:$0xf]  ;;  %v6456_v24 = vor.u32 %v8371_v18, %v6455_v17 }
 0x120   : > { %2519 = vmatpush.bf16.msrb.mxu0 %v6536_v56  ;;  %2508 = vmatmul.bf16.vlgmr.msra.gmra.mxu3 %v9680_v58  ;;  %v2187_v56 = vadd.f32 %v2186_v44, %v2168_v27  ;;  %v2150_v60 = vpop.f32.mrf.mxu0  ;;  %v8403_v20 = vld [vmem:[%s9578_s25 + $0x554] sm:$0xf0]  ;;  %v6695_v25 = vld [vmem:[%s9578_s25 + $0x628] sm:$0xf] }
 0x121   : > { %2576 = vmatpush.bf16.msrb.mxu3 %v6920_v62  ;;  %v6855_v62 = vld [vmem:[%s9578_s25 + $0x768] sm:$0xf]  ;;  %v2170_v5 = vadd.f32 %v2169_v0, %v2150_v60  ;;  %v8467_v22 = vld [vmem:[%s9578_s25 + $0x754] sm:$0xf0]  ;;  %v8261_v0 = vld [vmem:[%s9578_s25 + $0xec] sm:$0xf] }
 0x122   : > { %2558 = vmatpush.bf16.msrb.mxu2 %v6776_v11  ;;  %v10026_v4 = vadd.f32 %v2205_v59, %v2187_v56  ;;  %v6711_v11 = vld [vmem:[%s9578_s25 + $0x648] sm:$0xf]  ;;  %v8431_v26 = vld [vmem:[%s9578_s25 + $0x634] sm:$0xf0] }
 0x123   : > { %2539 = vmatpush.bf16.msrb.mxu1 %v6648_v13  ;;  %v6600_v13 = vor.u32 %v8407_v61, %v6599_v53  ;;  %v6439_v30 = vld [vmem:[%s9578_s25 + $0x428] sm:$0xf]  ;;  %v8367_v31 = vld [vmem:[%s9578_s25 + $0x434] sm:$0xf0] }
 0x124   : > { %2520 = vmatpush.bf16.msrb.mxu0 %v6520_v12  ;;  %v8435_v12 = vld [vmem:[%s9578_s25 + $0x654] sm:$0xf0]  ;;  %v6823_v37 = vld [vmem:[%s9578_s25 + $0x728] sm:$0xf]  ;;  %v6440_v44 = vor.u32 %v8367_v31, %v6439_v30  ;;  %v8257_v30 = vld [vmem:[%s9578_s25 + $0xcc] sm:$0xf] }
 0x125   : > { %2577 = vmatpush.bf16.msrb.mxu3 %v6904_v16  ;;  %v6856_v16 = vor.u32 %v8471_v63, %v6855_v62  ;;  %v6712_v23 = vor.u32 %v8435_v12, %v6711_v11  ;;  %v8399_v36 = vld [vmem:[%s9578_s25 + $0x534] sm:$0xf0]  ;;  %v6551_v56 = vld [vmem:[%s9578_s25 + $0x508] sm:$0xf]  ;;  %v8325_v62 = vld [vmem:[%s9578_s25 + $0x2ec] sm:$0xf] }
 0x126   : > { %2559 = vmatpush.bf16.msrb.mxu2 %v6760_v28  ;;  %v2188_v27 = vpop.f32.mrf.mxu2  ;;  %v6584_v28 = vor.u32 %v8403_v20, %v6583_v19  ;;  %v8463_v38 = vld [vmem:[%s9578_s25 + $0x734] sm:$0xf0]  ;;  %v6807_v60 = vld [vmem:[%s9578_s25 + $0x708] sm:$0xf]  ;;  %v6281_v63 = vld [vmem:[%s9578_s25 + $0x2f8] sm:$0xf0] }
 0x127   : > { %2540 = vmatpush.bf16.msrb.mxu1 %v6632_v32  ;;  %v6567_v32 = vld [vmem:[%s9578_s25 + $0x528] sm:$0xf]  ;;  %v2207_v34 = vpop.f32.mrf.mxu3  ;;  %v2172_v39 = vpop.f32.mrf.mxu1  ;;  %v8363_v48 = vld [vmem:[%s9578_s25 + $0x414] sm:$0xf0]  ;;  %v6824_v53 = vor.u32 %v8463_v38, %v6823_v37  ;;  %v6153_v12 = vld [vmem:[%s9578_s25 + $0x1f8] sm:$0xf0] }
 0x128   : > { %2521 = vmatpush.bf16.msrb.mxu0 %v6504_v29  ;;  %v6840_v29 = vor.u32 %v8467_v22, %v6839_v21  ;;  %v6568_v50 = vor.u32 %v8399_v36, %v6567_v32  ;;  %v8395_v59 = vld [vmem:[%s9578_s25 + $0x514] sm:$0xf0]  ;;  %v6009_v31 = vld [vmem:[%s9578_s25 + $0xd8] sm:$0xf0]  ;;  %v8289_v32 = vld [vmem:[%s9578_s25 + $0x1cc] sm:$0xf] }
 0x129   : > { %2578 = vmatpush.bf16.msrb.mxu3 %v6888_v33  ;;  %v2189_v33 = vadd.f32 %v2188_v27, %v2170_v5  ;;  %v8459_v61 = vld [vmem:[%s9578_s25 + $0x714] sm:$0xf0]  ;;  %v8293_v5 = vld [vmem:[%s9578_s25 + $0x1ec] sm:$0xf]  ;;  %v6552_v18 = vor.u32 %v8395_v59, %v6551_v56  ;;  %v6393_v37 = vld [vmem:[%s9578_s25 + $0x3d8] sm:$0xf0] }
 0x12a   : > { %2560 = vmatpush.bf16.msrb.mxu2 %v6744_v40  ;;  %v2153_v35 = vpop.f32.mrf.mxu0  ;;  %v6696_v40 = vor.u32 %v8431_v26, %v6695_v25  ;;  %v6808_v19 = vor.u32 %v8459_v61, %v6807_v60  ;;  %v8321_v25 = vld [vmem:[%s9578_s25 + $0x2cc] sm:$0xf]  ;;  %v6265_v26 = vld [vmem:[%s9578_s25 + $0x2d8] sm:$0xf0] }
 0x12b   : > { %2541 = vmatpush.bf16.msrb.mxu1 %v6616_v46  ;;  %v10045_v42 = vadd.f32 %v2207_v34, %v2189_v33  ;;  %v2173_v43 = vadd.f32 %v2172_v39, %v2153_v35  ;;  %v8427_v46 = vld [vmem:[%s9578_s25 + $0x614] sm:$0xf0]  ;;  %v6137_v35 = vld [vmem:[%s9578_s25 + $0x1d8] sm:$0xf0]  ;;  %v8353_v36 = vld [vmem:[%s9578_s25 + $0x3cc] sm:$0xf]  ;;  %v6268_v38 = vor.u32 %v8321_v25, %v6265_v26  ;;  %v6012_v39 = vor.u32 %v8257_v30, %v6009_v31 }
 0x12c   : > { %2522 = vmatpush.bf16.msrb.mxu0 %v6488_v41  ;;  %v6679_v41 = vld [vmem:[%s9578_s25 + $0x608] sm:$0xf]  ;;  %v6121_v59 = vld [vmem:[%s9578_s25 + $0x1b8] sm:$0xf0]  ;;  %v8349_v60 = vld [vmem:[%s9578_s25 + $0x3ac] sm:$0xf] }
 0x12d   : > { %2579 = vmatpush.bf16.msrb.mxu3 %v6872_v47  ;;  %v6423_v47 = vld [vmem:[%s9578_s25 + $0x408] sm:$0xf]  ;;  %2494 = vmatmul.bf16.gmra.mxu2 %v9720_v52  ;;  %v6377_v61 = vld [vmem:[%s9578_s25 + $0x3b8] sm:$0xf0]  ;;  %v8309_v25 = vld [vmem:[%s9578_s25 + $0x26c] sm:$0xf] }
 0x12e   : > { %2561 = vmatpush.bf16.msrb.mxu2 %v6728_v3  ;;  %2475 = vmatmul.bf16.gmra.mxu1 %v9718_v51  ;;  %v6025_v3 = vld [vmem:[%s9578_s25 + $0xf8] sm:$0xf0]  ;;  %v6424_v11 = vor.u32 %v8363_v48, %v6423_v47  ;;  %v2191_v17 = vpop.f32.mrf.mxu2  ;;  %v8253_v47 = vld [vmem:[%s9578_s25 + $0xac] sm:$0xf] }
 0x12f   : > { %2542 = vmatpush.bf16.msrb.mxu1 %v6600_v13  ;;  %2456 = vmatmul.bf16.gmra.mxu0 %v9713_v45  ;;  %v8357_v13 = vld [vmem:[%s9578_s25 + $0x3ec] sm:$0xf]  ;;  %v2192_v20 = vadd.f32 %v2191_v17, %v2173_v43  ;;  %v2210_v21 = vpop.f32.mrf.mxu3  ;;  %v2174_v27 = vpop.f32.mrf.mxu1  ;;  %v5993_v48 = vld [vmem:[%s9578_s25 + $0xb8] sm:$0xf0] }
 0x130   : > { %2523 = vmatpush.bf16.msrb.mxu0 %v6472_v8  ;;  %2513 = vmatmul.bf16.gmra.mxu3 %v9724_v57  ;;  %v6680_v8 = vor.u32 %v8427_v46, %v6679_v41  ;;  %v6396_v41 = vor.u32 %v8353_v36, %v6393_v37  ;;  %v8317_v43 = vld [vmem:[%s9578_s25 + $0x2ac] sm:$0xf]  ;;  %v6217_v26 = vld [vmem:[%s9578_s25 + $0x278] sm:$0xf0] }
 0x131   : > { %2580 = vmatpush.bf16.msrb.mxu3 %v6856_v16  ;;  %v6409_v16 = vld [vmem:[%s9578_s25 + $0x3f8] sm:$0xf0]  ;;  %v10071_v33 = vadd.f32 %v2210_v21, %v2192_v20  ;;  %v8249_v17 = vld [vmem:[%s9578_s25 + $0x8c] sm:$0xf] }
 0x132   : > { %2562 = vmatpush.bf16.msrb.mxu2 %v6712_v23  ;;  %v2155_v22 = vpop.f32.mrf.mxu0  ;;  %v6284_v23 = vor.u32 %v8325_v62, %v6281_v63  ;;  %v6105_v21 = vld [vmem:[%s9578_s25 + $0x198] sm:$0xf0]  ;;  %v8277_v31 = vld [vmem:[%s9578_s25 + $0x16c] sm:$0xf] }
 0x133   : > { %2543 = vmatpush.bf16.msrb.mxu1 %v6584_v28  ;;  %v6156_v28 = vor.u32 %v8293_v5, %v6153_v12  ;;  %v2175_v34 = vadd.f32 %v2174_v27, %v2155_v22  ;;  %v6233_v12 = vld [vmem:[%s9578_s25 + $0x298] sm:$0xf0]  ;;  %v8341_v36 = vld [vmem:[%s9578_s25 + $0x36c] sm:$0xf] }
 0x134   : > { %2524 = vmatpush.bf16.msrb.mxu0 %v6456_v24  ;;  %v6028_v24 = vor.u32 %v8261_v0, %v6025_v3  ;;  %v6361_v22 = vld [vmem:[%s9578_s25 + $0x398] sm:$0xf0] }
 0x135   : > { %2581 = vmatpush.bf16.msrb.mxu3 %v6840_v29  ;;  %v6412_v29 = vor.u32 %v8357_v13, %v6409_v16  ;;  %v6380_v16 = vor.u32 %v8349_v60, %v6377_v61  ;;  %v5961_v30 = vld [vmem:[%s9578_s25 + $0x78] sm:$0xf0] }
 0x136   : > { %2563 = vmatpush.bf16.msrb.mxu2 %v6696_v40  ;;  %v6140_v40 = vor.u32 %v8289_v32, %v6137_v35  ;;  %v2193_v46 = vpop.f32.mrf.mxu2  ;;  %v6089_v35 = vld [vmem:[%s9578_s25 + $0x178] sm:$0xf0] }
 0x137   : > { %2544 = vmatpush.bf16.msrb.mxu1 %v6568_v50  ;;  %v8285_v50 = vld [vmem:[%s9578_s25 + $0x1ac] sm:$0xf]  ;;  %v2212_v56 = vpop.f32.mrf.mxu3  ;;  %v6345_v37 = vld [vmem:[%s9578_s25 + $0x378] sm:$0xf0] }
 0x138   : > { %2525 = vmatpush.bf16.msrb.mxu0 %v6440_v44  ;;  %v6249_v44 = vld [vmem:[%s9578_s25 + $0x2b8] sm:$0xf0]  ;;  %v6124_v13 = vor.u32 %v8285_v50, %v6121_v59  ;;  %v6092_v50 = vor.u32 %v8277_v31, %v6089_v35  ;;  %v8233_v31 = vld [vmem:[%s9578_s25 + $0xc] sm:$0xf] }
 0x139   : > { %2582 = vmatpush.bf16.msrb.mxu3 %v6824_v53  ;;  %v2194_v53 = vadd.f32 %v2193_v46, %v2175_v34  ;;  %v6252_v5 = vor.u32 %v8317_v43, %v6249_v44  ;;  %v6220_v43 = vor.u32 %v8309_v25, %v6217_v26  ;;  %v8305_v46 = vld [vmem:[%s9578_s25 + $0x24c] sm:$0xf]  ;;  %v5945_v59 = vld [vmem:[%s9578_s25 + $0x58] sm:$0xf0] }
 0x13a   : > { %2564 = vmatpush.bf16.msrb.mxu2 %v6680_v8  ;;  %v5996_v8 = vor.u32 %v8253_v47, %v5993_v48  ;;  %v6201_v47 = vld [vmem:[%s9578_s25 + $0x258] sm:$0xf0]  ;;  %v8297_v26 = vld [vmem:[%s9578_s25 + $0x20c] sm:$0xf] }
 0x13b   : > { %2545 = vmatpush.bf16.msrb.mxu1 %v6552_v18  ;;  %v2243_v63 = vpop.f32.mrf.mxu1  ;;  %v10084_v0 = vadd.f32 %v2212_v56, %v2194_v53  ;;  %v5977_v18 = vld [vmem:[%s9578_s25 + $0x98] sm:$0xf0]  ;;  %v6348_v53 = vor.u32 %v8341_v36, %v6345_v37  ;;  %v8241_v56 = vld [vmem:[%s9578_s25 + $0x4c] sm:$0xf] }
 0x13c   : > { %2526 = vmatpush.bf16.msrb.mxu0 %v6424_v11  ;;  %v2224_v62 = vpop.f32.mrf.mxu0  ;;  %v8313_v11 = vld [vmem:[%s9578_s25 + $0x28c] sm:$0xf]  ;;  %v6073_v61 = vld [vmem:[%s9578_s25 + $0x158] sm:$0xf0] }
 0x13d   : > { %2583 = vmatpush.bf16.msrb.mxu3 %v6808_v19  ;;  %v2225_v3 = vadd.f32 %v2224_v62, %v10026_v4  ;;  %v8281_v19 = vld [vmem:[%s9578_s25 + $0x18c] sm:$0xf]  ;;  %2565 = vmatmul.bf16.vlgmr.msrb.gmra.mxu2 %v9772_v6  ;;  %v6041_v37 = vld [vmem:[%s9578_s25 + $0x118] sm:$0xf0] }
 0x13e   : > { %2633 = vmatpush.bf16.msra.mxu2 %v6284_v23  ;;  %2546 = vmatmul.bf16.vlgmr.msrb.gmra.mxu1 %v9767_v2  ;;  %v8345_v4 = vld [vmem:[%s9578_s25 + $0x38c] sm:$0xf]  ;;  %v6236_v23 = vor.u32 %v8313_v11, %v6233_v12  ;;  %v6108_v27 = vor.u32 %v8281_v19, %v6105_v21  ;;  %v6185_v11 = vld [vmem:[%s9578_s25 + $0x238] sm:$0xf0] }
 0x13f   : > { %2614 = vmatpush.bf16.msra.mxu1 %v6156_v28  ;;  %v2244_v20 = vadd.f32 %v2243_v63, %v2225_v3  ;;  %2527 = vmatmul.bf16.vlgmr.msrb.gmra.mxu0 %v9765_v1  ;;  %v6364_v28 = vor.u32 %v8345_v4, %v6361_v22  ;;  %v8337_v62 = vld [vmem:[%s9578_s25 + $0x34c] sm:$0xf]  ;;  %v6329_v63 = vld [vmem:[%s9578_s25 + $0x358] sm:$0xf0]  ;;  %v6204_v3 = vor.u32 %v8305_v46, %v6201_v47 }
 0x140   : > { %2595 = vmatpush.bf16.msra.mxu0 %v6028_v24  ;;  %2584 = vmatmul.bf16.vlgmr.msrb.gmra.mxu3 %v9774_v7  ;;  %v5980_v24 = vor.u32 %v8249_v17, %v5977_v18  ;;  %v2262_v32 = vpop.f32.mrf.mxu2  ;;  %v5929_v17 = vld [vmem:[%s9578_s25 + $0x38] sm:$0xf0]  ;;  %v8269_v18 = vld [vmem:[%s9578_s25 + $0x12c] sm:$0xf] }
 0x141   : > { %2652 = vmatpush.bf16.msra.mxu3 %v6412_v29  ;;  %v8245_v29 = vld [vmem:[%s9578_s25 + $0x6c] sm:$0xf]  ;;  %v6057_v21 = vld [vmem:[%s9578_s25 + $0x138] sm:$0xf0] }
 0x142   : > { %2634 = vmatpush.bf16.msra.mxu2 %v6268_v38  ;;  %v2263_v38 = vadd.f32 %v2262_v32, %v2244_v20  ;;  %v5964_v44 = vor.u32 %v8245_v29, %v5961_v30  ;;  %v8333_v4 = vld [vmem:[%s9578_s25 + $0x32c] sm:$0xf]  ;;  %v6313_v22 = vld [vmem:[%s9578_s25 + $0x338] sm:$0xf0]  ;;  %v6060_v35 = vor.u32 %v8269_v18, %v6057_v21 }
 0x143   : > { %2615 = vmatpush.bf16.msra.mxu1 %v6140_v40  ;;  %v2281_v34 = vpop.f32.mrf.mxu3  ;;  %v2245_v40 = vpop.f32.mrf.mxu1  ;;  %v6169_v30 = vld [vmem:[%s9578_s25 + $0x218] sm:$0xf0]  ;;  %v6316_v36 = vor.u32 %v8333_v4, %v6313_v22  ;;  %v8421_v47 = vld [vmem:[%s9578_s25 + $0x5ec] sm:$0xf] }
 0x144   : > { %2596 = vmatpush.bf16.msra.mxu0 %v6012_v39  ;;  %v2226_v39 = vpop.f32.mrf.mxu0  ;;  %v10110_v48 = vadd.f32 %v2281_v34, %v2263_v38  ;;  %v5913_v32 = vld [vmem:[%s9578_s25 + $0x18] sm:$0xf0]  ;;  %v8329_v38 = vld [vmem:[%s9578_s25 + $0x30c] sm:$0xf] }
 0x145   : > { %2653 = vmatpush.bf16.msra.mxu3 %v6396_v41  ;;  %v2227_v41 = vadd.f32 %v2226_v39, %v10045_v42  ;;  %v8273_v42 = vld [vmem:[%s9578_s25 + $0x14c] sm:$0xf]  ;;  %v6537_v46 = vld [vmem:[%s9578_s25 + $0x4f8] sm:$0xf0] }
 0x146   : > { %2635 = vmatpush.bf16.msra.mxu2 %v6252_v5  ;;  %v5948_v5 = vor.u32 %v8241_v56, %v5945_v59  ;;  %v6076_v12 = vor.u32 %v8273_v42, %v6073_v61  ;;  %v6665_v56 = vld [vmem:[%s9578_s25 + $0x5f8] sm:$0xf0]  ;;  %v8485_v59 = vld [vmem:[%s9578_s25 + $0x7ec] sm:$0xf] }
 0x147   : > { %2616 = vmatpush.bf16.msra.mxu1 %v6124_v13  ;;  %v2246_v60 = vadd.f32 %v2245_v40, %v2227_v41  ;;  %v6332_v13 = vor.u32 %v8337_v62, %v6329_v63  ;;  %v6297_v40 = vld [vmem:[%s9578_s25 + $0x318] sm:$0xf0]  ;;  %v8453_v41 = vld [vmem:[%s9578_s25 + $0x6ec] sm:$0xf] }
 0x148   : > { %2597 = vmatpush.bf16.msra.mxu0 %v5996_v8  ;;  %v8301_v8 = vld [vmem:[%s9578_s25 + $0x22c] sm:$0xf]  ;;  %v2264_v19 = vpop.f32.mrf.mxu2  ;;  %v6921_v42 = vld [vmem:[%s9578_s25 + $0x7f8] sm:$0xf0]  ;;  %v6300_v61 = vor.u32 %v8329_v38, %v6297_v40 }
 0x149   : > { %2654 = vmatpush.bf16.msra.mxu3 %v6380_v16  ;;  %v8237_v16 = vld [vmem:[%s9578_s25 + $0x2c] sm:$0xf]  ;;  %v6924_v18 = vor.u32 %v8485_v59, %v6921_v42  ;;  %v6649_v22 = vld [vmem:[%s9578_s25 + $0x5d8] sm:$0xf0] }
 0x14a   : > { %2636 = vmatpush.bf16.msra.mxu2 %v6236_v23  ;;  %v2265_v23 = vadd.f32 %v2264_v19, %v2246_v60  ;;  %v5932_v29 = vor.u32 %v8237_v16, %v5929_v17  ;;  %v6668_v17 = vor.u32 %v8421_v47, %v6665_v56  ;;  %v8385_v19 = vld [vmem:[%s9578_s25 + $0x4cc] sm:$0xf]  ;;  %v6633_v38 = vld [vmem:[%s9578_s25 + $0x5b8] sm:$0xf0] }
 0x14b   : > { %2617 = vmatpush.bf16.msra.mxu1 %v6108_v27  ;;  %v2283_v20 = vpop.f32.mrf.mxu3  ;;  %v2248_v25 = vpop.f32.mrf.mxu1  ;;  %v8417_v21 = vld [vmem:[%s9578_s25 + $0x5cc] sm:$0xf]  ;;  %v6889_v40 = vld [vmem:[%s9578_s25 + $0x7b8] sm:$0xf0] }
 0x14c   : > { %2598 = vmatpush.bf16.msra.mxu0 %v5980_v24  ;;  %v2229_v24 = vpop.f32.mrf.mxu0  ;;  %v10131_v34 = vadd.f32 %v2283_v20, %v2265_v23  ;;  %v6521_v20 = vld [vmem:[%s9578_s25 + $0x4d8] sm:$0xf0]  ;;  %v8481_v23 = vld [vmem:[%s9578_s25 + $0x7cc] sm:$0xf] }
 0x14d   : > { %2655 = vmatpush.bf16.msra.mxu3 %v6364_v28  ;;  %v2230_v27 = vadd.f32 %v2229_v24, %v10071_v33  ;;  %v6188_v28 = vor.u32 %v8301_v8, %v6185_v11  ;;  %v8265_v33 = vld [vmem:[%s9578_s25 + $0x10c] sm:$0xf]  ;;  %2570 = vmatmul.bf16.gmra.mxu2 %v9816_v14  ;;  %v6777_v11 = vld [vmem:[%s9578_s25 + $0x6d8] sm:$0xf0] }
 0x14e   : > { %2637 = vmatpush.bf16.msra.mxu2 %v6220_v43  ;;  %2551 = vmatmul.bf16.gmra.mxu1 %v9811_v10  ;;  %v6793_v43 = vld [vmem:[%s9578_s25 + $0x6f8] sm:$0xf0]  ;;  %v6044_v60 = vor.u32 %v8265_v33, %v6041_v37  ;;  %v8449_v8 = vld [vmem:[%s9578_s25 + $0x6cc] sm:$0xf] }
 0x14f   : > { %2618 = vmatpush.bf16.msra.mxu1 %v6092_v50  ;;  %v2249_v39 = vadd.f32 %v2248_v25, %v2230_v27  ;;  %2532 = vmatmul.bf16.gmra.mxu0 %v9809_v9  ;;  %v6172_v50 = vor.u32 %v8297_v26, %v6169_v30  ;;  %v6905_v24 = vld [vmem:[%s9578_s25 + $0x7d8] sm:$0xf0]  ;;  %v6780_v27 = vor.u32 %v8449_v8, %v6777_v11  ;;  %v8445_v30 = vld [vmem:[%s9578_s25 + $0x6ac] sm:$0xf] }
 0x150   : > { %2599 = vmatpush.bf16.msra.mxu0 %v5964_v44  ;;  %2589 = vmatmul.bf16.gmra.mxu3 %v9818_v15  ;;  %v8389_v44 = vld [vmem:[%s9578_s25 + $0x4ec] sm:$0xf]  ;;  %v2267_v62 = vpop.f32.mrf.mxu2  ;;  %v6745_v56 = vld [vmem:[%s9578_s25 + $0x698] sm:$0xf0] }
 0x151   : > { %2656 = vmatpush.bf16.msra.mxu3 %v6348_v53  ;;  %v5916_v53 = vor.u32 %v8233_v31, %v5913_v32  ;;  %v6761_v31 = vld [vmem:[%s9578_s25 + $0x6b8] sm:$0xf0]  ;;  %v8381_v32 = vld [vmem:[%s9578_s25 + $0x4ac] sm:$0xf] }
 0x152   : > { %2638 = vmatpush.bf16.msra.mxu2 %v6204_v3  ;;  %v6796_v3 = vor.u32 %v8453_v41, %v6793_v43  ;;  %v6764_v47 = vor.u32 %v8445_v30, %v6761_v31  ;;  %v6873_v8 = vld [vmem:[%s9578_s25 + $0x798] sm:$0xf0] }
 0x153   : > { %2619 = vmatpush.bf16.msra.mxu1 %v6076_v12  ;;  %v2286_v63 = vpop.f32.mrf.mxu3  ;;  %v2268_v12 = vadd.f32 %v2267_v62, %v2249_v39  ;;  %v2250_v16 = vpop.f32.mrf.mxu1  ;;  %v8477_v39 = vld [vmem:[%s9578_s25 + $0x7ac] sm:$0xf]  ;;  %v6489_v62 = vld [vmem:[%s9578_s25 + $0x498] sm:$0xf0] }
 0x154   : > { %2600 = vmatpush.bf16.msra.mxu0 %v5948_v5  ;;  %v6540_v5 = vor.u32 %v8389_v44, %v6537_v46 }
 0x155   : > { %2657 = vmatpush.bf16.msra.mxu3 %v6332_v13  ;;  %v2231_v13 = vpop.f32.mrf.mxu0  ;;  %v10158_v25 = vadd.f32 %v2286_v63, %v2268_v12  ;;  %v8409_v63 = vld [vmem:[%s9578_s25 + $0x58c] sm:$0xf] }
 0x156   : > { %2639 = vmatpush.bf16.msra.mxu2 %v6188_v28  ;;  %v2232_v4 = vadd.f32 %v2231_v13, %v10084_v0  ;;  %v6524_v0 = vor.u32 %v8385_v19, %v6521_v20  ;;  %v6652_v28 = vor.u32 %v8417_v21, %v6649_v22  ;;  %v6729_v13 = vld [vmem:[%s9578_s25 + $0x678] sm:$0xf0]  ;;  %v8469_v21 = vld [vmem:[%s9578_s25 + $0x76c] sm:$0xf] }
 0x157   : > { %2620 = vmatpush.bf16.msra.mxu1 %v6060_v35  ;;  %v6505_v35 = vld [vmem:[%s9578_s25 + $0x4b8] sm:$0xf0] }
 0x158   : > { %2601 = vmatpush.bf16.msra.mxu0 %v5932_v29  ;;  %v2251_v26 = vadd.f32 %v2250_v16, %v2232_v4  ;;  %v6908_v29 = vor.u32 %v8481_v23, %v6905_v24  ;;  %v2269_v33 = vpop.f32.mrf.mxu2  ;;  %v6601_v20 = vld [vmem:[%s9578_s25 + $0x578] sm:$0xf0] }
 0x159   : > { %2658 = vmatpush.bf16.msra.mxu3 %v6316_v36  ;;  %v8413_v36 = vld [vmem:[%s9578_s25 + $0x5ac] sm:$0xf]  ;;  %v6857_v4 = vld [vmem:[%s9578_s25 + $0x778] sm:$0xf0] }
 0x15a   : > { %2640 = vmatpush.bf16.msra.mxu2 %v6172_v50  ;;  %v2270_v41 = vadd.f32 %v2269_v33, %v2251_v26  ;;  %v6508_v50 = vor.u32 %v8381_v32, %v6505_v35  ;;  %v6636_v42 = vor.u32 %v8413_v36, %v6633_v38  ;;  %v6860_v32 = vor.u32 %v8469_v21, %v6857_v4  ;;  %v8369_v35 = vld [vmem:[%s9578_s25 + $0x44c] sm:$0xf]  ;;  %v6457_v36 = vld [vmem:[%s9578_s25 + $0x458] sm:$0xf0] }
 0x15b   : > { %2621 = vmatpush.bf16.msra.mxu1 %v6044_v60  ;;  %v2288_v37 = vpop.f32.mrf.mxu3  ;;  %v2319_v44 = vpop.f32.mrf.mxu1  ;;  %v6892_v60 = vor.u32 %v8477_v39, %v6889_v40  ;;  %v8401_v33 = vld [vmem:[%s9578_s25 + $0x54c] sm:$0xf]  ;;  %v6841_v39 = vld [vmem:[%s9578_s25 + $0x758] sm:$0xf0] }
 0x15c   : > { %2602 = vmatpush.bf16.msra.mxu0 %v5916_v53  ;;  %v8441_v53 = vld [vmem:[%s9578_s25 + $0x68c] sm:$0xf]  ;;  %v10170_v59 = vadd.f32 %v2288_v37, %v2270_v41  ;;  %v6585_v37 = vld [vmem:[%s9578_s25 + $0x558] sm:$0xf0]  ;;  %v6460_v41 = vor.u32 %v8369_v35, %v6457_v36 }
 0x15d   : > { %2659 = vmatpush.bf16.msra.mxu3 %v6300_v61  ;;  %v2300_v43 = vpop.f32.mrf.mxu0  ;;  %v8377_v61 = vld [vmem:[%s9578_s25 + $0x48c] sm:$0xf]  ;;  %2641 = vmatmul.bf16.vlgmr.msra.gmra.mxu2 %v9676_v55  ;;  %v6748_v11 = vor.u32 %v8441_v53, %v6745_v56  ;;  %v6441_v53 = vld [vmem:[%s9578_s25 + $0x438] sm:$0xf0] }
 0x15e   : > { %2709 = vmatpush.bf16.msrb.mxu2 %v6796_v3  ;;  %v2320_v46 = vadd.f32 %v2319_v44, %v2300_v43  ;;  %2622 = vmatmul.bf16.vlgmr.msra.gmra.mxu1 %v9674_v54  ;;  %v6617_v3 = vld [vmem:[%s9578_s25 + $0x598] sm:$0xf0]  ;;  %v6492_v12 = vor.u32 %v8377_v61, %v6489_v62  ;;  %v8405_v55 = vld [vmem:[%s9578_s25 + $0x56c] sm:$0xf] }
 0x15f   : > { %2690 = vmatpush.bf16.msrb.mxu1 %v6668_v17  ;;  %2603 = vmatmul.bf16.vlgmr.msra.gmra.mxu0 %v9669_v49  ;;  %v8437_v49 = vld [vmem:[%s9578_s25 + $0x66c] sm:$0xf]  ;;  %v6620_v54 = vor.u32 %v8409_v63, %v6617_v3  ;;  %v6604_v31 = vor.u32 %v8405_v55, %v6601_v20  ;;  %v6697_v44 = vld [vmem:[%s9578_s25 + $0x638] sm:$0xf0] }
 0x160   : > { %2671 = vmatpush.bf16.msrb.mxu0 %v6540_v5  ;;  %v8473_v5 = vld [vmem:[%s9578_s25 + $0x78c] sm:$0xf]  ;;  %2660 = vmatmul.bf16.vlgmr.msra.gmra.mxu3 %v9680_v58  ;;  %v2338_v19 = vpop.f32.mrf.mxu2  ;;  %v6569_v61 = vld [vmem:[%s9578_s25 + $0x538] sm:$0xf0] }
 0x161   : > { %2728 = vmatpush.bf16.msrb.mxu3 %v6924_v18  ;;  %v6876_v16 = vor.u32 %v8473_v5, %v6873_v8  ;;  %v8373_v17 = vld [vmem:[%s9578_s25 + $0x46c] sm:$0xf]  ;;  %v6473_v18 = vld [vmem:[%s9578_s25 + $0x478] sm:$0xf0]  ;;  %v2339_v22 = vadd.f32 %v2338_v19, %v2320_v46  ;;  %v6588_v46 = vor.u32 %v8401_v33, %v6585_v37  ;;  %v7343_v33 = vld [vmem:[%s9584_s16 + $0x2c0] sm:$0xf] }
 0x162   : > { %2710 = vmatpush.bf16.msrb.mxu2 %v6780_v27  ;;  %v6732_v27 = vor.u32 %v8437_v49, %v6729_v13  ;;  %v8465_v38 = vld [vmem:[%s9578_s25 + $0x74c] sm:$0xf]  ;;  %v6825_v63 = vld [vmem:[%s9578_s25 + $0x738] sm:$0xf0]  ;;  %v8594_v37 = vld [vmem:[%s9584_s16 + $0x2cc] sm:$0xf0] }
 0x163   : > { %2691 = vmatpush.bf16.msrb.mxu1 %v6652_v28  ;;  %v2357_v58 = vpop.f32.mrf.mxu3  ;;  %v2321_v24 = vpop.f32.mrf.mxu1  ;;  %v8433_v28 = vld [vmem:[%s9578_s25 + $0x64c] sm:$0xf]  ;;  %v6553_v20 = vld [vmem:[%s9578_s25 + $0x518] sm:$0xf0] }
 0x164   : > { %2672 = vmatpush.bf16.msrb.mxu0 %v6524_v0  ;;  %v6476_v0 = vor.u32 %v8373_v17, %v6473_v18  ;;  %v10192_v30 = vadd.f32 %v2357_v58, %v2339_v22  ;;  %v8429_v43 = vld [vmem:[%s9578_s25 + $0x62c] sm:$0xf]  ;;  %v6425_v17 = vld [vmem:[%s9578_s25 + $0x418] sm:$0xf0]  ;;  %v7359_v22 = vld [vmem:[%s9584_s16 + $0x2e0] sm:$0xf] }
 0x165   : > { %2729 = vmatpush.bf16.msrb.mxu3 %v6908_v29  ;;  %v2302_v23 = vpop.f32.mrf.mxu0  ;;  %v6713_v29 = vld [vmem:[%s9578_s25 + $0x658] sm:$0xf0]  ;;  %v8397_v56 = vld [vmem:[%s9578_s25 + $0x52c] sm:$0xf]  ;;  %v6700_v49 = vor.u32 %v8429_v43, %v6697_v44  ;;  %v7087_v44 = vld [vmem:[%s9584_s16 + $0xc0] sm:$0xf] }
 0x166   : > { %2711 = vmatpush.bf16.msrb.mxu2 %v6764_v47  ;;  %v2322_v26 = vadd.f32 %v2321_v24, %v2302_v23  ;;  %v6716_v40 = vor.u32 %v8433_v28, %v6713_v29  ;;  %v6844_v47 = vor.u32 %v8465_v38, %v6841_v39  ;;  %v8461_v62 = vld [vmem:[%s9578_s25 + $0x72c] sm:$0xf]  ;;  %v6572_v55 = vor.u32 %v8397_v56, %v6569_v61  ;;  %v6809_v4 = vld [vmem:[%s9578_s25 + $0x718] sm:$0xf0]  ;;  %v8598_v23 = vld [vmem:[%s9584_s16 + $0x2ec] sm:$0xf0] }
 0x167   : > { %2692 = vmatpush.bf16.msrb.mxu1 %v6636_v42  ;;  %v6828_v19 = vor.u32 %v8461_v62, %v6825_v63  ;;  %v8393_v58 = vld [vmem:[%s9578_s25 + $0x50c] sm:$0xf]  ;;  %v7103_v24 = vld [vmem:[%s9584_s16 + $0xe0] sm:$0xf]  ;;  %v7360_v35 = vor.u32 %v8598_v23, %v7359_v22  ;;  %v7344_v61 = vor.u32 %v8594_v37, %v7343_v33  ;;  %v8518_v37 = vld [vmem:[%s9584_s16 + $0x6c] sm:$0xf0] }
 0x168   : > { %2673 = vmatpush.bf16.msrb.mxu0 %v6508_v50  ;;  %v8365_v50 = vld [vmem:[%s9578_s25 + $0x42c] sm:$0xf]  ;;  %v2340_v42 = vpop.f32.mrf.mxu2  ;;  %v7487_v29 = vld [vmem:[%s9584_s16 + $0x3e0] sm:$0xf] }
 0x169   : > { %2730 = vmatpush.bf16.msrb.mxu3 %v6892_v60  ;;  %v2341_v3 = vadd.f32 %v2340_v42, %v2322_v26  ;;  %v6444_v13 = vor.u32 %v8365_v50, %v6441_v53  ;;  %v8457_v21 = vld [vmem:[%s9578_s25 + $0x70c] sm:$0xf]  ;;  %v8534_v26 = vld [vmem:[%s9584_s16 + $0xec] sm:$0xf0]  ;;  %v7471_v56 = vld [vmem:[%s9584_s16 + $0x3c0] sm:$0xf] }
 0x16a   : > { %2712 = vmatpush.bf16.msrb.mxu2 %v6748_v11  ;;  %v8425_v11 = vld [vmem:[%s9578_s25 + $0x60c] sm:$0xf]  ;;  %v7104_v36 = vor.u32 %v8534_v26, %v7103_v24  ;;  %v8562_v53 = vld [vmem:[%s9584_s16 + $0x1cc] sm:$0xf0]  ;;  %v7311_v23 = vld [vmem:[%s9584_s16 + $0x280] sm:$0xf] }
 0x16b   : > { %2693 = vmatpush.bf16.msrb.mxu1 %v6620_v54  ;;  %v2359_v60 = vpop.f32.mrf.mxu3  ;;  %v2324_v8 = vpop.f32.mrf.mxu1  ;;  %v6681_v54 = vld [vmem:[%s9578_s25 + $0x618] sm:$0xf0]  ;;  %v8626_v42 = vld [vmem:[%s9584_s16 + $0x3cc] sm:$0xf0]  ;;  %v7039_v33 = vld [vmem:[%s9584_s16 + $0x60] sm:$0xf] }
 0x16c   : > { %2674 = vmatpush.bf16.msrb.mxu0 %v6492_v12  ;;  %v10212_v18 = vadd.f32 %v2359_v60, %v2341_v3  ;;  %v7472_v3 = vor.u32 %v8626_v42, %v7471_v56  ;;  %v8586_v24 = vld [vmem:[%s9584_s16 + $0x28c] sm:$0xf0]  ;;  %v7279_v56 = vld [vmem:[%s9584_s16 + $0x240] sm:$0xf] }
 0x16d   : > { %2731 = vmatpush.bf16.msrb.mxu3 %v6876_v16  ;;  %v2305_v5 = vpop.f32.mrf.mxu0  ;;  %v8361_v16 = vld [vmem:[%s9578_s25 + $0x40c] sm:$0xf]  ;;  %2646 = vmatmul.bf16.gmra.mxu2 %v9720_v52  ;;  %v6812_v52 = vor.u32 %v8457_v21, %v6809_v4  ;;  %v8578_v42 = vld [vmem:[%s9584_s16 + $0x24c] sm:$0xf0] }
 0x16e   : > { %2713 = vmatpush.bf16.msrb.mxu2 %v6732_v27  ;;  %v2325_v12 = vadd.f32 %v2324_v8, %v2305_v5  ;;  %2627 = vmatmul.bf16.gmra.mxu1 %v9718_v51  ;;  %v7231_v27 = vld [vmem:[%s9584_s16 + $0x1e0] sm:$0xf]  ;;  %v6428_v28 = vor.u32 %v8361_v16, %v6425_v17  ;;  %v6556_v51 = vor.u32 %v8393_v58, %v6553_v20  ;;  %v8590_v8 = vld [vmem:[%s9584_s16 + $0x2ac] sm:$0xf0] }
 0x16f   : > { %2694 = vmatpush.bf16.msrb.mxu1 %v6604_v31  ;;  %2608 = vmatmul.bf16.gmra.mxu0 %v9713_v45  ;;  %v8566_v45 = vld [vmem:[%s9584_s16 + $0x1ec] sm:$0xf0]  ;;  %v7327_v5 = vld [vmem:[%s9584_s16 + $0x2a0] sm:$0xf] }
 0x170   : > { %2675 = vmatpush.bf16.msrb.mxu0 %v6476_v0  ;;  %2665 = vmatmul.bf16.gmra.mxu3 %v9724_v57  ;;  %v6684_v0 = vor.u32 %v8425_v11, %v6681_v54  ;;  %v8630_v31 = vld [vmem:[%s9584_s16 + $0x3ec] sm:$0xf0]  ;;  %v2343_v57 = vpop.f32.mrf.mxu2  ;;  %v7071_v11 = vld [vmem:[%s9584_s16 + $0xa0] sm:$0xf]  ;;  %v7328_v4 = vor.u32 %v8590_v8, %v7327_v5 }
 0x171   : > { %2732 = vmatpush.bf16.msrb.mxu3 %v6860_v32  ;;  %v2344_v38 = vadd.f32 %v2343_v57, %v2325_v12  ;;  %v7488_v43 = vor.u32 %v8630_v31, %v7487_v29  ;;  %v8526_v12 = vld [vmem:[%s9584_s16 + $0xac] sm:$0xf0]  ;;  %v7455_v17 = vld [vmem:[%s9584_s16 + $0x3a0] sm:$0xf]  ;;  %v7312_v57 = vor.u32 %v8586_v24, %v7311_v23 }
 0x172   : > { %2714 = vmatpush.bf16.msrb.mxu2 %v6716_v40  ;;  %v8558_v16 = vld [vmem:[%s9584_s16 + $0x1ac] sm:$0xf0]  ;;  %v7072_v22 = vor.u32 %v8526_v12, %v7071_v11  ;;  %v7183_v29 = vld [vmem:[%s9584_s16 + $0x180] sm:$0xf] }
 0x173   : > { %2695 = vmatpush.bf16.msrb.mxu1 %v6588_v46  ;;  %v2362_v32 = vpop.f32.mrf.mxu3  ;;  %v2326_v40 = vpop.f32.mrf.mxu1  ;;  %v8530_v46 = vld [vmem:[%s9584_s16 + $0xcc] sm:$0xf0]  ;;  %v7407_v12 = vld [vmem:[%s9584_s16 + $0x340] sm:$0xf] }
 0x174   : > { %2676 = vmatpush.bf16.msrb.mxu0 %v6460_v41  ;;  %v7232_v41 = vor.u32 %v8566_v45, %v7231_v27  ;;  %v10238_v60 = vadd.f32 %v2362_v32, %v2344_v38  ;;  %v7088_v62 = vor.u32 %v8530_v46, %v7087_v44  ;;  %v8522_v45 = vld [vmem:[%s9584_s16 + $0x8c] sm:$0xf0]  ;;  %v7391_v24 = vld [vmem:[%s9584_s16 + $0x320] sm:$0xf] }
 0x175   : > { %2733 = vmatpush.bf16.msrb.mxu3 %v6844_v47  ;;  %v2307_v39 = vpop.f32.mrf.mxu0  ;;  %v7215_v47 = vld [vmem:[%s9584_s16 + $0x1c0] sm:$0xf]  ;;  %v8514_v5 = vld [vmem:[%s9584_s16 + $0x4c] sm:$0xf0] }
 0x176   : > { %2715 = vmatpush.bf16.msrb.mxu2 %v6700_v49  ;;  %v2327_v50 = vadd.f32 %v2326_v40, %v2307_v39  ;;  %v7216_v63 = vor.u32 %v8562_v53, %v7215_v47  ;;  %v7199_v49 = vld [vmem:[%s9584_s16 + $0x1a0] sm:$0xf]  ;;  %v8550_v39 = vld [vmem:[%s9584_s16 + $0x16c] sm:$0xf0]  ;;  %v7040_v53 = vor.u32 %v8518_v37, %v7039_v33 }
 0x177   : > { %2696 = vmatpush.bf16.msrb.mxu1 %v6572_v55  ;;  %v8622_v55 = vld [vmem:[%s9584_s16 + $0x3ac] sm:$0xf0]  ;;  %v7200_v27 = vor.u32 %v8558_v16, %v7199_v49  ;;  %v7423_v40 = vld [vmem:[%s9584_s16 + $0x360] sm:$0xf] }
 0x178   : > { %2677 = vmatpush.bf16.msrb.mxu0 %v6444_v13  ;;  %v2345_v13 = vpop.f32.mrf.mxu2  ;;  %v8546_v11 = vld [vmem:[%s9584_s16 + $0x14c] sm:$0xf0]  ;;  %v7263_v16 = vld [vmem:[%s9584_s16 + $0x220] sm:$0xf] }
 0x179   : > { %2734 = vmatpush.bf16.msrb.mxu3 %v6828_v19  ;;  %v2346_v19 = vadd.f32 %v2345_v13, %v2327_v50  ;;  %v8610_v49 = vld [vmem:[%s9584_s16 + $0x34c] sm:$0xf0]  ;;  %v7280_v13 = vor.u32 %v8578_v42, %v7279_v56  ;;  %v7375_v33 = vld [vmem:[%s9584_s16 + $0x300] sm:$0xf] }
 0x17a   : > { %2716 = vmatpush.bf16.msrb.mxu2 %v6684_v0  ;;  %v7456_v0 = vor.u32 %v8622_v55, %v7455_v17  ;;  %v8574_v17 = vld [vmem:[%s9584_s16 + $0x22c] sm:$0xf0]  ;;  %v7855_v42 = vld [vmem:[%s9584_s16 + $0x6c0] sm:$0xf] }
 0x17b   : > { %2697 = vmatpush.bf16.msrb.mxu1 %v6556_v51  ;;  %v2364_v54 = vpop.f32.mrf.mxu3  ;;  %v2395_v20 = vpop.f32.mrf.mxu1  ;;  %v7439_v51 = vld [vmem:[%s9584_s16 + $0x380] sm:$0xf]  ;;  %v8542_v23 = vld [vmem:[%s9584_s16 + $0x12c] sm:$0xf0] }
 0x17c   : > { %2678 = vmatpush.bf16.msrb.mxu0 %v6428_v28  ;;  %v10251_v26 = vadd.f32 %v2364_v54, %v2346_v19  ;;  %v7055_v28 = vld [vmem:[%s9584_s16 + $0x80] sm:$0xf]  ;;  %v7408_v19 = vor.u32 %v8610_v49, %v7407_v12  ;;  %v8658_v12 = vld [vmem:[%s9584_s16 + $0x4cc] sm:$0xf0] }
 0x17d   : > { %2735 = vmatpush.bf16.msrb.mxu3 %v6812_v52  ;;  %v2376_v58 = vpop.f32.mrf.mxu0  ;;  %v8618_v52 = vld [vmem:[%s9584_s16 + $0x38c] sm:$0xf0]  ;;  %2717 = vmatmul.bf16.vlgmr.msrb.gmra.mxu2 %v9772_v6  ;;  %v7056_v32 = vor.u32 %v8522_v45, %v7055_v28  ;;  %v7167_v6 = vld [vmem:[%s9584_s16 + $0x160] sm:$0xf] }
 0x17e   : > { %4417 = vmatpush.bf16.msra.mxu2 %v7360_v35  ;;  %v2377_v21 = vadd.f32 %v2376_v58, %v10192_v30  ;;  %2698 = vmatmul.bf16.vlgmr.msrb.gmra.mxu1 %v9767_v2  ;;  %v8554_v30 = vld [vmem:[%s9584_s16 + $0x18c] sm:$0xf0]  ;;  %v7007_v58 = vld [vmem:[%s9584_s16 + $0x20] sm:$0xf] }
 0x17f   : > { %4398 = vmatpush.bf16.msra.mxu1 %v7232_v41  ;;  %2679 = vmatmul.bf16.vlgmr.msrb.gmra.mxu0 %v9765_v1  ;;  %v7295_v1 = vld [vmem:[%s9584_s16 + $0x260] sm:$0xf]  ;;  %v8582_v35 = vld [vmem:[%s9584_s16 + $0x26c] sm:$0xf0]  ;;  %v7184_v2 = vor.u32 %v8554_v30, %v7183_v29  ;;  %v7264_v30 = vor.u32 %v8574_v17, %v7263_v16 }
 0x180   : > { %4379 = vmatpush.bf16.msra.mxu0 %v7104_v36  ;;  %v2396_v31 = vadd.f32 %v2395_v20, %v2377_v21  ;;  %2736 = vmatmul.bf16.vlgmr.msrb.gmra.mxu3 %v9774_v7  ;;  %v7440_v36 = vor.u32 %v8618_v52, %v7439_v51  ;;  %v2414_v38 = vpop.f32.mrf.mxu2  ;;  %v8614_v41 = vld [vmem:[%s9584_s16 + $0x36c] sm:$0xf0]  ;;  %v7296_v50 = vor.u32 %v8582_v35, %v7295_v1  ;;  %v7135_v21 = vld [vmem:[%s9584_s16 + $0x120] sm:$0xf] }
 0x181   : > { %4436 = vmatpush.bf16.msra.mxu3 %v7488_v43  ;;  %v8510_v20 = vld [vmem:[%s9584_s16 + $0x2c] sm:$0xf0]  ;;  %v7247_v29 = vld [vmem:[%s9584_s16 + $0x200] sm:$0xf]  ;;  %v7136_v35 = vor.u32 %v8542_v23, %v7135_v21  ;;  %v8488_v21 = vld [vmem:[#allocation5 + $0x4] sm:$0xf] }
 0x182   : > { %4418 = vmatpush.bf16.msra.mxu2 %v7344_v61  ;;  %v2415_v43 = vadd.f32 %v2414_v38, %v2396_v31  ;;  %v7008_v51 = vor.u32 %v8510_v20, %v7007_v58  ;;  %v8570_v52 = vld [vmem:[%s9584_s16 + $0x20c] sm:$0xf0]  ;;  %v7871_v38 = vld [vmem:[%s9584_s16 + $0x6e0] sm:$0xf]  ;;  %v6935_v23 = vld [vmem:[#allocation5 + $0x8] sm:$0xf] }
 0x183   : > { %4399 = vmatpush.bf16.msra.mxu1 %v7216_v63  ;;  %v2433_v7 = vpop.f32.mrf.mxu3  ;;  %v2397_v46 = vpop.f32.mrf.mxu1  ;;  %v7424_v63 = vor.u32 %v8614_v41, %v7423_v40  ;;  %v8662_v40 = vld [vmem:[%s9584_s16 + $0x4ec] sm:$0xf0]  ;;  %v7743_v41 = vld [vmem:[%s9584_s16 + $0x5e0] sm:$0xf] }
 0x184   : > { %4380 = vmatpush.bf16.msra.mxu0 %v7088_v62  ;;  %v10274_v61 = vadd.f32 %v2433_v7, %v2415_v43  ;;  %v7168_v62 = vor.u32 %v8550_v39, %v7167_v6  ;;  %v8602_v6 = vld [vmem:[%s9584_s16 + $0x30c] sm:$0xf0]  ;;  %v7615_v39 = vld [vmem:[%s9584_s16 + $0x4e0] sm:$0xf]  ;;  %v7248_v43 = vor.u32 %v8570_v52, %v7247_v29 }
 0x185   : > { %4437 = vmatpush.bf16.msra.mxu3 %v7472_v3  ;;  %v2378_v44 = vpop.f32.mrf.mxu0  ;;  %v7023_v3 = vld [vmem:[%s9584_s16 + $0x40] sm:$0xf]  ;;  %v8726_v7 = vld [vmem:[%s9584_s16 + $0x6ec] sm:$0xf0]  ;;  %v7616_v56 = vor.u32 %v8662_v40, %v7615_v39 }
 0x186   : > { %4419 = vmatpush.bf16.msra.mxu2 %v7328_v4  ;;  %v2379_v47 = vadd.f32 %v2378_v44, %v10212_v18  ;;  %v7151_v18 = vld [vmem:[%s9584_s16 + $0x140] sm:$0xf]  ;;  %v7024_v54 = vor.u32 %v8514_v5, %v7023_v3  ;;  %v8754_v17 = vld [vmem:[%s9584_s16 + $0x7cc] sm:$0xf0] }
 0x187   : > { %4400 = vmatpush.bf16.msra.mxu1 %v7200_v27  ;;  %v7152_v55 = vor.u32 %v8546_v11, %v7151_v18  ;;  %v8606_v27 = vld [vmem:[%s9584_s16 + $0x32c] sm:$0xf0]  ;;  %v7599_v11 = vld [vmem:[%s9584_s16 + $0x4c0] sm:$0xf] }
 0x188   : > { %4381 = vmatpush.bf16.msra.mxu0 %v7072_v22  ;;  %v2398_v8 = vadd.f32 %v2397_v46, %v2379_v47  ;;  %v2416_v4 = vpop.f32.mrf.mxu2  ;;  %v7999_v46 = vld [vmem:[%s9584_s16 + $0x7e0] sm:$0xf]  ;;  %v8758_v47 = vld [vmem:[%s9584_s16 + $0x7ec] sm:$0xf0] }
 0x189   : > { %4438 = vmatpush.bf16.msra.mxu3 %v7456_v0  ;;  %v7727_v49 = vld [vmem:[%s9584_s16 + $0x5c0] sm:$0xf] }
 0x18a   : > { %4420 = vmatpush.bf16.msra.mxu2 %v7312_v57  ;;  %v2417_v0 = vadd.f32 %v2416_v4, %v2398_v8  ;;  %v6991_v57 = vld [vmem:[%s9584_s16] sm:$0xf]  ;;  %v8000_v8 = vor.u32 %v8758_v47, %v7999_v46  ;;  %v6929_v4 = vld [vmem:[#allocation5 + $0x20] sm:$0xf0] }
 0x18b   : > { %4401 = vmatpush.bf16.msra.mxu1 %v7184_v2  ;;  %v2435_v22 = vpop.f32.mrf.mxu3  ;;  %v2400_v45 = vpop.f32.mrf.mxu1  ;;  %v7392_v2 = vor.u32 %v8606_v27, %v7391_v24  ;;  %v7983_v16 = vld [vmem:[%s9584_s16 + $0x7c0] sm:$0xf]  ;;  %v8493_v24 = vld [vmem:[#allocation5 + $0x24] sm:$0xf0]  ;;  %v8489_v27 = vld [vmem:[#allocation5 + $0xc] sm:$0xf] }
 0x18c   : > { %4382 = vmatpush.bf16.msra.mxu0 %v7056_v32  ;;  %v8506_v32 = vld [vmem:[%s9584_s16 + $0xc] sm:$0xf0]  ;;  %v10295_v1 = vadd.f32 %v2435_v22, %v2417_v0  ;;  %v8492_v20 = vld [vmem:[#allocation5 + $0x1c] sm:$0xf0]  ;;  %v7600_v22 = vor.u32 %v8658_v12, %v7599_v11 }
 0x18d   : > { %4439 = vmatpush.bf16.msra.mxu3 %v7440_v36  ;;  %v2381_v28 = vpop.f32.mrf.mxu0  ;;  %v8538_v36 = vld [vmem:[%s9584_s16 + $0x10c] sm:$0xf0]  ;;  %2722 = vmatmul.bf16.gmra.mxu2 %v9816_v14  ;;  %v6992_v44 = vor.u32 %v8506_v32, %v6991_v57  ;;  %v7376_v14 = vor.u32 %v8602_v6, %v7375_v33  ;;  %v7839_v29 = vld [vmem:[%s9584_s16 + $0x6a0] sm:$0xf] }
 0x18e   : > { %4421 = vmatpush.bf16.msra.mxu2 %v7296_v50  ;;  %v2382_v31 = vadd.f32 %v2381_v28, %v10238_v60  ;;  %v7119_v60 = vld [vmem:[%s9584_s16 + $0x100] sm:$0xf]  ;;  %2703 = vmatmul.bf16.gmra.mxu1 %v9811_v10  ;;  %v7984_v28 = vor.u32 %v8754_v17, %v7983_v16  ;;  %v8750_v33 = vld [vmem:[%s9584_s16 + $0x7ac] sm:$0xf0] }
 0x18f   : > { %4402 = vmatpush.bf16.msra.mxu1 %v7168_v62  ;;  %2684 = vmatmul.bf16.gmra.mxu0 %v9809_v9  ;;  %v8694_v9 = vld [vmem:[%s9584_s16 + $0x5ec] sm:$0xf0]  ;;  %v7120_v10 = vor.u32 %v8538_v36, %v7119_v60  ;;  %v7711_v52 = vld [vmem:[%s9584_s16 + $0x5a0] sm:$0xf] }
 0x190   : > { %4383 = vmatpush.bf16.msra.mxu0 %v7040_v53  ;;  %v2401_v37 = vadd.f32 %v2400_v45, %v2382_v31  ;;  %2741 = vmatmul.bf16.gmra.mxu3 %v9818_v15  ;;  %v2419_v15 = vpop.f32.mrf.mxu2  ;;  %v7872_v53 = vor.u32 %v8726_v7, %v7871_v38  ;;  %v8722_v62 = vld [vmem:[%s9584_s16 + $0x6cc] sm:$0xf0]  ;;  %v7744_v18 = vor.u32 %v8694_v9, %v7743_v41  ;;  %v6937_v45 = vld [vmem:[#allocation5 + $0x28] sm:$0xf0]  ;;  %v7967_v36 = vld [vmem:[%s9584_s16 + $0x7a0] sm:$0xf] }
 0x191   : > { %4440 = vmatpush.bf16.msra.mxu3 %v7424_v63  ;;  %v8718_v31 = vld [vmem:[%s9584_s16 + $0x6ac] sm:$0xf0]  ;;  %v10336_v7 = vor.u32 %v8493_v24, %v6935_v23  ;;  %v10338_v39 = vor.u32 %v8489_v27, %v6937_v45  ;;  %v7551_v11 = vld [vmem:[%s9584_s16 + $0x460] sm:$0xf]  ;;  %v8496_v45 = vld [vmem:[#allocation5 + $0x44] sm:$0xf] }
 0x192   : > { %4422 = vmatpush.bf16.msra.mxu2 %v7280_v13  ;;  %v2420_v63 = vadd.f32 %v2419_v15, %v2401_v37  ;;  %v8686_v60 = vld [vmem:[%s9584_s16 + $0x5ac] sm:$0xf0]  ;;  %v7840_v41 = vor.u32 %v8718_v31, %v7839_v29  ;;  %v7935_v17 = vld [vmem:[%s9584_s16 + $0x760] sm:$0xf]  ;;  %v6961_v29 = vld [vmem:[#allocation5 + $0x60] sm:$0xf0] }
 0x193   : > { %4403 = vmatpush.bf16.msra.mxu1 %v7152_v55  ;;  %v2438_v50 = vpop.f32.mrf.mxu3  ;;  %v2402_v5 = vpop.f32.mrf.mxu1  ;;  %v8714_v9 = vld [vmem:[%s9584_s16 + $0x68c] sm:$0xf0]  ;;  %v7712_v47 = vor.u32 %v8686_v60, %v7711_v52  ;;  %v7791_v23 = vld [vmem:[%s9584_s16 + $0x640] sm:$0xf] }
 0x194   : > { %4384 = vmatpush.bf16.msra.mxu0 %v7024_v54  ;;  %v8690_v54 = vld [vmem:[%s9584_s16 + $0x5cc] sm:$0xf0]  ;;  %v10322_v55 = vadd.f32 %v2438_v50, %v2420_v63  ;;  %v7695_v50 = vld [vmem:[%s9584_s16 + $0x580] sm:$0xf] }
 0x195   : > { %4441 = vmatpush.bf16.msra.mxu3 %v7408_v19  ;;  %v2383_v3 = vpop.f32.mrf.mxu0  ;;  %v6927_v19 = vld [vmem:[#allocation5] sm:$0xf]  ;;  %v7728_v0 = vor.u32 %v8690_v54, %v7727_v49  ;;  %v8650_v15 = vld [vmem:[%s9584_s16 + $0x48c] sm:$0xf0] }
 0x196   : > { %4423 = vmatpush.bf16.msra.mxu2 %v7264_v30  ;;  %v2384_v13 = vadd.f32 %v2383_v3, %v10251_v26  ;;  %v7856_v26 = vor.u32 %v8722_v62, %v7855_v42  ;;  %v7583_v30 = vld [vmem:[%s9584_s16 + $0x4a0] sm:$0xf]  ;;  %v8746_v42 = vld [vmem:[%s9584_s16 + $0x78c] sm:$0xf0] }
 0x197   : > { %4404 = vmatpush.bf16.msra.mxu1 %v7136_v35  ;;  %v10329_v35 = vor.u32 %v8492_v20, %v6927_v19  ;;  %v7807_v3 = vld [vmem:[%s9584_s16 + $0x660] sm:$0xf]  ;;  %v8646_v12 = vld [vmem:[%s9584_s16 + $0x46c] sm:$0xf0] }
 0x198   : > { %4385 = vmatpush.bf16.msra.mxu0 %v7008_v51  ;;  %v2403_v58 = vadd.f32 %v2402_v5, %v2384_v13  ;;  %v8654_v51 = vld [vmem:[%s9584_s16 + $0x4ac] sm:$0xf0]  ;;  %v2421_v57 = vpop.f32.mrf.mxu2  ;;  %v7679_v49 = vld [vmem:[%s9584_s16 + $0x560] sm:$0xf] }
 0x199   : > { %4442 = vmatpush.bf16.msra.mxu3 %v7392_v2  ;;  %v10331_v2 = vor.u32 %v8488_v21, %v6929_v4  ;;  %v8710_v5 = vld [vmem:[%s9584_s16 + $0x66c] sm:$0xf0]  ;;  %v7919_v60 = vld [vmem:[%s9584_s16 + $0x740] sm:$0xf] }
 0x19a   : > { %4424 = vmatpush.bf16.msra.mxu2 %v7248_v43  ;;  %v2422_v37 = vadd.f32 %v2421_v57, %v2403_v58  ;;  %v7584_v43 = vor.u32 %v8654_v51, %v7583_v30  ;;  %v8678_v16 = vld [vmem:[%s9584_s16 + $0x56c] sm:$0xf0]  ;;  %v7535_v51 = vld [vmem:[%s9584_s16 + $0x440] sm:$0xf] }
 0x19b   : > { %4405 = vmatpush.bf16.msra.mxu1 %v7120_v10  ;;  %v2440_v32 = vpop.f32.mrf.mxu3  ;;  %v2471_v38 = vpop.f32.mrf.mxu1  ;;  %v7968_v10 = vor.u32 %v8750_v33, %v7967_v36  ;;  %v8742_v19 = vld [vmem:[%s9584_s16 + $0x76c] sm:$0xf0]  ;;  %v7680_v31 = vor.u32 %v8678_v16, %v7679_v49  ;;  %v7663_v57 = vld [vmem:[%s9584_s16 + $0x540] sm:$0xf]  ;;  %v6967_v33 = vld [vmem:[#allocation5 + $0x48] sm:$0xf] }
 0x19c   : > { %4386 = vmatpush.bf16.msra.mxu0 %v6992_v44  ;;  %v7823_v44 = vld [vmem:[%s9584_s16 + $0x680] sm:$0xf]  ;;  %v10342_v46 = vadd.f32 %v2440_v32, %v2422_v37  ;;  %v8706_v24 = vld [vmem:[%s9584_s16 + $0x64c] sm:$0xf0]  ;;  %v7936_v30 = vor.u32 %v8742_v19, %v7935_v17  ;;  %v8501_v37 = vld [vmem:[#allocation5 + $0x64] sm:$0xf0] }
 0x19d   : > { %4443 = vmatpush.bf16.msra.mxu3 %v7376_v14  ;;  %v2452_v6 = vpop.f32.mrf.mxu0  ;;  %v7567_v14 = vld [vmem:[%s9584_s16 + $0x480] sm:$0xf]  ;;  %4425 = vmatmul.bf16.vlgmr.msra.gmra.mxu2 %v10336_v7  ;;  %v7824_v62 = vor.u32 %v8714_v9, %v7823_v44  ;;  %v8642_v52 = vld [vmem:[%s9584_s16 + $0x44c] sm:$0xf0] }
 0x19e   : > { %4493 = vmatpush.bf16.msrb.mxu2 %v7872_v53  ;;  %v2472_v40 = vadd.f32 %v2471_v38, %v2452_v6  ;;  %4406 = vmatmul.bf16.vlgmr.msra.gmra.mxu1 %v10331_v2  ;;  %v8682_v53 = vld [vmem:[%s9584_s16 + $0x58c] sm:$0xf0]  ;;  %v7568_v63 = vor.u32 %v8650_v15, %v7567_v14  ;;  %v8497_v6 = vld [vmem:[#allocation5 + $0x4c] sm:$0xf]  ;;  %v7647_v15 = vld [vmem:[%s9584_s16 + $0x520] sm:$0xf] }
 0x19f   : > { %4474 = vmatpush.bf16.msrb.mxu1 %v7744_v18  ;;  %4387 = vmatmul.bf16.vlgmr.msra.gmra.mxu0 %v10329_v35  ;;  %v7696_v18 = vor.u32 %v8682_v53, %v7695_v50  ;;  %v8674_v32 = vld [vmem:[%s9584_s16 + $0x54c] sm:$0xf0]  ;;  %v6969_v38 = vld [vmem:[#allocation5 + $0x68] sm:$0xf0]  ;;  %v7759_v49 = vld [vmem:[%s9584_s16 + $0x600] sm:$0xf] }
 0x1a0   : > { %4455 = vmatpush.bf16.msrb.mxu0 %v7616_v56  ;;  %v7951_v56 = vld [vmem:[%s9584_s16 + $0x780] sm:$0xf]  ;;  %4444 = vmatmul.bf16.vlgmr.msra.gmra.mxu3 %v10338_v39  ;;  %v2490_v13 = vpop.f32.mrf.mxu2  ;;  %v8738_v36 = vld [vmem:[%s9584_s16 + $0x74c] sm:$0xf0]  ;;  %v7664_v9 = vor.u32 %v8674_v32, %v7663_v57  ;;  %v8628_v57 = vld [vmem:[%s9584_s16 + $0x3e4] sm:$0xf] }
 0x1a1   : > { %4512 = vmatpush.bf16.msrb.mxu3 %v8000_v8  ;;  %v7952_v8 = vor.u32 %v8746_v42, %v7951_v56  ;;  %v2491_v58 = vadd.f32 %v2490_v13, %v2472_v40  ;;  %v7792_v40 = vor.u32 %v8706_v24, %v7791_v23  ;;  %v8702_v44 = vld [vmem:[%s9584_s16 + $0x62c] sm:$0xf0]  ;;  %v10379_v42 = vor.u32 %v8496_v45, %v6961_v29  ;;  %v7503_v19 = vld [vmem:[%s9584_s16 + $0x400] sm:$0xf]  ;;  %v8532_v45 = vld [vmem:[%s9584_s16 + $0xe4] sm:$0xf] }
 0x1a2   : > { %4494 = vmatpush.bf16.msrb.mxu2 %v7856_v26  ;;  %v7808_v26 = vor.u32 %v8710_v5, %v7807_v3  ;;  %v8638_v14 = vld [vmem:[%s9584_s16 + $0x42c] sm:$0xf0]  ;;  %v7887_v23 = vld [vmem:[%s9584_s16 + $0x700] sm:$0xf]  ;;  %v7105_v29 = vld [vmem:[%s9584_s16 + $0xf0] sm:$0xf0] }
 0x1a3   : > { %4475 = vmatpush.bf16.msrb.mxu1 %v7728_v0  ;;  %v2509_v54 = vpop.f32.mrf.mxu3  ;;  %v2473_v21 = vpop.f32.mrf.mxu1  ;;  %v6959_v0 = vld [vmem:[#allocation5 + $0x40] sm:$0xf]  ;;  %v8734_v3 = vld [vmem:[%s9584_s16 + $0x72c] sm:$0xf0]  ;;  %v7489_v32 = vld [vmem:[%s9584_s16 + $0x3f0] sm:$0xf0] }
 0x1a4   : > { %4456 = vmatpush.bf16.msrb.mxu0 %v7600_v22  ;;  %v7552_v22 = vor.u32 %v8646_v12, %v7551_v11  ;;  %v10364_v27 = vadd.f32 %v2509_v54, %v2491_v58  ;;  %v10384_v11 = vor.u32 %v8501_v37, %v6967_v33  ;;  %v10386_v12 = vor.u32 %v8497_v6, %v6969_v38  ;;  %v8698_v17 = vld [vmem:[%s9584_s16 + $0x60c] sm:$0xf0] }
 0x1a5   : > { %4513 = vmatpush.bf16.msrb.mxu3 %v7984_v28  ;;  %v2454_v20 = vpop.f32.mrf.mxu0  ;;  %v8500_v28 = vld [vmem:[#allocation5 + $0x5c] sm:$0xf0]  ;;  %v8634_v58 = vld [vmem:[%s9584_s16 + $0x40c] sm:$0xf0]  ;;  %v7108_v38 = vor.u32 %v8532_v45, %v7105_v29 }
 0x1a6   : > { %4495 = vmatpush.bf16.msrb.mxu2 %v7840_v41  ;;  %v2474_v4 = vadd.f32 %v2473_v21, %v2454_v20  ;;  %v7536_v41 = vor.u32 %v8642_v52, %v7535_v51  ;;  %v10377_v56 = vor.u32 %v8500_v28, %v6959_v0  ;;  %v8730_v24 = vld [vmem:[%s9584_s16 + $0x70c] sm:$0xf0]  ;;  %v8596_v0 = vld [vmem:[%s9584_s16 + $0x2e4] sm:$0xf]  ;;  %v7361_v28 = vld [vmem:[%s9584_s16 + $0x2f0] sm:$0xf0]  ;;  %v7504_v51 = vor.u32 %v8634_v58, %v7503_v19 }
 0x1a7   : > { %4476 = vmatpush.bf16.msrb.mxu1 %v7712_v47  ;;  %v7920_v47 = vor.u32 %v8738_v36, %v7919_v60  ;;  %v7233_v52 = vld [vmem:[%s9584_s16 + $0x1f0] sm:$0xf0]  ;;  %v7888_v36 = vor.u32 %v8730_v24, %v7887_v23  ;;  %v7364_v6 = vor.u32 %v8596_v0, %v7361_v28  ;;  %v8495_v19 = vld [vmem:[#allocation5 + $0x34] sm:$0xf0]  ;;  %v8491_v58 = vld [vmem:[#allocation5 + $0x1c] sm:$0xf] }
 0x1a8   : > { %4457 = vmatpush.bf16.msrb.mxu0 %v7584_v43  ;;  %v7775_v43 = vld [vmem:[%s9584_s16 + $0x620] sm:$0xf]  ;;  %v2492_v50 = vpop.f32.mrf.mxu2  ;;  %v7329_v23 = vld [vmem:[%s9584_s16 + $0x2b0] sm:$0xf0]  ;;  %v8524_v24 = vld [vmem:[%s9584_s16 + $0xa4] sm:$0xf] }
 0x1a9   : > { %4514 = vmatpush.bf16.msrb.mxu3 %v7968_v10  ;;  %v7519_v10 = vld [vmem:[%s9584_s16 + $0x420] sm:$0xf]  ;;  %v2493_v5 = vadd.f32 %v2492_v50, %v2474_v4  ;;  %v7776_v54 = vor.u32 %v8702_v44, %v7775_v43  ;;  %v8560_v50 = vld [vmem:[%s9584_s16 + $0x1c4] sm:$0xf]  ;;  %v7073_v0 = vld [vmem:[%s9584_s16 + $0xb0] sm:$0xf0] }
 0x1aa   : > { %4496 = vmatpush.bf16.msrb.mxu2 %v7824_v62  ;;  %v8670_v62 = vld [vmem:[%s9584_s16 + $0x52c] sm:$0xf0]  ;;  %v7520_v16 = vor.u32 %v8638_v14, %v7519_v10  ;;  %v7492_v10 = vor.u32 %v8628_v57, %v7489_v32  ;;  %v8528_v14 = vld [vmem:[%s9584_s16 + $0xc4] sm:$0xf]  ;;  %v7457_v57 = vld [vmem:[%s9584_s16 + $0x3b0] sm:$0xf0] }
 0x1ab   : > { %4477 = vmatpush.bf16.msrb.mxu1 %v7696_v18  ;;  %v2511_v53 = vpop.f32.mrf.mxu3  ;;  %v7648_v21 = vor.u32 %v8670_v62, %v7647_v15  ;;  %v7089_v15 = vld [vmem:[%s9584_s16 + $0xd0] sm:$0xf0]  ;;  %v8556_v28 = vld [vmem:[%s9584_s16 + $0x1a4] sm:$0xf] }
 0x1ac   : > { %4458 = vmatpush.bf16.msrb.mxu0 %v7568_v63  ;;  %v7903_v63 = vld [vmem:[%s9584_s16 + $0x720] sm:$0xf]  ;;  %v10392_v20 = vadd.f32 %v2511_v53, %v2493_v5  ;;  %v7217_v62 = vld [vmem:[%s9584_s16 + $0x1d0] sm:$0xf0] }
 0x1ad   : > { %4515 = vmatpush.bf16.msrb.mxu3 %v7952_v8  ;;  %v2457_v18 = vpop.f32.mrf.mxu0  ;;  %v2476_v8 = vpop.f32.mrf.mxu1  ;;  %v7904_v4 = vor.u32 %v8734_v3, %v7903_v63  ;;  %4430 = vmatmul.bf16.gmra.mxu2 %v10384_v11  ;;  %v8624_v63 = vld [vmem:[%s9584_s16 + $0x3c4] sm:$0xf]  ;;  %v7473_v3 = vld [vmem:[%s9584_s16 + $0x3d0] sm:$0xf0] }
 0x1ae   : > { %4497 = vmatpush.bf16.msrb.mxu2 %v7808_v26  ;;  %v2477_v13 = vadd.f32 %v2476_v8, %v2457_v18  ;;  %v7631_v26 = vld [vmem:[%s9584_s16 + $0x500] sm:$0xf]  ;;  %4411 = vmatmul.bf16.gmra.mxu1 %v10379_v42  ;;  %v6943_v18 = vld [vmem:[#allocation5 + $0x10] sm:$0xf] }
 0x1af   : > { %4478 = vmatpush.bf16.msrb.mxu1 %v7680_v31  ;;  %4392 = vmatmul.bf16.gmra.mxu0 %v10377_v56  ;;  %v8564_v31 = vld [vmem:[%s9584_s16 + $0x1e4] sm:$0xf]  ;;  %v8494_v8 = vld [vmem:[#allocation5 + $0x2c] sm:$0xf0] }
 0x1b0   : > { %4459 = vmatpush.bf16.msrb.mxu0 %v7552_v22  ;;  %v8666_v22 = vld [vmem:[%s9584_s16 + $0x50c] sm:$0xf0]  ;;  %4449 = vmatmul.bf16.gmra.mxu3 %v10386_v12  ;;  %v2495_v33 = vpop.f32.mrf.mxu2 }
 0x1b1   : > { %4516 = vmatpush.bf16.msrb.mxu3 %v7936_v30  ;;  %v7760_v30 = vor.u32 %v8698_v17, %v7759_v49  ;;  %v7632_v60 = vor.u32 %v8666_v22, %v7631_v26  ;;  %v2496_v43 = vadd.f32 %v2495_v33, %v2477_v13  ;;  %v8490_v49 = vld [vmem:[#allocation5 + $0x14] sm:$0xf]  ;;  %v6951_v17 = vld [vmem:[#allocation5 + $0x18] sm:$0xf]  ;;  %v6953_v26 = vld [vmem:[#allocation5 + $0x38] sm:$0xf0] }
 0x1b2   : > { %4498 = vmatpush.bf16.msrb.mxu2 %v7792_v40  ;;  %v8592_v40 = vld [vmem:[%s9584_s16 + $0x2c4] sm:$0xf]  ;;  %v6945_v13 = vld [vmem:[#allocation5 + $0x30] sm:$0xf0]  ;;  %v10432_v33 = vor.u32 %v8495_v19, %v6951_v17 }
 0x1b3   : > { %4479 = vmatpush.bf16.msrb.mxu1 %v7664_v9  ;;  %v2514_v37 = vpop.f32.mrf.mxu3  ;;  %v8588_v22 = vld [vmem:[%s9584_s16 + $0x2a4] sm:$0xf] }
 0x1b4   : > { %4460 = vmatpush.bf16.msrb.mxu0 %v7536_v41  ;;  %v7345_v41 = vld [vmem:[%s9584_s16 + $0x2d0] sm:$0xf0]  ;;  %v10418_v5 = vadd.f32 %v2514_v37, %v2496_v43  ;;  %v10434_v37 = vor.u32 %v8491_v58, %v6953_v26  ;;  %v8548_v17 = vld [vmem:[%s9584_s16 + $0x164] sm:$0xf] }
 0x1b5   : > { %4517 = vmatpush.bf16.msrb.mxu3 %v7920_v47  ;;  %v2459_v44 = vpop.f32.mrf.mxu0  ;;  %v2478_v9 = vpop.f32.mrf.mxu1  ;;  %v7236_v47 = vor.u32 %v8564_v31, %v7233_v52  ;;  %v10425_v31 = vor.u32 %v8494_v8, %v6943_v18  ;;  %v8620_v52 = vld [vmem:[%s9584_s16 + $0x3a4] sm:$0xf]  ;;  %v7313_v43 = vld [vmem:[%s9584_s16 + $0x290] sm:$0xf0] }
 0x1b6   : > { %4499 = vmatpush.bf16.msrb.mxu2 %v7776_v54  ;;  %v2479_v53 = vadd.f32 %v2478_v9, %v2459_v44  ;;  %v7348_v54 = vor.u32 %v8592_v40, %v7345_v41  ;;  %v7076_v40 = vor.u32 %v8524_v24, %v7073_v0  ;;  %v8584_v41 = vld [vmem:[%s9584_s16 + $0x284] sm:$0xf]  ;;  %v7297_v8 = vld [vmem:[%s9584_s16 + $0x270] sm:$0xf0] }
 0x1b7   : > { %4480 = vmatpush.bf16.msrb.mxu1 %v7648_v21  ;;  %v7220_v21 = vor.u32 %v8560_v50, %v7217_v62  ;;  %v7441_v62 = vld [vmem:[%s9584_s16 + $0x390] sm:$0xf0]  ;;  %v8580_v18 = vld [vmem:[%s9584_s16 + $0x264] sm:$0xf] }
 0x1b8   : > { %4461 = vmatpush.bf16.msrb.mxu0 %v7520_v16  ;;  %v7092_v16 = vor.u32 %v8528_v14, %v7089_v15  ;;  %v2497_v45 = vpop.f32.mrf.mxu2  ;;  %v7057_v14 = vld [vmem:[%s9584_s16 + $0x90] sm:$0xf0]  ;;  %v8552_v15 = vld [vmem:[%s9584_s16 + $0x184] sm:$0xf] }
 0x1b9   : > { %4518 = vmatpush.bf16.msrb.mxu3 %v7904_v4  ;;  %v7476_v4 = vor.u32 %v8624_v63, %v7473_v3  ;;  %v2498_v32 = vadd.f32 %v2497_v45, %v2479_v53  ;;  %v8616_v53 = vld [vmem:[%s9584_s16 + $0x384] sm:$0xf]  ;;  %v7316_v63 = vor.u32 %v8584_v41, %v7313_v43  ;;  %v7425_v26 = vld [vmem:[%s9584_s16 + $0x370] sm:$0xf0] }
 0x1ba   : > { %4500 = vmatpush.bf16.msrb.mxu2 %v7760_v30  ;;  %v10427_v30 = vor.u32 %v8490_v49, %v6945_v13  ;;  %v7444_v13 = vor.u32 %v8616_v53, %v7441_v62  ;;  %v8544_v41 = vld [vmem:[%s9584_s16 + $0x144] sm:$0xf] }
 0x1bb   : > { %4481 = vmatpush.bf16.msrb.mxu1 %v7632_v60  ;;  %v2516_v29 = vpop.f32.mrf.mxu3 }
 0x1bc   : > { %4462 = vmatpush.bf16.msrb.mxu0 %v7504_v51  ;;  %v7201_v51 = vld [vmem:[%s9584_s16 + $0x1b0] sm:$0xf0]  ;;  %v10439_v44 = vadd.f32 %v2516_v29, %v2498_v32  ;;  %v8576_v29 = vld [vmem:[%s9584_s16 + $0x244] sm:$0xf]  ;;  %v8502_v32 = vld [vmem:[#allocation5 + $0x6c] sm:$0xf0] }
 0x1bd   : > { %4519 = vmatpush.bf16.msrb.mxu3 %v7888_v36  ;;  %v2528_v60 = vpop.f32.mrf.mxu0  ;;  %v2547_v36 = vpop.f32.mrf.mxu1  ;;  %v7204_v9 = vor.u32 %v8556_v28, %v7201_v51  ;;  %4501 = vmatmul.bf16.vlgmr.msrb.gmra.mxu2 %v10432_v33  ;;  %v7300_v28 = vor.u32 %v8580_v18, %v7297_v8  ;;  %v7281_v51 = vld [vmem:[%s9584_s16 + $0x250] sm:$0xf0] }
 0x1be   : > { %4569 = vmatpush.bf16.msra.mxu2 %v7364_v6  ;;  %v2529_v6 = vadd.f32 %v2528_v60, %v10364_v27  ;;  %4482 = vmatmul.bf16.vlgmr.msrb.gmra.mxu1 %v10427_v30  ;;  %v7185_v27 = vld [vmem:[%s9584_s16 + $0x190] sm:$0xf0]  ;;  %v7284_v53 = vor.u32 %v8576_v29, %v7281_v51 }
 0x1bf   : > { %4550 = vmatpush.bf16.msra.mxu1 %v7236_v47  ;;  %v7460_v47 = vor.u32 %v8620_v52, %v7457_v57  ;;  %4463 = vmatmul.bf16.vlgmr.msrb.gmra.mxu0 %v10425_v31  ;;  %v7188_v49 = vor.u32 %v8552_v15, %v7185_v27  ;;  %v6975_v57 = vld [vmem:[#allocation5 + $0x50] sm:$0xf]  ;;  %v8498_v60 = vld [vmem:[#allocation5 + $0x54] sm:$0xf]  ;;  %v8503_v15 = vld [vmem:[#allocation5 + $0x74] sm:$0xf0] }
 0x1c0   : > { %4531 = vmatpush.bf16.msra.mxu0 %v7108_v38  ;;  %v7332_v38 = vor.u32 %v8588_v22, %v7329_v23  ;;  %v2548_v50 = vadd.f32 %v2547_v36, %v2529_v6  ;;  %4520 = vmatmul.bf16.vlgmr.msrb.gmra.mxu3 %v10434_v37  ;;  %v2566_v19 = vpop.f32.mrf.mxu2  ;;  %v6985_v27 = vld [vmem:[#allocation5 + $0x78] sm:$0xf0] }
 0x1c1   : > { %4588 = vmatpush.bf16.msra.mxu3 %v7492_v10  ;;  %v8520_v10 = vld [vmem:[%s9584_s16 + $0x84] sm:$0xf] }
 0x1c2   : > { %4570 = vmatpush.bf16.msra.mxu2 %v7348_v54  ;;  %v7060_v3 = vor.u32 %v8520_v10, %v7057_v14  ;;  %v8516_v54 = vld [vmem:[%s9584_s16 + $0x64] sm:$0xf]  ;;  %v2567_v22 = vadd.f32 %v2566_v19, %v2548_v50  ;;  %v7409_v10 = vld [vmem:[%s9584_s16 + $0x350] sm:$0xf0]  ;;  %v6983_v14 = vld [vmem:[#allocation5 + $0x58] sm:$0xf]  ;;  %v10475_v19 = vor.u32 %v8502_v32, %v6975_v57 }
 0x1c3   : > { %4551 = vmatpush.bf16.msra.mxu1 %v7220_v21  ;;  %v2585_v58 = vpop.f32.mrf.mxu3  ;;  %v7169_v21 = vld [vmem:[%s9584_s16 + $0x170] sm:$0xf0]  ;;  %v8499_v50 = vld [vmem:[#allocation5 + $0x5c] sm:$0xf] }
 0x1c4   : > { %4532 = vmatpush.bf16.msra.mxu0 %v7092_v16  ;;  %v7041_v16 = vld [vmem:[%s9584_s16 + $0x70] sm:$0xf0]  ;;  %v10462_v52 = vadd.f32 %v2585_v58, %v2567_v22  ;;  %v7172_v36 = vor.u32 %v8548_v17, %v7169_v21 }
 0x1c5   : > { %4589 = vmatpush.bf16.msra.mxu3 %v7476_v4  ;;  %v8612_v4 = vld [vmem:[%s9584_s16 + $0x364] sm:$0xf]  ;;  %v2530_v23 = vpop.f32.mrf.mxu0  ;;  %v2549_v24 = vpop.f32.mrf.mxu1  ;;  %v7044_v45 = vor.u32 %v8516_v54, %v7041_v16  ;;  %v7137_v21 = vld [vmem:[%s9584_s16 + $0x130] sm:$0xf0] }
 0x1c6   : > { %4571 = vmatpush.bf16.msra.mxu2 %v7332_v38  ;;  %v2531_v0 = vadd.f32 %v2530_v23, %v10392_v20  ;;  %v6977_v20 = vld [vmem:[#allocation5 + $0x70] sm:$0xf0]  ;;  %v7428_v6 = vor.u32 %v8612_v4, %v7425_v26  ;;  %v8512_v38 = vld [vmem:[%s9584_s16 + $0x44] sm:$0xf] }
 0x1c7   : > { %4552 = vmatpush.bf16.msra.mxu1 %v7204_v9  ;;  %v7153_v9 = vld [vmem:[%s9584_s16 + $0x150] sm:$0xf0]  ;;  %v8540_v54 = vld [vmem:[%s9584_s16 + $0x124] sm:$0xf]  ;;  %v10477_v58 = vor.u32 %v8498_v60, %v6977_v20 }
 0x1c8   : > { %4533 = vmatpush.bf16.msra.mxu0 %v7076_v40  ;;  %v7025_v40 = vld [vmem:[%s9584_s16 + $0x50] sm:$0xf0]  ;;  %v2550_v43 = vadd.f32 %v2549_v24, %v2531_v0  ;;  %v7156_v18 = vor.u32 %v8544_v41, %v7153_v9  ;;  %v2568_v16 = vpop.f32.mrf.mxu2  ;;  %v8604_v4 = vld [vmem:[%s9584_s16 + $0x324] sm:$0xf]  ;;  %v10482_v0 = vor.u32 %v8503_v15, %v6983_v14 }
 0x1c9   : > { %4590 = vmatpush.bf16.msra.mxu3 %v7460_v47  ;;  %v8608_v47 = vld [vmem:[%s9584_s16 + $0x344] sm:$0xf]  ;;  %v7028_v62 = vor.u32 %v8512_v38, %v7025_v40  ;;  %v7393_v26 = vld [vmem:[%s9584_s16 + $0x330] sm:$0xf0] }
 0x1ca   : > { %4572 = vmatpush.bf16.msra.mxu2 %v7316_v63  ;;  %v8572_v63 = vld [vmem:[%s9584_s16 + $0x224] sm:$0xf]  ;;  %v7412_v8 = vor.u32 %v8608_v47, %v7409_v10  ;;  %v2569_v22 = vadd.f32 %v2568_v16, %v2550_v43  ;;  %v7249_v32 = vld [vmem:[%s9584_s16 + $0x210] sm:$0xf0]  ;;  %v7396_v38 = vor.u32 %v8604_v4, %v7393_v26 }
 0x1cb   : > { %4553 = vmatpush.bf16.msra.mxu1 %v7188_v49  ;;  %v8508_v49 = vld [vmem:[%s9584_s16 + $0x24] sm:$0xf]  ;;  %v2587_v17 = vpop.f32.mrf.mxu3  ;;  %v6993_v20 = vld [vmem:[%s9584_s16 + $0x10] sm:$0xf0] }
 0x1cc   : > { %4534 = vmatpush.bf16.msra.mxu0 %v7060_v3  ;;  %v7265_v3 = vld [vmem:[%s9584_s16 + $0x230] sm:$0xf0]  ;;  %v8504_v60 = vld [vmem:[%s9584_s16 + $0x4] sm:$0xf] }
 0x1cd   : > { %4591 = vmatpush.bf16.msra.mxu3 %v7444_v13  ;;  %v7009_v13 = vld [vmem:[%s9584_s16 + $0x30] sm:$0xf0]  ;;  %v2533_v23 = vpop.f32.mrf.mxu0  ;;  %v2552_v24 = vpop.f32.mrf.mxu1  ;;  %v7268_v51 = vor.u32 %v8572_v63, %v7265_v3  ;;  %v8600_v41 = vld [vmem:[%s9584_s16 + $0x304] sm:$0xf]  ;;  %4506 = vmatmul.bf16.gmra.mxu2 %v10482_v0 }
 0x1ce   : > { %4573 = vmatpush.bf16.msra.mxu2 %v7300_v28  ;;  %v10484_v28 = vor.u32 %v8499_v50, %v6985_v27  ;;  %v2534_v29 = vadd.f32 %v2533_v23, %v10418_v5  ;;  %v7012_v57 = vor.u32 %v8508_v49, %v7009_v13  ;;  %v8536_v5 = vld [vmem:[%s9584_s16 + $0x104] sm:$0xf]  ;;  %v7121_v40 = vld [vmem:[%s9584_s16 + $0x110] sm:$0xf0]  ;;  %4487 = vmatmul.bf16.gmra.mxu1 %v10477_v58 }
 0x1cf   : > { %4554 = vmatpush.bf16.msra.mxu1 %v7172_v36  ;;  %v10491_v36 = vadd.f32 %v2587_v17, %v2569_v22  ;;  %4468 = vmatmul.bf16.gmra.mxu0 %v10475_v19  ;;  %v7377_v9 = vld [vmem:[%s9584_s16 + $0x310] sm:$0xf0]  ;;  %v8724_v47 = vld [vmem:[%s9584_s16 + $0x6e4] sm:$0xf] }
 0x1d0   : > { %4535 = vmatpush.bf16.msra.mxu0 %v7044_v45  ;;  %v8568_v45 = vld [vmem:[%s9584_s16 + $0x204] sm:$0xf]  ;;  %v2553_v43 = vadd.f32 %v2552_v24, %v2534_v29  ;;  %v7873_v10 = vld [vmem:[%s9584_s16 + $0x6f0] sm:$0xf0]  ;;  %4525 = vmatmul.bf16.gmra.mxu3 %v10484_v28  ;;  %v2571_v49 = vpop.f32.mrf.mxu2 }
 0x1d1   : > { %4592 = vmatpush.bf16.msra.mxu3 %v7428_v6  ;;  %v7140_v6 = vor.u32 %v8540_v54, %v7137_v21  ;;  %v8660_v14 = vld [vmem:[%s9584_s16 + $0x4e4] sm:$0xf]  ;;  %v7617_v15 = vld [vmem:[%s9584_s16 + $0x4f0] sm:$0xf0]  ;;  %v7252_v27 = vor.u32 %v8568_v45, %v7249_v32  ;;  %v7876_v54 = vor.u32 %v8724_v47, %v7873_v10 }
 0x1d2   : > { %4574 = vmatpush.bf16.msra.mxu2 %v7284_v53  ;;  %v8692_v50 = vld [vmem:[%s9584_s16 + $0x5e4] sm:$0xf]  ;;  %v6996_v53 = vor.u32 %v8504_v60, %v6993_v20  ;;  %v8001_v3 = vld [vmem:[%s9584_s16 + $0x7f0] sm:$0xf0]  ;;  %v7620_v16 = vor.u32 %v8660_v14, %v7617_v15  ;;  %v2572_v4 = vadd.f32 %v2571_v49, %v2553_v43 }
 0x1d3   : > { %4555 = vmatpush.bf16.msra.mxu1 %v7156_v18  ;;  %v8756_v63 = vld [vmem:[%s9584_s16 + $0x7e4] sm:$0xf]  ;;  %v7124_v18 = vor.u32 %v8536_v5, %v7121_v40  ;;  %v2590_v13 = vpop.f32.mrf.mxu3  ;;  %v7857_v21 = vld [vmem:[%s9584_s16 + $0x6d0] sm:$0xf0] }
 0x1d4   : > { %4536 = vmatpush.bf16.msra.mxu0 %v7028_v62  ;;  %v7745_v62 = vld [vmem:[%s9584_s16 + $0x5f0] sm:$0xf0]  ;;  %v8720_v17 = vld [vmem:[%s9584_s16 + $0x6c4] sm:$0xf]  ;;  %v8004_v24 = vor.u32 %v8756_v63, %v8001_v3 }
 0x1d5   : > { %4593 = vmatpush.bf16.msra.mxu3 %v7412_v8  ;;  %v7380_v8 = vor.u32 %v8600_v41, %v7377_v9  ;;  %v2535_v26 = vpop.f32.mrf.mxu0  ;;  %v2554_v22 = vpop.f32.mrf.mxu1  ;;  %v7748_v23 = vor.u32 %v8692_v50, %v7745_v62  ;;  %v8656_v45 = vld [vmem:[%s9584_s16 + $0x4c4] sm:$0xf]  ;;  %v7601_v29 = vld [vmem:[%s9584_s16 + $0x4d0] sm:$0xf0]  ;;  %v7860_v5 = vor.u32 %v8720_v17, %v7857_v21 }
 0x1d6   : > { %4575 = vmatpush.bf16.msra.mxu2 %v7268_v51  ;;  %v8688_v51 = vld [vmem:[%s9584_s16 + $0x5c4] sm:$0xf]  ;;  %v7729_v32 = vld [vmem:[%s9584_s16 + $0x5d0] sm:$0xf0] }
 0x1d7   : > { %4556 = vmatpush.bf16.msra.mxu1 %v7140_v6  ;;  %v8752_v60 = vld [vmem:[%s9584_s16 + $0x7c4] sm:$0xf]  ;;  %v7985_v20 = vld [vmem:[%s9584_s16 + $0x7d0] sm:$0xf0]  ;;  %v10518_v6 = vadd.f32 %v2590_v13, %v2572_v4  ;;  %v7732_v40 = vor.u32 %v8688_v51, %v7729_v32 }
 0x1d8   : > { %4537 = vmatpush.bf16.msra.mxu0 %v7012_v57  ;;  %v2536_v57 = vadd.f32 %v2535_v26, %v10439_v44  ;;  %v7604_v44 = vor.u32 %v8656_v45, %v7601_v29  ;;  %v7988_v41 = vor.u32 %v8752_v60, %v7985_v20  ;;  %v8716_v43 = vld [vmem:[%s9584_s16 + $0x6a4] sm:$0xf]  ;;  %v7841_v9 = vld [vmem:[%s9584_s16 + $0x6b0] sm:$0xf0]  ;;  %v2573_v15 = vpop.f32.mrf.mxu2 }
 0x1d9   : > { %4594 = vmatpush.bf16.msra.mxu3 %v7396_v38  ;;  %v8652_v47 = vld [vmem:[%s9584_s16 + $0x4a4] sm:$0xf]  ;;  %v7585_v10 = vld [vmem:[%s9584_s16 + $0x4b0] sm:$0xf0]  ;;  %v7844_v49 = vor.u32 %v8716_v43, %v7841_v9 }
 0x1da   : > { %4576 = vmatpush.bf16.msra.mxu2 %v7252_v27  ;;  %v2555_v38 = vadd.f32 %v2554_v22, %v2536_v57  ;;  %v8684_v14 = vld [vmem:[%s9584_s16 + $0x5a4] sm:$0xf]  ;;  %v7713_v27 = vld [vmem:[%s9584_s16 + $0x5b0] sm:$0xf0]  ;;  %v7588_v13 = vor.u32 %v8652_v47, %v7585_v10 }
 0x1db   : > { %4557 = vmatpush.bf16.msra.mxu1 %v7124_v18  ;;  %v2592_v50 = vpop.f32.mrf.mxu3  ;;  %v7969_v62 = vld [vmem:[%s9584_s16 + $0x7b0] sm:$0xf0]  ;;  %v7716_v21 = vor.u32 %v8684_v14, %v7713_v27  ;;  %v8648_v26 = vld [vmem:[%s9584_s16 + $0x484] sm:$0xf] }
 0x1dc   : > { %4538 = vmatpush.bf16.msra.mxu0 %v6996_v53  ;;  %v8748_v53 = vld [vmem:[%s9584_s16 + $0x7a4] sm:$0xf]  ;;  %v2574_v63 = vadd.f32 %v2573_v15, %v2555_v38  ;;  %v7569_v22 = vld [vmem:[%s9584_s16 + $0x490] sm:$0xf0] }
 0x1dd   : > { %4595 = vmatpush.bf16.msra.mxu3 %v7380_v8  ;;  %v2604_v3 = vpop.f32.mrf.mxu0  ;;  %v2623_v18 = vpop.f32.mrf.mxu1  ;;  %v7972_v4 = vor.u32 %v8748_v53, %v7969_v62  ;;  %v8744_v45 = vld [vmem:[%s9584_s16 + $0x784] sm:$0xf]  ;;  %v7953_v29 = vld [vmem:[%s9584_s16 + $0x790] sm:$0xf0]  ;;  %4577 = vmatmul.bf16.vlgmr.msra.gmra.mxu2 %v10336_v7  ;;  %v7572_v57 = vor.u32 %v8648_v26, %v7569_v22 }
 0x1de   : > { %4645 = vmatpush.bf16.msrb.mxu2 %v7876_v54  ;;  %v2624_v8 = vadd.f32 %v2623_v18, %v2604_v3  ;;  %v8712_v54 = vld [vmem:[%s9584_s16 + $0x684] sm:$0xf]  ;;  %v10530_v17 = vadd.f32 %v2592_v50, %v2574_v63  ;;  %4558 = vmatmul.bf16.vlgmr.msra.gmra.mxu1 %v10331_v2  ;;  %v7809_v60 = vld [vmem:[%s9584_s16 + $0x670] sm:$0xf0]  ;;  %v7956_v38 = vor.u32 %v8744_v45, %v7953_v29 }
 0x1df   : > { %4626 = vmatpush.bf16.msrb.mxu1 %v7748_v23  ;;  %v8680_v23 = vld [vmem:[%s9584_s16 + $0x584] sm:$0xf]  ;;  %4539 = vmatmul.bf16.vlgmr.msra.gmra.mxu0 %v10329_v35  ;;  %v7681_v9 = vld [vmem:[%s9584_s16 + $0x570] sm:$0xf0] }
 0x1e0   : > { %4607 = vmatpush.bf16.msrb.mxu0 %v7620_v16  ;;  %v7825_v16 = vld [vmem:[%s9584_s16 + $0x690] sm:$0xf0]  ;;  %4596 = vmatmul.bf16.vlgmr.msra.gmra.mxu3 %v10338_v39  ;;  %v8708_v32 = vld [vmem:[%s9584_s16 + $0x664] sm:$0xf] }
 0x1e1   : > { %4664 = vmatpush.bf16.msrb.mxu3 %v8004_v24  ;;  %v7697_v24 = vld [vmem:[%s9584_s16 + $0x590] sm:$0xf0]  ;;  %v7828_v51 = vor.u32 %v8712_v54, %v7825_v16  ;;  %v8740_v47 = vld [vmem:[%s9584_s16 + $0x764] sm:$0xf]  ;;  %v7812_v53 = vor.u32 %v8708_v32, %v7809_v60 }
 0x1e2   : > { %4646 = vmatpush.bf16.msrb.mxu2 %v7860_v5  ;;  %v7700_v20 = vor.u32 %v8680_v23, %v7697_v24  ;;  %v8644_v5 = vld [vmem:[%s9584_s16 + $0x464] sm:$0xf]  ;;  %v7937_v10 = vld [vmem:[%s9584_s16 + $0x770] sm:$0xf0] }
 0x1e3   : > { %4627 = vmatpush.bf16.msrb.mxu1 %v7732_v40  ;;  %v8676_v40 = vld [vmem:[%s9584_s16 + $0x564] sm:$0xf]  ;;  %v2661_v43 = vpop.f32.mrf.mxu3  ;;  %v7793_v3 = vld [vmem:[%s9584_s16 + $0x650] sm:$0xf0] }
 0x1e4   : > { %4608 = vmatpush.bf16.msrb.mxu0 %v7604_v44  ;;  %v7553_v44 = vld [vmem:[%s9584_s16 + $0x470] sm:$0xf0]  ;;  %v8704_v63 = vld [vmem:[%s9584_s16 + $0x644] sm:$0xf] }
 0x1e5   : > { %4665 = vmatpush.bf16.msrb.mxu3 %v7988_v41  ;;  %v2642_v41 = vpop.f32.mrf.mxu2  ;;  %v2606_v15 = vpop.f32.mrf.mxu0  ;;  %v7556_v62 = vor.u32 %v8644_v5, %v7553_v44  ;;  %v7537_v54 = vld [vmem:[%s9584_s16 + $0x450] sm:$0xf0]  ;;  %v8672_v16 = vld [vmem:[%s9584_s16 + $0x544] sm:$0xf]  ;;  %v7796_v22 = vor.u32 %v8704_v63, %v7793_v3 }
 0x1e6   : > { %4647 = vmatpush.bf16.msrb.mxu2 %v7844_v49  ;;  %v2643_v14 = vadd.f32 %v2642_v41, %v2624_v8  ;;  %v2625_v50 = vpop.f32.mrf.mxu1  ;;  %v7684_v8 = vor.u32 %v8676_v40, %v7681_v9  ;;  %v7940_v49 = vor.u32 %v8740_v47, %v7937_v10  ;;  %v7921_v26 = vld [vmem:[%s9584_s16 + $0x750] sm:$0xf0]  ;;  %v8700_v24 = vld [vmem:[%s9584_s16 + $0x624] sm:$0xf] }
 0x1e7   : > { %4628 = vmatpush.bf16.msrb.mxu1 %v7716_v21  ;;  %v2626_v27 = vadd.f32 %v2625_v50, %v2606_v15  ;;  %v7665_v21 = vld [vmem:[%s9584_s16 + $0x550] sm:$0xf0]  ;;  %v8668_v60 = vld [vmem:[%s9584_s16 + $0x524] sm:$0xf] }
 0x1e8   : > { %4609 = vmatpush.bf16.msrb.mxu0 %v7588_v13  ;;  %v10552_v18 = vadd.f32 %v2661_v43, %v2643_v14  ;;  %v8640_v13 = vld [vmem:[%s9584_s16 + $0x444] sm:$0xf]  ;;  %v7777_v45 = vld [vmem:[%s9584_s16 + $0x630] sm:$0xf0]  ;;  %v7668_v29 = vor.u32 %v8672_v16, %v7665_v21  ;;  %v7367_v16 = vld [vmem:[%s9584_s16 + $0x2e8] sm:$0xf] }
 0x1e9   : > { %4666 = vmatpush.bf16.msrb.mxu3 %v7972_v4  ;;  %v8736_v4 = vld [vmem:[%s9584_s16 + $0x744] sm:$0xf]  ;;  %v7540_v23 = vor.u32 %v8640_v13, %v7537_v54  ;;  %v7521_v32 = vld [vmem:[%s9584_s16 + $0x430] sm:$0xf0]  ;;  %v7780_v14 = vor.u32 %v8700_v24, %v7777_v45  ;;  %v8599_v21 = vld [vmem:[%s9584_s16 + $0x2f4] sm:$0xf0] }
 0x1ea   : > { %4648 = vmatpush.bf16.msrb.mxu2 %v7828_v51  ;;  %v7924_v51 = vor.u32 %v8736_v4, %v7921_v26  ;;  %v7649_v5 = vld [vmem:[%s9584_s16 + $0x530] sm:$0xf0]  ;;  %v8732_v44 = vld [vmem:[%s9584_s16 + $0x724] sm:$0xf]  ;;  %v7111_v4 = vld [vmem:[%s9584_s16 + $0xe8] sm:$0xf] }
 0x1eb   : > { %4629 = vmatpush.bf16.msrb.mxu1 %v7700_v20  ;;  %v7905_v40 = vld [vmem:[%s9584_s16 + $0x730] sm:$0xf0]  ;;  %v8696_v47 = vld [vmem:[%s9584_s16 + $0x604] sm:$0xf]  ;;  %v8535_v26 = vld [vmem:[%s9584_s16 + $0xf4] sm:$0xf0] }
 0x1ec   : > { %4610 = vmatpush.bf16.msrb.mxu0 %v7572_v57  ;;  %v8636_v57 = vld [vmem:[%s9584_s16 + $0x424] sm:$0xf]  ;;  %v7761_v50 = vld [vmem:[%s9584_s16 + $0x610] sm:$0xf0]  ;;  %v7908_v3 = vor.u32 %v8732_v44, %v7905_v40  ;;  %v8567_v45 = vld [vmem:[%s9584_s16 + $0x1f4] sm:$0xf0] }
 0x1ed   : > { %4667 = vmatpush.bf16.msrb.mxu3 %v7956_v38  ;;  %v2644_v20 = vpop.f32.mrf.mxu2  ;;  %v2663_v38 = vpop.f32.mrf.mxu3  ;;  %v7524_v15 = vor.u32 %v8636_v57, %v7521_v32  ;;  %v8728_v13 = vld [vmem:[%s9584_s16 + $0x704] sm:$0xf]  ;;  %v7889_v54 = vld [vmem:[%s9584_s16 + $0x710] sm:$0xf0]  ;;  %4582 = vmatmul.bf16.gmra.mxu2 %v10384_v11  ;;  %v7351_v44 = vld [vmem:[%s9584_s16 + $0x2c8] sm:$0xf] }
 0x1ee   : > { %4649 = vmatpush.bf16.msrb.mxu2 %v7812_v53  ;;  %v2645_v41 = vadd.f32 %v2644_v20, %v2626_v27  ;;  %v2609_v43 = vpop.f32.mrf.mxu0  ;;  %v2628_v9 = vpop.f32.mrf.mxu1  ;;  %v8632_v53 = vld [vmem:[%s9584_s16 + $0x404] sm:$0xf]  ;;  %v7652_v27 = vor.u32 %v8668_v60, %v7649_v5  ;;  %4563 = vmatmul.bf16.gmra.mxu1 %v10379_v42  ;;  %v7892_v32 = vor.u32 %v8728_v13, %v7889_v54  ;;  %v8595_v40 = vld [vmem:[%s9584_s16 + $0x2d4] sm:$0xf0] }
 0x1ef   : > { %4630 = vmatpush.bf16.msrb.mxu1 %v7684_v8  ;;  %v2629_v10 = vadd.f32 %v2628_v9, %v2609_v43  ;;  %v8664_v8 = vld [vmem:[%s9584_s16 + $0x504] sm:$0xf]  ;;  %4544 = vmatmul.bf16.gmra.mxu0 %v10377_v56  ;;  %v7112_v5 = vor.u32 %v8535_v26, %v7111_v4  ;;  %v8591_v4 = vld [vmem:[%s9584_s16 + $0x2b4] sm:$0xf0]  ;;  %v7079_v26 = vld [vmem:[%s9584_s16 + $0xa8] sm:$0xf] }
 0x1f0   : > { %4611 = vmatpush.bf16.msrb.mxu0 %v7556_v62  ;;  %v7505_v62 = vld [vmem:[%s9584_s16 + $0x410] sm:$0xf0]  ;;  %v10572_v63 = vadd.f32 %v2663_v38, %v2645_v41  ;;  %4601 = vmatmul.bf16.gmra.mxu3 %v10386_v12  ;;  %v7368_v38 = vor.u32 %v8599_v21, %v7367_v16  ;;  %v7335_v21 = vld [vmem:[%s9584_s16 + $0x2a8] sm:$0xf] }
 0x1f1   : > { %4668 = vmatpush.bf16.msrb.mxu3 %v7940_v49  ;;  %v7633_v49 = vld [vmem:[%s9584_s16 + $0x510] sm:$0xf0]  ;;  %v7508_v24 = vor.u32 %v8632_v53, %v7505_v62  ;;  %v7223_v53 = vld [vmem:[%s9584_s16 + $0x1c8] sm:$0xf] }
 0x1f2   : > { %4650 = vmatpush.bf16.msrb.mxu2 %v7796_v22  ;;  %v7239_v22 = vld [vmem:[%s9584_s16 + $0x1e8] sm:$0xf]  ;;  %v7636_v57 = vor.u32 %v8664_v8, %v7633_v49  ;;  %v8627_v8 = vld [vmem:[%s9584_s16 + $0x3d4] sm:$0xf0] }
 0x1f3   : > { %4631 = vmatpush.bf16.msrb.mxu1 %v7668_v29  ;;  %v7495_v29 = vld [vmem:[%s9584_s16 + $0x3e8] sm:$0xf] }
 0x1f4   : > { %4612 = vmatpush.bf16.msrb.mxu0 %v7540_v23  ;;  %v7764_v23 = vor.u32 %v8696_v47, %v7761_v50  ;;  %v7240_v47 = vor.u32 %v8567_v45, %v7239_v22  ;;  %v8531_v50 = vld [vmem:[%s9584_s16 + $0xd4] sm:$0xf0] }
 0x1f5   : > { %4669 = vmatpush.bf16.msrb.mxu3 %v7924_v51  ;;  %v8631_v51 = vld [vmem:[%s9584_s16 + $0x3f4] sm:$0xf0]  ;;  %v2647_v60 = vpop.f32.mrf.mxu2  ;;  %v2666_v20 = vpop.f32.mrf.mxu3 }
 0x1f6   : > { %4651 = vmatpush.bf16.msrb.mxu2 %v7780_v14  ;;  %v2648_v41 = vadd.f32 %v2647_v60, %v2629_v10  ;;  %v2611_v43 = vpop.f32.mrf.mxu0  ;;  %v2630_v9 = vpop.f32.mrf.mxu1  ;;  %v7496_v14 = vor.u32 %v8631_v51, %v7495_v29  ;;  %v7352_v10 = vor.u32 %v8595_v40, %v7351_v44  ;;  %v8527_v22 = vld [vmem:[%s9584_s16 + $0xb4] sm:$0xf0]  ;;  %v7463_v51 = vld [vmem:[%s9584_s16 + $0x3a8] sm:$0xf] }
 0x1f7   : > { %4632 = vmatpush.bf16.msrb.mxu1 %v7652_v27  ;;  %v2631_v62 = vadd.f32 %v2630_v9, %v2611_v43  ;;  %v8563_v27 = vld [vmem:[%s9584_s16 + $0x1d4] sm:$0xf0]  ;;  %v7080_v44 = vor.u32 %v8527_v22, %v7079_v26  ;;  %v7319_v40 = vld [vmem:[%s9584_s16 + $0x288] sm:$0xf] }
 0x1f8   : > { %4613 = vmatpush.bf16.msrb.mxu0 %v7524_v15  ;;  %v7095_v15 = vld [vmem:[%s9584_s16 + $0xc8] sm:$0xf]  ;;  %v10598_v49 = vadd.f32 %v2666_v20, %v2648_v41  ;;  %v7224_v54 = vor.u32 %v8563_v27, %v7223_v53  ;;  %v8559_v29 = vld [vmem:[%s9584_s16 + $0x1b4] sm:$0xf0] }
 0x1f9   : > { %4670 = vmatpush.bf16.msrb.mxu3 %v7908_v3  ;;  %v7479_v3 = vld [vmem:[%s9584_s16 + $0x3c8] sm:$0xf]  ;;  %v7096_v13 = vor.u32 %v8531_v50, %v7095_v15  ;;  %v8587_v41 = vld [vmem:[%s9584_s16 + $0x294] sm:$0xf0] }
 0x1fa   : > { %4652 = vmatpush.bf16.msrb.mxu2 %v7764_v23  ;;  %v7480_v16 = vor.u32 %v8627_v8, %v7479_v3  ;;  %v7207_v23 = vld [vmem:[%s9584_s16 + $0x1a8] sm:$0xf]  ;;  %v8523_v15 = vld [vmem:[%s9584_s16 + $0x94] sm:$0xf0]  ;;  %v7320_v3 = vor.u32 %v8587_v41, %v7319_v40 }
 0x1fb   : > { %4633 = vmatpush.bf16.msrb.mxu1 %v7636_v57  ;;  %v8623_v57 = vld [vmem:[%s9584_s16 + $0x3b4] sm:$0xf0]  ;;  %v7208_v9 = vor.u32 %v8559_v29, %v7207_v23  ;;  %v7191_v50 = vld [vmem:[%s9584_s16 + $0x188] sm:$0xf] }
 0x1fc   : > { %4614 = vmatpush.bf16.msrb.mxu0 %v7508_v24  ;;  %v8619_v27 = vld [vmem:[%s9584_s16 + $0x394] sm:$0xf0]  ;;  %v7175_v26 = vld [vmem:[%s9584_s16 + $0x168] sm:$0xf] }
 0x1fd   : > { %4671 = vmatpush.bf16.msrb.mxu3 %v7892_v32  ;;  %v2649_v24 = vpop.f32.mrf.mxu2  ;;  %v2668_v45 = vpop.f32.mrf.mxu3  ;;  %4653 = vmatmul.bf16.vlgmr.msrb.gmra.mxu2 %v10432_v33  ;;  %v8615_v29 = vld [vmem:[%s9584_s16 + $0x374] sm:$0xf0] }
 0x1fe   : > { %4721 = vmatpush.bf16.msra.mxu2 %v7368_v38  ;;  %v2650_v32 = vadd.f32 %v2649_v24, %v2631_v62  ;;  %v2680_v60 = vpop.f32.mrf.mxu0  ;;  %v2699_v20 = vpop.f32.mrf.mxu1  ;;  %4634 = vmatmul.bf16.vlgmr.msrb.gmra.mxu1 %v10427_v30  ;;  %v7447_v62 = vld [vmem:[%s9584_s16 + $0x388] sm:$0xf]  ;;  %v8551_v24 = vld [vmem:[%s9584_s16 + $0x174] sm:$0xf0] }
 0x1ff   : > { %4702 = vmatpush.bf16.msra.mxu1 %v7240_v47  ;;  %v2681_v38 = vadd.f32 %v2680_v60, %v10552_v18  ;;  %v7464_v47 = vor.u32 %v8623_v57, %v7463_v51  ;;  %4615 = vmatmul.bf16.vlgmr.msrb.gmra.mxu0 %v10425_v31  ;;  %v8555_v18 = vld [vmem:[%s9584_s16 + $0x194] sm:$0xf0]  ;;  %v7176_v41 = vor.u32 %v8551_v24, %v7175_v26 }
 0x200   : > { %4683 = vmatpush.bf16.msra.mxu0 %v7112_v5  ;;  %v7336_v5 = vor.u32 %v8591_v4, %v7335_v21  ;;  %v10611_v43 = vadd.f32 %v2668_v45, %v2650_v32  ;;  %4672 = vmatmul.bf16.vlgmr.msrb.gmra.mxu3 %v10434_v37  ;;  %v7047_v21 = vld [vmem:[%s9584_s16 + $0x68] sm:$0xf]  ;;  %v8519_v4 = vld [vmem:[%s9584_s16 + $0x74] sm:$0xf0] }
 0x201   : > { %4740 = vmatpush.bf16.msra.mxu3 %v7496_v14  ;;  %v7063_v14 = vld [vmem:[%s9584_s16 + $0x88] sm:$0xf]  ;;  %v2700_v53 = vadd.f32 %v2699_v20, %v2681_v38  ;;  %v7048_v38 = vor.u32 %v8519_v4, %v7047_v21  ;;  %v8607_v24 = vld [vmem:[%s9584_s16 + $0x334] sm:$0xf0] }
 0x202   : > { %4722 = vmatpush.bf16.msra.mxu2 %v7352_v10  ;;  %v7064_v8 = vor.u32 %v8523_v15, %v7063_v14  ;;  %v7303_v10 = vld [vmem:[%s9584_s16 + $0x268] sm:$0xf]  ;;  %v8515_v14 = vld [vmem:[%s9584_s16 + $0x54] sm:$0xf0] }
 0x203   : > { %4703 = vmatpush.bf16.msra.mxu1 %v7224_v54  ;;  %v7192_v54 = vor.u32 %v8555_v18, %v7191_v50  ;;  %v7431_v45 = vld [vmem:[%s9584_s16 + $0x368] sm:$0xf]  ;;  %v8547_v50 = vld [vmem:[%s9584_s16 + $0x154] sm:$0xf0] }
 0x204   : > { %4684 = vmatpush.bf16.msra.mxu0 %v7096_v13  ;;  %v8583_v13 = vld [vmem:[%s9584_s16 + $0x274] sm:$0xf0]  ;;  %v7143_v21 = vld [vmem:[%s9584_s16 + $0x128] sm:$0xf] }
 0x205   : > { %4741 = vmatpush.bf16.msra.mxu3 %v7480_v16  ;;  %v7448_v16 = vor.u32 %v8619_v27, %v7447_v62  ;;  %v2718_v22 = vpop.f32.mrf.mxu2  ;;  %v2737_v23 = vpop.f32.mrf.mxu3  ;;  %v7304_v20 = vor.u32 %v8583_v13, %v7303_v10  ;;  %v8611_v18 = vld [vmem:[%s9584_s16 + $0x354] sm:$0xf0] }
 0x206   : > { %4723 = vmatpush.bf16.msra.mxu2 %v7336_v5  ;;  %v2719_v51 = vadd.f32 %v2718_v22, %v2700_v53  ;;  %v2682_v57 = vpop.f32.mrf.mxu0  ;;  %v2701_v32 = vpop.f32.mrf.mxu1  ;;  %v7287_v5 = vld [vmem:[%s9584_s16 + $0x248] sm:$0xf]  ;;  %v8543_v22 = vld [vmem:[%s9584_s16 + $0x134] sm:$0xf0] }
 0x207   : > { %4704 = vmatpush.bf16.msra.mxu1 %v7208_v9  ;;  %v2683_v60 = vadd.f32 %v2682_v57, %v10572_v63  ;;  %v7432_v9 = vor.u32 %v8615_v29, %v7431_v45  ;;  %v7159_v63 = vld [vmem:[%s9584_s16 + $0x148] sm:$0xf] }
 0x208   : > { %4685 = vmatpush.bf16.msra.mxu0 %v7080_v44  ;;  %v8579_v44 = vld [vmem:[%s9584_s16 + $0x254] sm:$0xf0]  ;;  %v10634_v40 = vadd.f32 %v2737_v23, %v2719_v51  ;;  %v7415_v53 = vld [vmem:[%s9584_s16 + $0x348] sm:$0xf]  ;;  %v7160_v10 = vor.u32 %v8547_v50, %v7159_v63 }
 0x209   : > { %4742 = vmatpush.bf16.msra.mxu3 %v7464_v47  ;;  %v7031_v47 = vld [vmem:[%s9584_s16 + $0x48] sm:$0xf]  ;;  %v2702_v15 = vadd.f32 %v2701_v32, %v2683_v60  ;;  %v7288_v62 = vor.u32 %v8579_v44, %v7287_v5  ;;  %v7416_v13 = vor.u32 %v8611_v18, %v7415_v53  ;;  %v8507_v44 = vld [vmem:[%s9584_s16 + $0x14] sm:$0xf0] }
 0x20a   : > { %4724 = vmatpush.bf16.msra.mxu2 %v7320_v3  ;;  %v7032_v27 = vor.u32 %v8515_v14, %v7031_v47  ;;  %v7271_v3 = vld [vmem:[%s9584_s16 + $0x228] sm:$0xf]  ;;  %v8539_v14 = vld [vmem:[%s9584_s16 + $0x114] sm:$0xf0] }
 0x20b   : > { %4705 = vmatpush.bf16.msra.mxu1 %v7192_v54  ;;  %v7015_v54 = vld [vmem:[%s9584_s16 + $0x28] sm:$0xf]  ;;  %v8603_v50 = vld [vmem:[%s9584_s16 + $0x314] sm:$0xf0] }
 0x20c   : > { %4686 = vmatpush.bf16.msra.mxu0 %v7064_v8  ;;  %v8575_v8 = vld [vmem:[%s9584_s16 + $0x234] sm:$0xf0]  ;;  %v7399_v23 = vld [vmem:[%s9584_s16 + $0x328] sm:$0xf] }
 0x20d   : > { %4743 = vmatpush.bf16.msra.mxu3 %v7448_v16  ;;  %v8511_v16 = vld [vmem:[%s9584_s16 + $0x34] sm:$0xf0]  ;;  %v2720_v4 = vpop.f32.mrf.mxu2  ;;  %v2739_v26 = vpop.f32.mrf.mxu3  ;;  %v7255_v57 = vld [vmem:[%s9584_s16 + $0x208] sm:$0xf]  ;;  %v7272_v60 = vor.u32 %v8575_v8, %v7271_v3  ;;  %v7400_v47 = vor.u32 %v8607_v24, %v7399_v23  ;;  %4658 = vmatmul.bf16.gmra.mxu2 %v10482_v0 }
 0x20e   : > { %4725 = vmatpush.bf16.msra.mxu2 %v7304_v20  ;;  %v2721_v45 = vadd.f32 %v2720_v4, %v2702_v15  ;;  %v2685_v29 = vpop.f32.mrf.mxu0  ;;  %v2704_v51 = vpop.f32.mrf.mxu1  ;;  %v7016_v20 = vor.u32 %v8511_v16, %v7015_v54  ;;  %v6999_v5 = vld [vmem:[%s9584_s16 + $0x8] sm:$0xf]  ;;  %4639 = vmatmul.bf16.gmra.mxu1 %v10477_v58  ;;  %v8727_v18 = vld [vmem:[%s9584_s16 + $0x6f4] sm:$0xf0] }
 0x20f   : > { %4706 = vmatpush.bf16.msra.mxu1 %v7176_v41  ;;  %v2686_v32 = vadd.f32 %v2685_v29, %v10598_v49  ;;  %v7127_v49 = vld [vmem:[%s9584_s16 + $0x108] sm:$0xf]  ;;  %4620 = vmatmul.bf16.gmra.mxu0 %v10475_v19  ;;  %v8759_v16 = vld [vmem:[%s9584_s16 + $0x7f4] sm:$0xf0] }
 0x210   : > { %4687 = vmatpush.bf16.msra.mxu0 %v7048_v38  ;;  %v8571_v38 = vld [vmem:[%s9584_s16 + $0x214] sm:$0xf0]  ;;  %v10655_v41 = vadd.f32 %v2739_v26, %v2721_v45  ;;  %v7383_v63 = vld [vmem:[%s9584_s16 + $0x308] sm:$0xf]  ;;  %4677 = vmatmul.bf16.gmra.mxu3 %v10484_v28 }
 0x211   : > { %4744 = vmatpush.bf16.msra.mxu3 %v7432_v9  ;;  %v7144_v9 = vor.u32 %v8543_v22, %v7143_v21  ;;  %v2705_v15 = vadd.f32 %v2704_v51, %v2686_v32  ;;  %v7879_v53 = vld [vmem:[%s9584_s16 + $0x6e8] sm:$0xf]  ;;  %v7256_v8 = vor.u32 %v8571_v38, %v7255_v57  ;;  %v7128_v21 = vor.u32 %v8539_v14, %v7127_v49  ;;  %v8723_v29 = vld [vmem:[%s9584_s16 + $0x6d4] sm:$0xf0] }
 0x212   : > { %4726 = vmatpush.bf16.msra.mxu2 %v7288_v62  ;;  %v7623_v62 = vld [vmem:[%s9584_s16 + $0x4e8] sm:$0xf]  ;;  %v7384_v4 = vor.u32 %v8603_v50, %v7383_v63  ;;  %v7880_v23 = vor.u32 %v8727_v18, %v7879_v53  ;;  %v8755_v14 = vld [vmem:[%s9584_s16 + $0x7d4] sm:$0xf0] }
 0x213   : > { %4707 = vmatpush.bf16.msra.mxu1 %v7160_v10  ;;  %v7751_v3 = vld [vmem:[%s9584_s16 + $0x5e8] sm:$0xf]  ;;  %v7000_v10 = vor.u32 %v8507_v44, %v6999_v5  ;;  %v8659_v5 = vld [vmem:[%s9584_s16 + $0x4d4] sm:$0xf0] }
 0x214   : > { %4688 = vmatpush.bf16.msra.mxu0 %v7032_v27  ;;  %v8663_v27 = vld [vmem:[%s9584_s16 + $0x4f4] sm:$0xf0]  ;;  %v8007_v54 = vld [vmem:[%s9584_s16 + $0x7e8] sm:$0xf] }
 0x215   : > { %4745 = vmatpush.bf16.msra.mxu3 %v7416_v13  ;;  %v8695_v13 = vld [vmem:[%s9584_s16 + $0x5f4] sm:$0xf0]  ;;  %v2723_v26 = vpop.f32.mrf.mxu2  ;;  %v2742_v22 = vpop.f32.mrf.mxu3  ;;  %v7624_v24 = vor.u32 %v8663_v27, %v7623_v62  ;;  %v7863_v45 = vld [vmem:[%s9584_s16 + $0x6c8] sm:$0xf] }
 0x216   : > { %4727 = vmatpush.bf16.msra.mxu2 %v7272_v60  ;;  %v2724_v51 = vadd.f32 %v2723_v26, %v2705_v15  ;;  %v2687_v57 = vpop.f32.mrf.mxu0  ;;  %v2706_v32 = vpop.f32.mrf.mxu1  ;;  %v7752_v60 = vor.u32 %v8695_v13, %v7751_v3  ;;  %v7607_v38 = vld [vmem:[%s9584_s16 + $0x4c8] sm:$0xf]  ;;  %v7864_v50 = vor.u32 %v8723_v29, %v7863_v45  ;;  %v8719_v27 = vld [vmem:[%s9584_s16 + $0x6b4] sm:$0xf0] }
 0x217   : > { %4708 = vmatpush.bf16.msra.mxu1 %v7144_v9  ;;  %v7735_v44 = vld [vmem:[%s9584_s16 + $0x5c8] sm:$0xf]  ;;  %v2688_v9 = vadd.f32 %v2687_v57, %v10611_v43  ;;  %v7608_v43 = vor.u32 %v8659_v5, %v7607_v38  ;;  %v8715_v57 = vld [vmem:[%s9584_s16 + $0x694] sm:$0xf0] }
 0x218   : > { %4689 = vmatpush.bf16.msra.mxu0 %v7016_v20  ;;  %v8008_v20 = vor.u32 %v8759_v16, %v8007_v54  ;;  %v7991_v49 = vld [vmem:[%s9584_s16 + $0x7c8] sm:$0xf]  ;;  %v10682_v63 = vadd.f32 %v2742_v22, %v2724_v51  ;;  %v8687_v16 = vld [vmem:[%s9584_s16 + $0x5b4] sm:$0xf0] }
 0x219   : > { %4746 = vmatpush.bf16.msra.mxu3 %v7400_v47  ;;  %v8691_v47 = vld [vmem:[%s9584_s16 + $0x5d4] sm:$0xf0]  ;;  %v2707_v15 = vadd.f32 %v2706_v32, %v2688_v9  ;;  %v7992_v18 = vor.u32 %v8755_v14, %v7991_v49  ;;  %v7847_v62 = vld [vmem:[%s9584_s16 + $0x6a8] sm:$0xf] }
 0x21a   : > { %4728 = vmatpush.bf16.msra.mxu2 %v7256_v8  ;;  %11112 = vst [vmem:[#allocation26_spill] sm:$0xff] %v10682_v63  ;;  %v7736_v53 = vor.u32 %v8691_v47, %v7735_v44  ;;  %v7591_v3 = vld [vmem:[%s9584_s16 + $0x4a8] sm:$0xf]  ;;  %v8655_v8 = vld [vmem:[%s9584_s16 + $0x4b4] sm:$0xf0]  ;;  %v7848_v45 = vor.u32 %v8719_v27, %v7847_v62 }
 0x21b   : > { %4709 = vmatpush.bf16.msra.mxu1 %v7128_v21  ;;  %v7975_v21 = vld [vmem:[%s9584_s16 + $0x7a8] sm:$0xf]  ;;  %v7592_v29 = vor.u32 %v8655_v8, %v7591_v3  ;;  %v8651_v5 = vld [vmem:[%s9584_s16 + $0x494] sm:$0xf0] }
 0x21c   : > { %4690 = vmatpush.bf16.msra.mxu0 %v7000_v10  ;;  %v7719_v10 = vld [vmem:[%s9584_s16 + $0x5a8] sm:$0xf]  ;;  %v8683_v9 = vld [vmem:[%s9584_s16 + $0x594] sm:$0xf0] }
 0x21d   : > { %4747 = vmatpush.bf16.msra.mxu3 %v7384_v4  ;;  %v2725_v13 = vpop.f32.mrf.mxu2  ;;  %v2744_v54 = vpop.f32.mrf.mxu3  ;;  %v8751_v4 = vld [vmem:[%s9584_s16 + $0x7b4] sm:$0xf0]  ;;  %v7831_v51 = vld [vmem:[%s9584_s16 + $0x688] sm:$0xf]  ;;  %4729 = vmatmul.bf16.vlgmr.msra.gmra.mxu2 %v10336_v7 }
 0x21e   : > { %4797 = vmatpush.bf16.msrb.mxu2 %v7880_v23  ;;  %v2726_v26 = vadd.f32 %v2725_v13, %v2707_v15  ;;  %v4388_v22 = vpop.f32.mrf.mxu0  ;;  %v4407_v23 = vpop.f32.mrf.mxu1  ;;  %v7575_v38 = vld [vmem:[%s9584_s16 + $0x488] sm:$0xf]  ;;  %4710 = vmatmul.bf16.vlgmr.msra.gmra.mxu1 %v10331_v2  ;;  %v8747_v49 = vld [vmem:[%s9584_s16 + $0x794] sm:$0xf0]  ;;  %v7832_v14 = vor.u32 %v8715_v57, %v7831_v51 }
 0x21f   : > { %4778 = vmatpush.bf16.msrb.mxu1 %v7752_v60  ;;  %v7720_v60 = vor.u32 %v8687_v16, %v7719_v10  ;;  %v7703_v44 = vld [vmem:[%s9584_s16 + $0x588] sm:$0xf]  ;;  %4691 = vmatmul.bf16.vlgmr.msra.gmra.mxu0 %v10329_v35  ;;  %v7576_v15 = vor.u32 %v8651_v5, %v7575_v38  ;;  %v8647_v27 = vld [vmem:[%s9584_s16 + $0x474] sm:$0xf0] }
 0x220   : > { %4759 = vmatpush.bf16.msrb.mxu0 %v7624_v24  ;;  %v4408_v24 = vadd.f32 %v4407_v23, %v4388_v22  ;;  %v10694_v32 = vadd.f32 %v2744_v54, %v2726_v26  ;;  %v7959_v47 = vld [vmem:[%s9584_s16 + $0x788] sm:$0xf]  ;;  %4748 = vmatmul.bf16.vlgmr.msra.gmra.mxu3 %v10338_v39  ;;  %v8679_v13 = vld [vmem:[%s9584_s16 + $0x574] sm:$0xf0] }
 0x221   : > { %4816 = vmatpush.bf16.msrb.mxu3 %v8008_v20  ;;  %v7976_v20 = vor.u32 %v8751_v4, %v7975_v21  ;;  %v7559_v62 = vld [vmem:[%s9584_s16 + $0x468] sm:$0xf]  ;;  %v8743_v16 = vld [vmem:[%s9584_s16 + $0x774] sm:$0xf0] }
 0x222   : > { %4798 = vmatpush.bf16.msrb.mxu2 %v7864_v50  ;;  %11113 = vst [vmem:[#allocation27_spill] sm:$0xff] %v10694_v32  ;;  %v7815_v50 = vld [vmem:[%s9584_s16 + $0x668] sm:$0xf]  ;;  %v8707_v51 = vld [vmem:[%s9584_s16 + $0x654] sm:$0xf0] }
 0x223   : > { %4779 = vmatpush.bf16.msrb.mxu1 %v7736_v53  ;;  %v7704_v53 = vor.u32 %v8683_v9, %v7703_v44  ;;  %v7687_v3 = vld [vmem:[%s9584_s16 + $0x568] sm:$0xf]  ;;  %v8643_v38 = vld [vmem:[%s9584_s16 + $0x454] sm:$0xf0]  ;;  %v7097_v32 = vld [vmem:[%s9584_s16 + $0xd8] sm:$0xf0] }
 0x224   : > { %4760 = vmatpush.bf16.msrb.mxu0 %v7608_v43  ;;  %v8711_v43 = vld [vmem:[%s9584_s16 + $0x674] sm:$0xf0]  ;;  %v7943_v54 = vld [vmem:[%s9584_s16 + $0x768] sm:$0xf] }
 0x225   : > { %4817 = vmatpush.bf16.msrb.mxu3 %v7992_v18  ;;  %v7960_v18 = vor.u32 %v8747_v49, %v7959_v47  ;;  %v4426_v8 = vpop.f32.mrf.mxu2  ;;  %v4445_v10 = vpop.f32.mrf.mxu3  ;;  %v7816_v23 = vor.u32 %v8711_v43, %v7815_v50  ;;  %v7671_v5 = vld [vmem:[%s9584_s16 + $0x548] sm:$0xf]  ;;  %v8675_v44 = vld [vmem:[%s9584_s16 + $0x554] sm:$0xf0] }
 0x226   : > { %4799 = vmatpush.bf16.msrb.mxu2 %v7848_v45  ;;  %v4427_v21 = vadd.f32 %v4426_v8, %v4408_v24  ;;  %v4390_v4 = vpop.f32.mrf.mxu0  ;;  %v4409_v26 = vpop.f32.mrf.mxu1  ;;  %v7560_v45 = vor.u32 %v8647_v27, %v7559_v62  ;;  %v7688_v24 = vor.u32 %v8679_v13, %v7687_v3  ;;  %v7927_v9 = vld [vmem:[%s9584_s16 + $0x748] sm:$0xf]  ;;  %v8739_v47 = vld [vmem:[%s9584_s16 + $0x754] sm:$0xf0]  ;;  %v7672_v43 = vor.u32 %v8675_v44, %v7671_v5 }
 0x227   : > { %4780 = vmatpush.bf16.msrb.mxu1 %v7720_v60  ;;  %v4410_v22 = vadd.f32 %v4409_v26, %v4390_v4  ;;  %v7944_v60 = vor.u32 %v8743_v16, %v7943_v54  ;;  %v8703_v50 = vld [vmem:[%s9584_s16 + $0x634] sm:$0xf0]  ;;  %v7655_v27 = vld [vmem:[%s9584_s16 + $0x528] sm:$0xf] }
 0x228   : > { %4761 = vmatpush.bf16.msrb.mxu0 %v7592_v29  ;;  %v7799_v29 = vld [vmem:[%s9584_s16 + $0x648] sm:$0xf]  ;;  %v10716_v57 = vadd.f32 %v4445_v10, %v4427_v21  ;;  %v8639_v62 = vld [vmem:[%s9584_s16 + $0x434] sm:$0xf0] }
 0x229   : > { %4818 = vmatpush.bf16.msrb.mxu3 %v7976_v20  ;;  %v7543_v20 = vld [vmem:[%s9584_s16 + $0x448] sm:$0xf]  ;;  %v7800_v49 = vor.u32 %v8707_v51, %v7799_v29  ;;  %v8671_v10 = vld [vmem:[%s9584_s16 + $0x534] sm:$0xf0] }
 0x22a   : > { %4800 = vmatpush.bf16.msrb.mxu2 %v7832_v14  ;;  %v7544_v14 = vor.u32 %v8643_v38, %v7543_v20  ;;  %v7911_v13 = vld [vmem:[%s9584_s16 + $0x728] sm:$0xf]  ;;  %v8735_v54 = vld [vmem:[%s9584_s16 + $0x734] sm:$0xf0] }
 0x22b   : > { %4781 = vmatpush.bf16.msrb.mxu1 %v7704_v53  ;;  %v7928_v53 = vor.u32 %v8739_v47, %v7927_v9  ;;  %v7767_v26 = vld [vmem:[%s9584_s16 + $0x608] sm:$0xf]  ;;  %v8699_v51 = vld [vmem:[%s9584_s16 + $0x614] sm:$0xf0]  ;;  %v7912_v38 = vor.u32 %v8735_v54, %v7911_v13 }
 0x22c   : > { %4762 = vmatpush.bf16.msrb.mxu0 %v7576_v15  ;;  %v7783_v15 = vld [vmem:[%s9584_s16 + $0x628] sm:$0xf]  ;;  %v8667_v44 = vld [vmem:[%s9584_s16 + $0x514] sm:$0xf0] }
 0x22d   : > { %4819 = vmatpush.bf16.msrb.mxu3 %v7960_v18  ;;  %v7527_v18 = vld [vmem:[%s9584_s16 + $0x428] sm:$0xf]  ;;  %v4428_v3 = vpop.f32.mrf.mxu2  ;;  %v4447_v8 = vpop.f32.mrf.mxu3  ;;  %v8731_v47 = vld [vmem:[%s9584_s16 + $0x714] sm:$0xf0]  ;;  %4734 = vmatmul.bf16.gmra.mxu2 %v10384_v11 }
 0x22e   : > { %4801 = vmatpush.bf16.msrb.mxu2 %v7816_v23  ;;  %v4429_v16 = vadd.f32 %v4428_v3, %v4410_v22  ;;  %v4393_v21 = vpop.f32.mrf.mxu0  ;;  %v4412_v4 = vpop.f32.mrf.mxu1  ;;  %v7528_v29 = vor.u32 %v8639_v62, %v7527_v18  ;;  %v7656_v22 = vor.u32 %v8671_v10, %v7655_v27  ;;  %v7639_v5 = vld [vmem:[%s9584_s16 + $0x508] sm:$0xf]  ;;  %4715 = vmatmul.bf16.gmra.mxu1 %v10379_v42  ;;  %v7241_v62 = vld [vmem:[%s9584_s16 + $0x1f8] sm:$0xf0]  ;;  %v8629_v27 = vld [vmem:[%s9584_s16 + $0x3ec] sm:$0xf] }
 0x22f   : > { %4782 = vmatpush.bf16.msrb.mxu1 %v7688_v24  ;;  %v4413_v23 = vadd.f32 %v4412_v4, %v4393_v21  ;;  %v7511_v24 = vld [vmem:[%s9584_s16 + $0x408] sm:$0xf]  ;;  %4696 = vmatmul.bf16.gmra.mxu0 %v10377_v56  ;;  %v7497_v3 = vld [vmem:[%s9584_s16 + $0x3f8] sm:$0xf0]  ;;  %v8593_v4 = vld [vmem:[%s9584_s16 + $0x2cc] sm:$0xf] }
 0x230   : > { %4763 = vmatpush.bf16.msrb.mxu0 %v7560_v45  ;;  %v7784_v45 = vor.u32 %v8703_v50, %v7783_v15  ;;  %v10736_v20 = vadd.f32 %v4447_v8, %v4429_v16  ;;  %v7895_v9 = vld [vmem:[%s9584_s16 + $0x708] sm:$0xf]  ;;  %4753 = vmatmul.bf16.gmra.mxu3 %v10386_v12  ;;  %v8533_v15 = vld [vmem:[%s9584_s16 + $0xec] sm:$0xf]  ;;  %v7113_v50 = vld [vmem:[%s9584_s16 + $0xf8] sm:$0xf0]  ;;  %v7640_v8 = vor.u32 %v8667_v44, %v7639_v5 }
 0x231   : > { %4820 = vmatpush.bf16.msrb.mxu3 %v7944_v60  ;;  %v8635_v60 = vld [vmem:[%s9584_s16 + $0x414] sm:$0xf0]  ;;  %v7896_v10 = vor.u32 %v8731_v47, %v7895_v9  ;;  %v7116_v21 = vor.u32 %v8533_v15, %v7113_v50  ;;  %v7225_v5 = vld [vmem:[%s9584_s16 + $0x1d8] sm:$0xf0]  ;;  %v8625_v44 = vld [vmem:[%s9584_s16 + $0x3cc] sm:$0xf] }
 0x232   : > { %4802 = vmatpush.bf16.msrb.mxu2 %v7800_v49  ;;  %v8597_v49 = vld [vmem:[%s9584_s16 + $0x2ec] sm:$0xf]  ;;  %v7512_v18 = vor.u32 %v8635_v60, %v7511_v24  ;;  %v7500_v60 = vor.u32 %v8629_v27, %v7497_v3  ;;  %v7481_v9 = vld [vmem:[%s9584_s16 + $0x3d8] sm:$0xf0] }
 0x233   : > { %4783 = vmatpush.bf16.msrb.mxu1 %v7672_v43  ;;  %v8565_v43 = vld [vmem:[%s9584_s16 + $0x1ec] sm:$0xf]  ;;  %v7484_v15 = vor.u32 %v8625_v44, %v7481_v9  ;;  %v7449_v9 = vld [vmem:[%s9584_s16 + $0x398] sm:$0xf0] }
 0x234   : > { %4764 = vmatpush.bf16.msrb.mxu0 %v7544_v14  ;;  %v7369_v14 = vld [vmem:[%s9584_s16 + $0x2f8] sm:$0xf0]  ;;  %v7244_v24 = vor.u32 %v8565_v43, %v7241_v62  ;;  %v8589_v50 = vld [vmem:[%s9584_s16 + $0x2ac] sm:$0xf] }
 0x235   : > { %4821 = vmatpush.bf16.msrb.mxu3 %v7928_v53  ;;  %v7768_v53 = vor.u32 %v8699_v51, %v7767_v26  ;;  %v4431_v13 = vpop.f32.mrf.mxu2  ;;  %v4450_v54 = vpop.f32.mrf.mxu3  ;;  %v7372_v16 = vor.u32 %v8597_v49, %v7369_v14  ;;  %v7353_v26 = vld [vmem:[%s9584_s16 + $0x2d8] sm:$0xf0]  ;;  %v8557_v62 = vld [vmem:[%s9584_s16 + $0x1ac] sm:$0xf] }
 0x236   : > { %4803 = vmatpush.bf16.msrb.mxu2 %v7784_v45  ;;  %v4432_v45 = vadd.f32 %v4431_v13, %v4413_v23  ;;  %v4414_v51 = vpop.f32.mrf.mxu1  ;;  %v7356_v23 = vor.u32 %v8593_v4, %v7353_v26  ;;  %v7337_v43 = vld [vmem:[%s9584_s16 + $0x2b8] sm:$0xf0]  ;;  %v8617_v44 = vld [vmem:[%s9584_s16 + $0x38c] sm:$0xf] }
 0x237   : > { %4784 = vmatpush.bf16.msrb.mxu1 %v7656_v22  ;;  %v8529_v22 = vld [vmem:[%s9584_s16 + $0xcc] sm:$0xf]  ;;  %v7340_v4 = vor.u32 %v8589_v50, %v7337_v43  ;;  %v7452_v43 = vor.u32 %v8617_v44, %v7449_v9  ;;  %v7417_v9 = vld [vmem:[%s9584_s16 + $0x358] sm:$0xf0] }
 0x238   : > { %4765 = vmatpush.bf16.msrb.mxu0 %v7528_v29  ;;  %v4395_v29 = vpop.f32.mrf.mxu0  ;;  %v10762_v47 = vadd.f32 %v4450_v54, %v4432_v45  ;;  %v7100_v49 = vor.u32 %v8529_v22, %v7097_v32  ;;  %v7465_v32 = vld [vmem:[%s9584_s16 + $0x3b8] sm:$0xf0]  ;;  %v8585_v45 = vld [vmem:[%s9584_s16 + $0x28c] sm:$0xf] }
 0x239   : > { %4822 = vmatpush.bf16.msrb.mxu3 %v7912_v38  ;;  %v8561_v38 = vld [vmem:[%s9584_s16 + $0x1cc] sm:$0xf]  ;;  %v4415_v63 = vadd.f32 %v4414_v51, %v4395_v29  ;;  %v7321_v29 = vld [vmem:[%s9584_s16 + $0x298] sm:$0xf0] }
 0x23a   : > { %4804 = vmatpush.bf16.msrb.mxu2 %v7768_v53  ;;  %v7228_v14 = vor.u32 %v8561_v38, %v7225_v5  ;;  %v8525_v53 = vld [vmem:[%s9584_s16 + $0xac] sm:$0xf] }
 0x23b   : > { %4785 = vmatpush.bf16.msrb.mxu1 %v7640_v8  ;;  %v7209_v8 = vld [vmem:[%s9584_s16 + $0x1b8] sm:$0xf0]  ;;  %v8521_v22 = vld [vmem:[%s9584_s16 + $0x8c] sm:$0xf] }
 0x23c   : > { %4766 = vmatpush.bf16.msrb.mxu0 %v7512_v18  ;;  %v7081_v18 = vld [vmem:[%s9584_s16 + $0xb8] sm:$0xf0]  ;;  %v8553_v38 = vld [vmem:[%s9584_s16 + $0x18c] sm:$0xf] }
 0x23d   : > { %4823 = vmatpush.bf16.msrb.mxu3 %v7896_v10  ;;  %v4433_v27 = vpop.f32.mrf.mxu2  ;;  %v4452_v3 = vpop.f32.mrf.mxu3  ;;  %v8621_v10 = vld [vmem:[%s9584_s16 + $0x3ac] sm:$0xf]  ;;  %v7084_v26 = vor.u32 %v8525_v53, %v7081_v18  ;;  %4805 = vmatmul.bf16.vlgmr.msrb.gmra.mxu2 %v10432_v33  ;;  %v7049_v18 = vld [vmem:[%s9584_s16 + $0x78] sm:$0xf0] }
 0x23e   : > { %4873 = vmatpush.bf16.msra.mxu2 %v7372_v16  ;;  %v4434_v13 = vadd.f32 %v4433_v27, %v4415_v63  ;;  %v4483_v16 = vpop.f32.mrf.mxu1  ;;  %v7065_v63 = vld [vmem:[%s9584_s16 + $0x98] sm:$0xf0]  ;;  %4786 = vmatmul.bf16.vlgmr.msrb.gmra.mxu1 %v10427_v30  ;;  %v8517_v53 = vld [vmem:[%s9584_s16 + $0x6c] sm:$0xf] }
 0x23f   : > { %4854 = vmatpush.bf16.msra.mxu1 %v7244_v24  ;;  %v7212_v24 = vor.u32 %v8557_v62, %v7209_v8  ;;  %4767 = vmatmul.bf16.vlgmr.msrb.gmra.mxu0 %v10425_v31  ;;  %v8549_v62 = vld [vmem:[%s9584_s16 + $0x16c] sm:$0xf]  ;;  %v7177_v8 = vld [vmem:[%s9584_s16 + $0x178] sm:$0xf0] }
 0x240   : > { %4835 = vmatpush.bf16.msra.mxu0 %v7116_v21  ;;  %v4464_v54 = vpop.f32.mrf.mxu0  ;;  %v10775_v51 = vadd.f32 %v4452_v3, %v4434_v13  ;;  %4824 = vmatmul.bf16.vlgmr.msrb.gmra.mxu3 %v10434_v37  ;;  %v8609_v44 = vld [vmem:[%s9584_s16 + $0x34c] sm:$0xf] }
 0x241   : > { %4892 = vmatpush.bf16.msra.mxu3 %v7500_v60  ;;  %v4465_v21 = vadd.f32 %v4464_v54, %v10716_v57  ;;  %v7468_v60 = vor.u32 %v8621_v10, %v7465_v32  ;;  %v7193_v57 = vld [vmem:[%s9584_s16 + $0x198] sm:$0xf0]  ;;  %v8613_v10 = vld [vmem:[%s9584_s16 + $0x36c] sm:$0xf] }
 0x242   : > { %4874 = vmatpush.bf16.msra.mxu2 %v7356_v23  ;;  %v7324_v23 = vor.u32 %v8585_v45, %v7321_v29  ;;  %v7196_v50 = vor.u32 %v8553_v38, %v7193_v57  ;;  %v7433_v32 = vld [vmem:[%s9584_s16 + $0x378] sm:$0xf0]  ;;  %v8577_v45 = vld [vmem:[%s9584_s16 + $0x24c] sm:$0xf] }
 0x243   : > { %4855 = vmatpush.bf16.msra.mxu1 %v7228_v14  ;;  %v4484_v5 = vadd.f32 %v4483_v16, %v4465_v21  ;;  %v8581_v14 = vld [vmem:[%s9584_s16 + $0x26c] sm:$0xf]  ;;  %v7289_v29 = vld [vmem:[%s9584_s16 + $0x258] sm:$0xf0] }
 0x244   : > { %4836 = vmatpush.bf16.msra.mxu0 %v7100_v49  ;;  %v7068_v49 = vor.u32 %v8521_v22, %v7065_v63  ;;  %v7436_v22 = vor.u32 %v8613_v10, %v7433_v32  ;;  %v8513_v63 = vld [vmem:[%s9584_s16 + $0x4c] sm:$0xf]  ;;  %v7033_v38 = vld [vmem:[%s9584_s16 + $0x58] sm:$0xf0] }
 0x245   : > { %4893 = vmatpush.bf16.msra.mxu3 %v7484_v15  ;;  %v7305_v15 = vld [vmem:[%s9584_s16 + $0x278] sm:$0xf0]  ;;  %v4502_v27 = vpop.f32.mrf.mxu2  ;;  %v4521_v3 = vpop.f32.mrf.mxu3 }
 0x246   : > { %4875 = vmatpush.bf16.msra.mxu2 %v7340_v4  ;;  %v4503_v13 = vadd.f32 %v4502_v27, %v4484_v5  ;;  %v4485_v16 = vpop.f32.mrf.mxu1  ;;  %v7308_v4 = vor.u32 %v8581_v14, %v7305_v15  ;;  %v8545_v5 = vld [vmem:[%s9584_s16 + $0x14c] sm:$0xf]  ;;  %v7161_v57 = vld [vmem:[%s9584_s16 + $0x158] sm:$0xf0]  ;;  %v7292_v14 = vor.u32 %v8577_v45, %v7289_v29  ;;  %v7036_v15 = vor.u32 %v8513_v63, %v7033_v38 }
 0x247   : > { %4856 = vmatpush.bf16.msra.mxu1 %v7212_v24  ;;  %v8509_v27 = vld [vmem:[%s9584_s16 + $0x2c] sm:$0xf]  ;;  %v7145_v32 = vld [vmem:[%s9584_s16 + $0x138] sm:$0xf0] }
 0x248   : > { %4837 = vmatpush.bf16.msra.mxu0 %v7084_v26  ;;  %v4466_v54 = vpop.f32.mrf.mxu0  ;;  %v7052_v26 = vor.u32 %v8517_v53, %v7049_v18  ;;  %v4522_v24 = vadd.f32 %v4521_v3, %v4503_v13  ;;  %v7164_v18 = vor.u32 %v8545_v5, %v7161_v57  ;;  %v7017_v3 = vld [vmem:[%s9584_s16 + $0x38] sm:$0xf0]  ;;  %v8605_v13 = vld [vmem:[%s9584_s16 + $0x32c] sm:$0xf] }
 0x249   : > { %4894 = vmatpush.bf16.msra.mxu3 %v7468_v60  ;;  %v4467_v21 = vadd.f32 %v4466_v54, %v10736_v20  ;;  %v7180_v60 = vor.u32 %v8549_v62, %v7177_v8  ;;  %v7420_v62 = vor.u32 %v8609_v44, %v7417_v9  ;;  %v7401_v54 = vld [vmem:[%s9584_s16 + $0x338] sm:$0xf0]  ;;  %v8537_v57 = vld [vmem:[%s9584_s16 + $0x10c] sm:$0xf] }
 0x24a   : > { %4876 = vmatpush.bf16.msra.mxu2 %v7324_v23  ;;  %v4987_v23 = vmul.f32 %v10110_v48, %v10110_v48  ;;  %v8541_v48 = vld [vmem:[%s9584_s16 + $0x12c] sm:$0xf]  ;;  %v7001_v63 = vld [vmem:[%s9584_s16 + $0x18] sm:$0xf0] }
 0x24b   : > { %4857 = vmatpush.bf16.msra.mxu1 %v7196_v50  ;;  %v4486_v20 = vadd.f32 %v4485_v16, %v4467_v21  ;;  %v8573_v50 = vld [vmem:[%s9584_s16 + $0x22c] sm:$0xf]  ;;  %v7148_v5 = vor.u32 %v8541_v48, %v7145_v32  ;;  %v7753_v48 = vld [vmem:[%s9584_s16 + $0x5f8] sm:$0xf0] }
 0x24c   : > { %4838 = vmatpush.bf16.msra.mxu0 %v7068_v49  ;;  %v5003_v49 = vmul.f32 %v4522_v24, %v4522_v24  ;;  %v7020_v24 = vor.u32 %v8509_v27, %v7017_v3  ;;  %v8601_v44 = vld [vmem:[%s9584_s16 + $0x30c] sm:$0xf] }
 0x24d   : > { %4895 = vmatpush.bf16.msra.mxu3 %v7452_v43  ;;  %v7273_v43 = vld [vmem:[%s9584_s16 + $0x238] sm:$0xf0]  ;;  %v4504_v8 = vpop.f32.mrf.mxu2  ;;  %v4523_v10 = vpop.f32.mrf.mxu3  ;;  %4810 = vmatmul.bf16.gmra.mxu2 %v10482_v0 }
 0x24e   : > { %4877 = vmatpush.bf16.msra.mxu2 %v7308_v4  ;;  %v10808_v53 = vadd.f32 %v5003_v49, %v4987_v23  ;;  %v4505_v16 = vadd.f32 %v4504_v8, %v4486_v20  ;;  %v4488_v4 = vpop.f32.mrf.mxu1  ;;  %v7276_v29 = vor.u32 %v8573_v50, %v7273_v43  ;;  %v7404_v20 = vor.u32 %v8605_v13, %v7401_v54  ;;  %v7385_v23 = vld [vmem:[%s9584_s16 + $0x318] sm:$0xf0]  ;;  %v8725_v49 = vld [vmem:[%s9584_s16 + $0x6ec] sm:$0xf] }
 0x24f   : > { %4858 = vmatpush.bf16.msra.mxu1 %v7180_v60  ;;  %v7257_v60 = vld [vmem:[%s9584_s16 + $0x218] sm:$0xf0]  ;;  %4772 = vmatmul.bf16.gmra.mxu0 %v10475_v19  ;;  %v8661_v43 = vld [vmem:[%s9584_s16 + $0x4ec] sm:$0xf]  ;;  %v7388_v13 = vor.u32 %v8601_v44, %v7385_v23 }
 0x250   : > { %4839 = vmatpush.bf16.msra.mxu0 %v7052_v26  ;;  %v4469_v21 = vpop.f32.mrf.mxu0  ;;  %v8569_v26 = vld [vmem:[%s9584_s16 + $0x20c] sm:$0xf]  ;;  %v4524_v38 = vadd.f32 %v4523_v10, %v4505_v16  ;;  %4791 = vmatmul.bf16.gmra.mxu1 %v10477_v58  ;;  %v8009_v10 = vld [vmem:[%s9584_s16 + $0x7f8] sm:$0xf0] }
 0x251   : > { %4896 = vmatpush.bf16.msra.mxu3 %v7436_v22  ;;  %v4470_v45 = vadd.f32 %v4469_v21, %v10762_v47  ;;  %v8505_v22 = vld [vmem:[%s9584_s16 + $0xc] sm:$0xf]  ;;  %v7129_v47 = vld [vmem:[%s9584_s16 + $0x118] sm:$0xf0]  ;;  %v7260_v27 = vor.u32 %v8569_v26, %v7257_v60 }
 0x252   : > { %4878 = vmatpush.bf16.msra.mxu2 %v7292_v14  ;;  %v7881_v14 = vld [vmem:[%s9584_s16 + $0x6f8] sm:$0xf0]  ;;  %v5007_v50 = vmul.f32 %v4524_v38, %v4524_v38  ;;  %4829 = vmatmul.bf16.gmra.mxu3 %v10484_v28  ;;  %v7004_v3 = vor.u32 %v8505_v22, %v7001_v63  ;;  %v8757_v8 = vld [vmem:[%s9584_s16 + $0x7ec] sm:$0xf] }
 0x253   : > { %4859 = vmatpush.bf16.msra.mxu1 %v7164_v18  ;;  %v4489_v9 = vadd.f32 %v4488_v4, %v4470_v45  ;;  %v7625_v18 = vld [vmem:[%s9584_s16 + $0x4f8] sm:$0xf0]  ;;  %v7884_v21 = vor.u32 %v8725_v49, %v7881_v14  ;;  %v8721_v26 = vld [vmem:[%s9584_s16 + $0x6cc] sm:$0xf]  ;;  %v8012_v38 = vor.u32 %v8757_v8, %v8009_v10  ;;  %v4995_v14 = vmul.f32 %v10158_v25, %v10158_v25 }
 0x254   : > { %4840 = vmatpush.bf16.msra.mxu0 %v7036_v15  ;;  %v4991_v15 = vmul.f32 %v10131_v34, %v10131_v34  ;;  %v7132_v34 = vor.u32 %v8537_v57, %v7129_v47  ;;  %v7628_v4 = vor.u32 %v8661_v43, %v7625_v18  ;;  %v7865_v45 = vld [vmem:[%s9584_s16 + $0x6d8] sm:$0xf0]  ;;  %v8689_v57 = vld [vmem:[%s9584_s16 + $0x5cc] sm:$0xf] }
 0x255   : > { %4897 = vmatpush.bf16.msra.mxu3 %v7420_v62  ;;  %v8693_v62 = vld [vmem:[%s9584_s16 + $0x5ec] sm:$0xf]  ;;  %v4507_v54 = vpop.f32.mrf.mxu2  ;;  %v4526_v16 = vpop.f32.mrf.mxu3  ;;  %v7737_v44 = vld [vmem:[%s9584_s16 + $0x5d8] sm:$0xf0] }
 0x256   : > { %4879 = vmatpush.bf16.msra.mxu2 %v7276_v29  ;;  %v10839_v32 = vadd.f32 %v5007_v50, %v4991_v15  ;;  %v4490_v22 = vpop.f32.mrf.mxu1  ;;  %v7756_v63 = vor.u32 %v8693_v62, %v7753_v48  ;;  %v8753_v23 = vld [vmem:[%s9584_s16 + $0x7cc] sm:$0xf]  ;;  %v7993_v49 = vld [vmem:[%s9584_s16 + $0x7d8] sm:$0xf0]  ;;  %v7740_v18 = vor.u32 %v8689_v57, %v7737_v44 }
 0x257   : > { %4860 = vmatpush.bf16.msra.mxu1 %v7148_v5  ;;  %v8657_v5 = vld [vmem:[%s9584_s16 + $0x4cc] sm:$0xf]  ;;  %v7996_v62 = vor.u32 %v8753_v23, %v7993_v49  ;;  %v7593_v8 = vld [vmem:[%s9584_s16 + $0x4b8] sm:$0xf0] }
 0x258   : > { %4841 = vmatpush.bf16.msra.mxu0 %v7020_v24  ;;  %v5035_v29 = vpack.c.bf16 %v10839_v32, %v10808_v53  ;;  %v4508_v24 = vadd.f32 %v4507_v54, %v4489_v9  ;;  %v4471_v60 = vpop.f32.mrf.mxu0  ;;  %v8717_v25 = vld [vmem:[%s9584_s16 + $0x6ac] sm:$0xf]  ;;  %v7721_v54 = vld [vmem:[%s9584_s16 + $0x5b8] sm:$0xf0] }
 0x259   : > { %4898 = vmatpush.bf16.msra.mxu3 %v7404_v20  ;;  %v7609_v20 = vld [vmem:[%s9584_s16 + $0x4d8] sm:$0xf0]  ;;  %v4472_v47 = vadd.f32 %v4471_v60, %v10775_v51  ;;  %v7868_v51 = vor.u32 %v8721_v26, %v7865_v45  ;;  %v8653_v48 = vld [vmem:[%s9584_s16 + $0x4ac] sm:$0xf] }
 0x25a   : > { %4880 = vmatpush.bf16.msra.mxu2 %v7260_v27  ;;  %v4527_v9 = vadd.f32 %v4526_v16, %v4508_v24  ;;  %v7612_v50 = vor.u32 %v8657_v5, %v7609_v20  ;;  %v7849_v27 = vld [vmem:[%s9584_s16 + $0x6b8] sm:$0xf0]  ;;  %v8685_v10 = vld [vmem:[%s9584_s16 + $0x5ac] sm:$0xf]  ;;  %v7596_v60 = vor.u32 %v8653_v48, %v7593_v8 }
 0x25b   : > { %4861 = vmatpush.bf16.msra.mxu1 %v7132_v34  ;;  %v4491_v15 = vadd.f32 %v4490_v22, %v4472_v47  ;;  %v8749_v16 = vld [vmem:[%s9584_s16 + $0x7ac] sm:$0xf]  ;;  %v7852_v24 = vor.u32 %v8717_v25, %v7849_v27  ;;  %v7724_v5 = vor.u32 %v8685_v10, %v7721_v54  ;;  %v7577_v47 = vld [vmem:[%s9584_s16 + $0x498] sm:$0xf0] }
 0x25c   : > { %4842 = vmatpush.bf16.msra.mxu0 %v7004_v3  ;;  %v5011_v43 = vmul.f32 %v4527_v9, %v4527_v9  ;;  %v8713_v22 = vld [vmem:[%s9584_s16 + $0x68c] sm:$0xf]  ;;  %v7705_v23 = vld [vmem:[%s9584_s16 + $0x598] sm:$0xf0]  ;;  %v4999_v9 = vmul.f32 %v10170_v59, %v10170_v59 }
 0x25d   : > { %4899 = vmatpush.bf16.msra.mxu3 %v7388_v13  ;;  %v4509_v34 = vpop.f32.mrf.mxu2  ;;  %v4528_v13 = vpop.f32.mrf.mxu3  ;;  %v8649_v57 = vld [vmem:[%s9584_s16 + $0x48c] sm:$0xf]  ;;  %4881 = vmatmul.bf16.vlgmr.msra.gmra.mxu2 %v10336_v7  ;;  %v7561_v7 = vld [vmem:[%s9584_s16 + $0x478] sm:$0xf0] }
 0x25e   : > { %4949 = vmatpush.bf16.msrb.mxu2 %v7884_v21  ;;  %v10856_v3 = vadd.f32 %v5011_v43, %v4995_v14  ;;  %v7977_v21 = vld [vmem:[%s9584_s16 + $0x7b8] sm:$0xf0]  ;;  %v10866_v45 = vpop.f32.mrf.mxu1  ;;  %v8681_v44 = vld [vmem:[%s9584_s16 + $0x58c] sm:$0xf] }
 0x25f   : > { %4930 = vmatpush.bf16.msrb.mxu1 %v7756_v63  ;;  %v7833_v63 = vld [vmem:[%s9584_s16 + $0x698] sm:$0xf0]  ;;  %v7980_v20 = vor.u32 %v8749_v16, %v7977_v21  ;;  %4843 = vmatmul.bf16.vlgmr.msra.gmra.mxu0 %v10329_v35  ;;  %v8745_v49 = vld [vmem:[%s9584_s16 + $0x78c] sm:$0xf]  ;;  %v7708_v59 = vor.u32 %v8681_v44, %v7705_v23 }
 0x260   : > { %4911 = vmatpush.bf16.msrb.mxu0 %v7628_v4  ;;  %v4510_v4 = vadd.f32 %v4509_v34, %v4491_v15  ;;  %v10864_v26 = vpop.f32.mrf.mxu0  ;;  %4862 = vmatmul.bf16.vlgmr.msra.gmra.mxu1 %v10331_v2  ;;  %v7961_v14 = vld [vmem:[%s9584_s16 + $0x798] sm:$0xf0]  ;;  %v7836_v35 = vor.u32 %v8713_v22, %v7833_v63  ;;  %v7580_v2 = vor.u32 %v8649_v57, %v7577_v47  ;;  %v8741_v8 = vld [vmem:[%s9584_s16 + $0x76c] sm:$0xf] }
 0x261   : > { %4968 = vmatpush.bf16.msrb.mxu3 %v8012_v38  ;;  %v7689_v48 = vld [vmem:[%s9584_s16 + $0x578] sm:$0xf0]  ;;  %v8641_v63 = vld [vmem:[%s9584_s16 + $0x44c] sm:$0xf] }
 0x262   : > { %4950 = vmatpush.bf16.msrb.mxu2 %v7868_v51  ;;  %v4529_v38 = vadd.f32 %v4528_v13, %v4510_v4  ;;  %4900 = vmatmul.bf16.vlgmr.msra.gmra.mxu3 %v10338_v39  ;;  %v8709_v51 = vld [vmem:[%s9584_s16 + $0x66c] sm:$0xf]  ;;  %v7945_v10 = vld [vmem:[%s9584_s16 + $0x778] sm:$0xf0] }
 0x263   : > { %4931 = vmatpush.bf16.msrb.mxu1 %v7740_v18  ;;  %v7964_v18 = vor.u32 %v8745_v49, %v7961_v14  ;;  %v8677_v39 = vld [vmem:[%s9584_s16 + $0x56c] sm:$0xf]  ;;  %v7948_v22 = vor.u32 %v8741_v8, %v7945_v10  ;;  %v7929_v47 = vld [vmem:[%s9584_s16 + $0x758] sm:$0xf0] }
 0x264   : > { %4912 = vmatpush.bf16.msrb.mxu0 %v7612_v50  ;;  %v5015_v15 = vmul.f32 %v4529_v38, %v4529_v38  ;;  %v7817_v50 = vld [vmem:[%s9584_s16 + $0x678] sm:$0xf0]  ;;  %v8705_v4 = vld [vmem:[%s9584_s16 + $0x64c] sm:$0xf] }
 0x265   : > { %4969 = vmatpush.bf16.msrb.mxu3 %v7996_v62  ;;  %v8645_v62 = vld [vmem:[%s9584_s16 + $0x46c] sm:$0xf]  ;;  %v10889_v25 = vpop.f32.mrf.mxu2  ;;  %v10891_v27 = vpop.f32.mrf.mxu3  ;;  %v7820_v16 = vor.u32 %v8709_v51, %v7817_v50  ;;  %v7545_v38 = vld [vmem:[%s9584_s16 + $0x458] sm:$0xf0] }
 0x266   : > { %4951 = vmatpush.bf16.msrb.mxu2 %v7852_v24  ;;  %v10884_v43 = vadd.f32 %v5015_v15, %v4999_v9  ;;  %v10898_v13 = vpop.f32.mrf.mxu1  ;;  %v7564_v21 = vor.u32 %v8645_v62, %v7561_v7  ;;  %v7801_v24 = vld [vmem:[%s9584_s16 + $0x658] sm:$0xf0]  ;;  %v8737_v57 = vld [vmem:[%s9584_s16 + $0x74c] sm:$0xf]  ;;  %v7548_v23 = vor.u32 %v8641_v63, %v7545_v38 }
 0x267   : > { %4932 = vmatpush.bf16.msrb.mxu1 %v7724_v5  ;;  %v8673_v5 = vld [vmem:[%s9584_s16 + $0x54c] sm:$0xf]  ;;  %v7804_v44 = vor.u32 %v8705_v4, %v7801_v24  ;;  %v7785_v14 = vld [vmem:[%s9584_s16 + $0x638] sm:$0xf0]  ;;  %v7932_v15 = vor.u32 %v8737_v57, %v7929_v47 }
 0x268   : > { %4913 = vmatpush.bf16.msrb.mxu0 %v7596_v60  ;;  %v10896_v34 = vpop.f32.mrf.mxu0  ;;  %v5039_v54 = vpack.c.bf16 %v10884_v43, %v10856_v3  ;;  %v7692_v60 = vor.u32 %v8677_v39, %v7689_v48  ;;  %v8701_v49 = vld [vmem:[%s9584_s16 + $0x62c] sm:$0xf]  ;;  %v7913_v7 = vld [vmem:[%s9584_s16 + $0x738] sm:$0xf0] }
 0x269   : > { %4970 = vmatpush.bf16.msrb.mxu3 %v7980_v20  ;;  %v7673_v20 = vld [vmem:[%s9584_s16 + $0x558] sm:$0xf0]  ;;  %v8669_v51 = vld [vmem:[%s9584_s16 + $0x52c] sm:$0xf]  ;;  %v7788_v8 = vor.u32 %v8701_v49, %v7785_v14 }
 0x26a   : > { %4952 = vmatpush.bf16.msrb.mxu2 %v7836_v35  ;;  %v7676_v9 = vor.u32 %v8673_v5, %v7673_v20  ;;  %v8637_v35 = vld [vmem:[%s9584_s16 + $0x42c] sm:$0xf]  ;;  %v7641_v38 = vld [vmem:[%s9584_s16 + $0x518] sm:$0xf0] }
 0x26b   : > { %4933 = vmatpush.bf16.msrb.mxu1 %v7708_v59  ;;  %v8733_v62 = vld [vmem:[%s9584_s16 + $0x72c] sm:$0xf]  ;;  %v7897_v20 = vld [vmem:[%s9584_s16 + $0x718] sm:$0xf0] }
 0x26c   : > { %4914 = vmatpush.bf16.msrb.mxu0 %v7580_v2  ;;  %v7529_v2 = vld [vmem:[%s9584_s16 + $0x438] sm:$0xf0]  ;;  %v7916_v24 = vor.u32 %v8733_v62, %v7913_v7  ;;  %v8665_v63 = vld [vmem:[%s9584_s16 + $0x50c] sm:$0xf] }
 0x26d   : > { %4971 = vmatpush.bf16.msrb.mxu3 %v7964_v18  ;;  %v10915_v50 = vpop.f32.mrf.mxu2  ;;  %v10917_v59 = vpop.f32.mrf.mxu3  ;;  %v7657_v18 = vld [vmem:[%s9584_s16 + $0x538] sm:$0xf0]  ;;  %v7532_v10 = vor.u32 %v8637_v35, %v7529_v2  ;;  %v8729_v5 = vld [vmem:[%s9584_s16 + $0x70c] sm:$0xf]  ;;  %4886 = vmatmul.bf16.gmra.mxu2 %v10384_v11  ;;  %v8766_v11 = vld [vmem:[%s9586_s0 + $0x30] sm:$0xff]  ;;  %v4560_v35 = vadd.f32 %v10866_v45, %v10864_v26 }
 0x26e   : > { %4953 = vmatpush.bf16.msrb.mxu2 %v7820_v16  ;;  %v10924_v48 = vpop.f32.mrf.mxu1  ;;  %v8697_v16 = vld [vmem:[%s9584_s16 + $0x60c] sm:$0xf]  ;;  %v7660_v4 = vor.u32 %v8669_v51, %v7657_v18  ;;  %v8767_v49 = vld [vmem:[%s9586_s0 + $0x38] sm:$0xff] }
 0x26f   : > { %4934 = vmatpush.bf16.msrb.mxu1 %v7692_v60  ;;  %v8633_v60 = vld [vmem:[%s9584_s16 + $0x40c] sm:$0xf]  ;;  %4848 = vmatmul.bf16.gmra.mxu0 %v10377_v56  ;;  %v7644_v56 = vor.u32 %v8665_v63, %v7641_v38  ;;  %v8775_v14 = vld [vmem:[%s9586_s0 + $0x78] sm:$0xff]  ;;  %v4579_v2 = vadd.f32 %v10889_v25, %v4560_v35  ;;  %v8764_v25 = vld [vmem:[%s9586_s0 + $0x20] sm:$0xff] }
 0x270   : > { %4915 = vmatpush.bf16.msrb.mxu0 %v7564_v21  ;;  %v10922_v39 = vpop.f32.mrf.mxu0  ;;  %v7769_v21 = vld [vmem:[%s9584_s16 + $0x618] sm:$0xf0]  ;;  %4867 = vmatmul.bf16.gmra.mxu1 %v10379_v42  ;;  %v8762_v63 = vld [vmem:[%s9586_s0 + $0x10] sm:$0xff] }
 0x271   : > { %4972 = vmatpush.bf16.msrb.mxu3 %v7948_v22  ;;  %v7513_v22 = vld [vmem:[%s9584_s16 + $0x418] sm:$0xf0]  ;;  %v7772_v57 = vor.u32 %v8697_v16, %v7769_v21  ;;  %v4598_v16 = vadd.f32 %v10891_v27, %v4579_v2  ;;  %v4562_v21 = vadd.f32 %v10898_v13, %v10896_v34  ;;  %v8772_v27 = vld [vmem:[%s9586_s0 + $0x60] sm:$0xff]  ;;  %v8770_v38 = vld [vmem:[%s9586_s0 + $0x50] sm:$0xff]  ;;  %v4992_v2 = vmul.f32 %v10295_v1, %v10295_v1 }
 0x272   : > { %4954 = vmatpush.bf16.msrb.mxu2 %v7804_v44  ;;  %4905 = vmatmul.bf16.gmra.mxu3 %v10386_v12  ;;  %v7516_v47 = vor.u32 %v8633_v60, %v7513_v22  ;;  %v7900_v44 = vor.u32 %v8729_v5, %v7897_v20  ;;  %v8774_v12 = vld [vmem:[%s9586_s0 + $0x70] sm:$0xff]  ;;  %v8771_v60 = vld [vmem:[%s9586_s0 + $0x58] sm:$0xff] }
 0x273   : > { %4935 = vmatpush.bf16.msrb.mxu1 %v7676_v9  ;;  %v4581_v26 = vadd.f32 %v10915_v50, %v4562_v21 }
 0x274   : > { %4916 = vmatpush.bf16.msrb.mxu0 %v7548_v23 }
 0x275   : > { %4973 = vmatpush.bf16.msrb.mxu3 %v7932_v15  ;;  %v4583_v42 = vpop.f32.mrf.mxu2  ;;  %v10938_v23 = vpop.f32.mrf.mxu3 }
 0x276   : > { %4955 = vmatpush.bf16.msrb.mxu2 %v7788_v8  ;;  %v4566_v15 = vpop.f32.mrf.mxu1  ;;  %v8765_v8 = vld [vmem:[%s9586_s0 + $0x28] sm:$0xff] }
 0x277   : > { %4936 = vmatpush.bf16.msrb.mxu1 %v7660_v4 }
 0x278   : > { %4917 = vmatpush.bf16.msrb.mxu0 %v7532_v10  ;;  %v4547_v9 = vpop.f32.mrf.mxu0  ;;  %v8773_v10 = vld [vmem:[%s9586_s0 + $0x68] sm:$0xff] }
 0x279   : > { %4974 = vmatpush.bf16.msrb.mxu3 %v7916_v24  ;;  %v8763_v24 = vld [vmem:[%s9586_s0 + $0x18] sm:$0xff] }
 0x27a   : > { %4956 = vmatpush.bf16.msrb.mxu2 %v7772_v57 }
 0x27b   : > { %4937 = vmatpush.bf16.msrb.mxu1 %v7644_v56 }
 0x27c   : > { %4918 = vmatpush.bf16.msrb.mxu0 %v7516_v47 }
 0x27d   : > { %4975 = vmatpush.bf16.msrb.mxu3 %v7900_v44  ;;  %v4585_v51 = vpop.f32.mrf.mxu2  ;;  %v10947_v18 = vpop.f32.mrf.mxu3  ;;  %4957 = vmatmul.bf16.vlgmr.msrb.gmra.mxu2 %v10432_v33 }
 0x27e   : > { %v4635_v7 = vpop.f32.mrf.mxu1 }
 0x27f   : > { %5322 = vmatpush.bf16.msra.mxu1 %v8775_v14  ;;  %4919 = vmatmul.bf16.vlgmr.msrb.gmra.mxu0 %v10425_v31  ;;  %v4600_v31 = vadd.f32 %v10917_v59, %v4581_v26  ;;  %v8761_v14 = vld [vmem:[%s9586_s0 + $0x8] sm:$0xff] }
 0x280   : > { %5303 = vmatpush.bf16.msra.mxu0 %v8767_v49  ;;  %v4616_v62 = vpop.f32.mrf.mxu0  ;;  %4938 = vmatmul.bf16.vlgmr.msrb.gmra.mxu1 %v10427_v30 }
 0x281   : > { %v4617_v45 = vadd.f32 %v4616_v62, %v4598_v16 }
 0x282   : > { %4976 = vmatmul.bf16.vlgmr.msrb.gmra.mxu3 %v10434_v37  ;;  %v4565_v37 = vadd.f32 %v10924_v48, %v10922_v39  ;;  %v4567_v48 = vadd.f32 %v4566_v15, %v4547_v9  ;;  %v8768_v9 = vld [vmem:[%s9586_s0 + $0x40] sm:$0xff] }
 0x283   : > { %5323 = vmatpush.bf16.msra.mxu1 %v8774_v12  ;;  %v4636_v30 = vadd.f32 %v4635_v7, %v4617_v45  ;;  %v8782_v45 = vld [vmem:[%s9586_s0 + $0xb0] sm:$0xff] }
 0x284   : > { %5304 = vmatpush.bf16.msra.mxu0 %v8766_v11  ;;  %v4584_v5 = vadd.f32 %v4583_v42, %v4565_v37  ;;  %v8769_v11 = vld [vmem:[%s9586_s0 + $0x48] sm:$0xff]  ;;  %v4988_v42 = vmul.f32 %v10274_v61, %v10274_v61  ;;  %v4586_v62 = vadd.f32 %v4585_v51, %v4567_v48  ;;  %v8780_v37 = vld [vmem:[%s9586_s0 + $0xa0] sm:$0xff] }
 0x285   : > { %v4654_v4 = vpop.f32.mrf.mxu2  ;;  %v4673_v34 = vpop.f32.mrf.mxu3 }
 0x286   : > { %v4637_v50 = vpop.f32.mrf.mxu1  ;;  %v4655_v33 = vadd.f32 %v4654_v4, %v4636_v30  ;;  %v4603_v39 = vadd.f32 %v10938_v23, %v4584_v5  ;;  %v8760_v23 = vld [vmem:[%s9586_s0] sm:$0xff] }
 0x287   : > { %5324 = vmatpush.bf16.msra.mxu1 %v8773_v10 }
 0x288   : > { %5305 = vmatpush.bf16.msra.mxu0 %v8765_v8  ;;  %v4618_v13 = vpop.f32.mrf.mxu0  ;;  %v4674_v59 = vadd.f32 %v4673_v34, %v4655_v33  ;;  %v5000_v33 = vmul.f32 %v10342_v46, %v10342_v46 }
 0x289   : > { %v4619_v22 = vadd.f32 %v4618_v13, %v4600_v31  ;;  %v8781_v13 = vld [vmem:[%s9586_s0 + $0xa8] sm:$0xff] }
 0x28a   : > { %v5004_v12 = vmul.f32 %v4674_v59, %v4674_v59 }
 0x28b   : > { %5325 = vmatpush.bf16.msra.mxu1 %v8772_v27  ;;  %v4638_v20 = vadd.f32 %v4637_v50, %v4619_v22 }
 0x28c   : > { %5306 = vmatpush.bf16.msra.mxu0 %v8764_v25  ;;  %v5020_v61 = vadd.f32 %v5004_v12, %v4988_v42 }
 0x28d   : > { %v4656_v57 = vpop.f32.mrf.mxu2  ;;  %v4675_v47 = vpop.f32.mrf.mxu3  ;;  %4962 = vmatmul.bf16.gmra.mxu2 %v10482_v0  ;;  %v8783_v0 = vld [vmem:[%s9586_s0 + $0xb8] sm:$0xff] }
 0x28e   : > { %v4657_v56 = vadd.f32 %v4656_v57, %v4638_v20  ;;  %v4640_v49 = vpop.f32.mrf.mxu1  ;;  %5341 = vmatpush.bf16.msra.mxu2 %v8783_v0  ;;  %v8778_v57 = vld [vmem:[%s9586_s0 + $0x90] sm:$0xff] }
 0x28f   : > { %5326 = vmatpush.bf16.msra.mxu1 %v8771_v60  ;;  %4924 = vmatmul.bf16.gmra.mxu0 %v10475_v19  ;;  %v4605_v19 = vadd.f32 %v10947_v18, %v4586_v62  ;;  %v4996_v60 = vmul.f32 %v10322_v55, %v10322_v55 }
 0x290   : > { %5307 = vmatpush.bf16.msra.mxu0 %v8763_v24  ;;  %v4621_v44 = vpop.f32.mrf.mxu0  ;;  %v4676_v35 = vadd.f32 %v4675_v47, %v4657_v56  ;;  %4943 = vmatmul.bf16.gmra.mxu1 %v10477_v58 }
 0x291   : > { %v4622_v8 = vadd.f32 %v4621_v44, %v4603_v39  ;;  %v8777_v44 = vld [vmem:[%s9586_s0 + $0x88] sm:$0xff] }
 0x292   : > { %v5008_v7 = vmul.f32 %v4676_v35, %v4676_v35  ;;  %4981 = vmatmul.bf16.gmra.mxu3 %v10484_v28  ;;  %5342 = vmatpush.bf16.msra.mxu2 %v8782_v45 }
 0x293   : > { %5327 = vmatpush.bf16.msra.mxu1 %v8770_v38  ;;  %v4641_v51 = vadd.f32 %v4640_v49, %v4622_v8  ;;  %v8776_v49 = vld [vmem:[%s9586_s0 + $0x80] sm:$0xff] }
 0x294   : > { %5308 = vmatpush.bf16.msra.mxu0 %v8762_v63  ;;  %v5024_v15 = vadd.f32 %v5008_v7, %v4992_v2 }
 0x295   : > { %v4659_v1 = vpop.f32.mrf.mxu2  ;;  %v4678_v10 = vpop.f32.mrf.mxu3 }
 0x296   : > { %v5036_v58 = vpack.c.bf16 %v5024_v15, %v5020_v61  ;;  %v4642_v21 = vpop.f32.mrf.mxu1  ;;  %v4660_v28 = vadd.f32 %v4659_v1, %v4641_v51  ;;  %5343 = vmatpush.bf16.msra.mxu2 %v8781_v13  ;;  %v4993_v13 = vmul.f32 %v10491_v36, %v10491_v36  ;;  %v8790_v36 = vld [vmem:[%s9586_s0 + $0xf0] sm:$0xff] }
 0x297   : > { %5328 = vmatpush.bf16.msra.mxu1 %v8769_v11 }
 0x298   : > { %5309 = vmatpush.bf16.msra.mxu0 %v8761_v14  ;;  %v4623_v16 = vpop.f32.mrf.mxu0  ;;  %v4679_v25 = vadd.f32 %v4678_v10, %v4660_v28 }
 0x299   : > { %v4624_v26 = vadd.f32 %v4623_v16, %v4605_v19 }
 0x29a   : > { %v5012_v50 = vmul.f32 %v4679_v25, %v4679_v25  ;;  %5344 = vmatpush.bf16.msra.mxu2 %v8780_v37 }
 0x29b   : > { %5329 = vmatpush.bf16.msra.mxu1 %v8768_v9  ;;  %v4643_v27 = vadd.f32 %v4642_v21, %v4624_v26 }
 0x29c   : > { %5310 = vmatpush.bf16.msra.mxu0 %v8760_v23  ;;  %v5028_v63 = vadd.f32 %v5012_v50, %v4996_v60 }
 0x29d   : > { %v4661_v4 = vpop.f32.mrf.mxu2  ;;  %v4680_v34 = vpop.f32.mrf.mxu3 }
 0x29e   : > { %v4662_v31 = vadd.f32 %v4661_v4, %v4643_v27  ;;  %v4711_v30 = vpop.f32.mrf.mxu1 }
 0x29f   : > { %5311 = vmatmul.bf16.vlgmr.msra.gmra.mxu0 %v5035_v29  ;;  %v8779_v29 = vld [vmem:[%s9586_s0 + $0x98] sm:$0xff] }
 0x2a0   : > { %v4692_v18 = vpop.f32.mrf.mxu0  ;;  %v4681_v24 = vadd.f32 %v4680_v34, %v4662_v31  ;;  %5330 = vmatmul.bf16.vlgmr.msra.gmra.mxu1 %v5036_v58  ;;  %5345 = vmatpush.bf16.msra.mxu2 %v8779_v29 }
 0x2a1   : > { %v4712_v12 = vadd.f32 %v4711_v30, %v4692_v18  ;;  %v4989_v30 = vmul.f32 %v10462_v52, %v10462_v52 }
 0x2a2   : > { %v5016_v22 = vmul.f32 %v4681_v24, %v4681_v24 }
 0x2a4   : > { %v5032_v38 = vadd.f32 %v5016_v22, %v5000_v33  ;;  %5346 = vmatpush.bf16.msra.mxu2 %v8778_v57 }
 0x2a5   : > { %v4730_v5 = vpop.f32.mrf.mxu2  ;;  %v4749_v59 = vpop.f32.mrf.mxu3 }
 0x2a6   : > { %v4713_v53 = vpop.f32.mrf.mxu1  ;;  %v5040_v32 = vpack.c.bf16 %v5032_v38, %v5028_v63  ;;  %v4731_v35 = vadd.f32 %v4730_v5, %v4712_v12  ;;  %v4997_v12 = vmul.f32 %v10518_v6, %v10518_v6 }
 0x2a8   : > { %v4694_v20 = vpop.f32.mrf.mxu0  ;;  %5347 = vmatpush.bf16.msra.mxu2 %v8777_v44  ;;  %v4750_v8 = vadd.f32 %v4749_v59, %v4731_v35  ;;  %v5001_v35 = vmul.f32 %v10530_v17, %v10530_v17 }
 0x2a9   : > { %v4714_v23 = vadd.f32 %v4713_v53, %v4694_v20 }
 0x2ac   : > { %5348 = vmatpush.bf16.msra.mxu2 %v8776_v49 }
 0x2ad   : > { %v4732_v55 = vpop.f32.mrf.mxu2  ;;  %v4751_v47 = vpop.f32.mrf.mxu3 }
 0x2ae   : > { %v4716_v46 = vpop.f32.mrf.mxu1  ;;  %v4733_v9 = vadd.f32 %v4732_v55, %v4714_v23 }
 0x2af   : > { %5316 = vmatmul.bf16.gmra.mxu0 %v5039_v54 }
 0x2b0   : > { %v4697_v56 = vpop.f32.mrf.mxu0  ;;  %5335 = vmatmul.bf16.gmra.mxu1 %v5040_v32  ;;  %v4752_v54 = vadd.f32 %v4751_v47, %v4733_v9  ;;  %v8791_v32 = vld [vmem:[%s9586_s0 + $0xf8] sm:$0xff] }
 0x2b1   : > { %v4717_v51 = vadd.f32 %v4716_v46, %v4697_v56  ;;  %5360 = vmatpush.bf16.msra.mxu3 %v8791_v32 }
 0x2b5   : > { %v4735_v14 = vpop.f32.mrf.mxu2  ;;  %v4754_v11 = vpop.f32.mrf.mxu3  ;;  %5361 = vmatpush.bf16.msra.mxu3 %v8790_v36 }
 0x2b6   : > { %v4718_v48 = vpop.f32.mrf.mxu1  ;;  %v4736_v16 = vadd.f32 %v4735_v14, %v4717_v51  ;;  %v8789_v14 = vld [vmem:[%s9586_s0 + $0xe8] sm:$0xff] }
 0x2b8   : > { %v4699_v39 = vpop.f32.mrf.mxu0  ;;  %v4755_v4 = vadd.f32 %v4754_v11, %v4736_v16 }
 0x2b9   : > { %v4719_v34 = vadd.f32 %v4718_v48, %v4699_v39  ;;  %5362 = vmatpush.bf16.msra.mxu3 %v8789_v14  ;;  %v8788_v48 = vld [vmem:[%s9586_s0 + $0xe0] sm:$0xff] }
 0x2bd   : > { %v4737_v42 = vpop.f32.mrf.mxu2  ;;  %v4756_v2 = vpop.f32.mrf.mxu3  ;;  %5363 = vmatpush.bf16.msra.mxu3 %v8788_v48 }
 0x2be   : > { %v4787_v7 = vpop.f32.mrf.mxu1  ;;  %v4738_v50 = vadd.f32 %v4737_v42, %v4719_v34 }
 0x2c0   : > { %v4768_v62 = vpop.f32.mrf.mxu0  ;;  %v4757_v38 = vadd.f32 %v4756_v2, %v4738_v50 }
 0x2c1   : > { %v4769_v61 = vadd.f32 %v4768_v62, %v4750_v8 }
 0x2c3   : > { %v4788_v15 = vadd.f32 %v4787_v7, %v4769_v61 }
 0x2c5   : > { %v4806_v3 = vpop.f32.mrf.mxu2  ;;  %v4825_v43 = vpop.f32.mrf.mxu3 }
 0x2c6   : > { %v4789_v10 = vpop.f32.mrf.mxu1  ;;  %v4807_v19 = vadd.f32 %v4806_v3, %v4788_v15  ;;  %v8787_v3 = vld [vmem:[%s9586_s0 + $0xd8] sm:$0xff] }
 0x2c7   : > { %5364 = vmatpush.bf16.msra.mxu3 %v8787_v3 }
 0x2c8   : > { %v4770_v1 = vpop.f32.mrf.mxu0  ;;  %v4826_v21 = vadd.f32 %v4825_v43, %v4807_v19  ;;  %v8786_v43 = vld [vmem:[%s9586_s0 + $0xd0] sm:$0xff] }
 0x2c9   : > { %v4771_v58 = vadd.f32 %v4770_v1, %v4752_v54  ;;  %v8785_v1 = vld [vmem:[%s9586_s0 + $0xc8] sm:$0xff] }
 0x2ca   : > { %v5005_v31 = vmul.f32 %v4826_v21, %v4826_v21 }
 0x2cb   : > { %v4790_v0 = vadd.f32 %v4789_v10, %v4771_v58  ;;  %5365 = vmatpush.bf16.msra.mxu3 %v8786_v43  ;;  %v8784_v10 = vld [vmem:[%s9586_s0 + $0xc0] sm:$0xff] }
 0x2cc   : > { %v5021_v33 = vadd.f32 %v5005_v31, %v4989_v30 }
 0x2cd   : > { %v4808_v28 = vpop.f32.mrf.mxu2  ;;  %v4827_v26 = vpop.f32.mrf.mxu3 }
 0x2ce   : > { %v4809_v45 = vadd.f32 %v4808_v28, %v4790_v0  ;;  %v4792_v27 = vpop.f32.mrf.mxu1 }
 0x2cf   : > { %5366 = vmatpush.bf16.msra.mxu3 %v8785_v1 }
 0x2d0   : > { %v4773_v25 = vpop.f32.mrf.mxu0  ;;  %v4828_v18 = vadd.f32 %v4827_v26, %v4809_v45 }
 0x2d1   : > { %v4774_v60 = vadd.f32 %v4773_v25, %v4755_v4 }
 0x2d2   : > { %v5009_v24 = vmul.f32 %v4828_v18, %v4828_v18 }
 0x2d3   : > { %v4793_v59 = vadd.f32 %v4792_v27, %v4774_v60  ;;  %5367 = vmatpush.bf16.msra.mxu3 %v8784_v10 }
 0x2d4   : > { %v5025_v22 = vadd.f32 %v5009_v24, %v4993_v13 }
 0x2d5   : > { %v4811_v37 = vpop.f32.mrf.mxu2  ;;  %v4830_v63 = vpop.f32.mrf.mxu3 }
 0x2d6   : > { %v5037_v5 = vpack.c.bf16 %v5025_v22, %v5021_v33  ;;  %v4794_v53 = vpop.f32.mrf.mxu1  ;;  %v4812_v29 = vadd.f32 %v4811_v37, %v4793_v59 }
 0x2d8   : > { %v4775_v20 = vpop.f32.mrf.mxu0  ;;  %5349 = vmatmul.bf16.vlgmr.msra.gmra.mxu2 %v5037_v5  ;;  %v4831_v57 = vadd.f32 %v4830_v63, %v4812_v29 }
 0x2d9   : > { %v4776_v52 = vadd.f32 %v4775_v20, %v4757_v38 }
 0x2da   : > { %v5013_v11 = vmul.f32 %v4831_v57, %v4831_v57 }
 0x2db   : > { %v4795_v55 = vadd.f32 %v4794_v53, %v4776_v52 }
 0x2dc   : > { %v5029_v2 = vadd.f32 %v5013_v11, %v4997_v12 }
 0x2dd   : > { %v4813_v47 = vpop.f32.mrf.mxu2  ;;  %v4832_v56 = vpop.f32.mrf.mxu3 }
 0x2de   : > { %v4814_v46 = vadd.f32 %v4813_v47, %v4795_v55  ;;  %v4863_v49 = vpop.f32.mrf.mxu1  ;;  %v4990_v55 = vmul.f32 %v10634_v40, %v10634_v40 }
 0x2e0   : > { %v4844_v44 = vpop.f32.mrf.mxu0  ;;  %v4833_v39 = vadd.f32 %v4832_v56, %v4814_v46  ;;  %v4994_v56 = vmul.f32 %v10655_v41, %v10655_v41 }
 0x2e1   : > { %v4864_v21 = vadd.f32 %v4863_v49, %v4844_v44 }
 0x2e2   : > { %v5017_v42 = vmul.f32 %v4833_v39, %v4833_v39 }
 0x2e4   : > { %v5033_v62 = vadd.f32 %v5017_v42, %v5001_v35 }
 0x2e5   : > { %v4882_v7 = vpop.f32.mrf.mxu2  ;;  %v4901_v8 = vpop.f32.mrf.mxu3 }
 0x2e6   : > { %v4865_v9 = vpop.f32.mrf.mxu1  ;;  %v5041_v61 = vpack.c.bf16 %v5033_v62, %v5029_v2  ;;  %v4883_v0 = vadd.f32 %v4882_v7, %v4864_v21 }
 0x2e8   : > { %v4846_v23 = vpop.f32.mrf.mxu0  ;;  %5354 = vmatmul.bf16.gmra.mxu2 %v5041_v61  ;;  %v4902_v27 = vadd.f32 %v4901_v8, %v4883_v0 }
 0x2e9   : > { %v4866_v4 = vadd.f32 %v4865_v9, %v4846_v23 }
 0x2ed   : > { %v4884_v54 = vpop.f32.mrf.mxu2  ;;  %v4903_v6 = vpop.f32.mrf.mxu3 }
 0x2ee   : > { %v4868_v17 = vpop.f32.mrf.mxu1  ;;  %v4885_v34 = vadd.f32 %v4884_v54, %v4866_v4  ;;  %v11114_v54 = vld [vmem:[#allocation26_spill] sm:$0xff] }
 0x2f0   : > { %v4849_v15 = vpop.f32.mrf.mxu0  ;;  %v4904_v13 = vadd.f32 %v4903_v6, %v4885_v34  ;;  %v4998_v6 = vmul.f32 %v11114_v54, %v11114_v54 }
 0x2f1   : > { %v4869_v37 = vadd.f32 %v4868_v17, %v4849_v15  ;;  %v11115_v15 = vld [vmem:[#allocation27_spill] sm:$0xff] }
 0x2f2   : > { %v5002_v17 = vmul.f32 %v11115_v15, %v11115_v15 }
 0x2f5   : > { %v4887_v19 = vpop.f32.mrf.mxu2  ;;  %v4906_v58 = vpop.f32.mrf.mxu3 }
 0x2f6   : > { %v4870_v16 = vpop.f32.mrf.mxu1  ;;  %v4888_v63 = vadd.f32 %v4887_v19, %v4869_v37 }
 0x2f8   : > { %v4851_v51 = vpop.f32.mrf.mxu0  ;;  %v4907_v29 = vadd.f32 %v4906_v58, %v4888_v63 }
 0x2f9   : > { %v4871_v52 = vadd.f32 %v4870_v16, %v4851_v51 }
 0x2fd   : > { %v4889_v28 = vpop.f32.mrf.mxu2  ;;  %v4908_v26 = vpop.f32.mrf.mxu3 }
 0x2fe   : > { %v4939_v25 = vpop.f32.mrf.mxu1  ;;  %v4890_v46 = vadd.f32 %v4889_v28, %v4871_v52 }
 0x300   : > { %v4920_v45 = vpop.f32.mrf.mxu0  ;;  %v4909_v12 = vadd.f32 %v4908_v26, %v4890_v46 }
 0x301   : > { %v4921_v31 = vadd.f32 %v4920_v45, %v4902_v27  ;;  %v5043_v27 = vld [vmem:[#allocation14] sm:$0xff] }
 0x303   : > { %v4940_v50 = vadd.f32 %v4939_v25, %v4921_v31 }
 0x305   : > { %v4958_v18 = vpop.f32.mrf.mxu2  ;;  %v4977_v30 = vpop.f32.mrf.mxu3 }
 0x306   : > { %v4941_v60 = vpop.f32.mrf.mxu1  ;;  %v4959_v33 = vadd.f32 %v4958_v18, %v4940_v50 }
 0x308   : > { %v4922_v24 = vpop.f32.mrf.mxu0  ;;  %v4978_v38 = vadd.f32 %v4977_v30, %v4959_v33 }
 0x309   : > { %v4923_v22 = vadd.f32 %v4922_v24, %v4904_v13  ;;  %v5044_v24 = vld [vmem:[#allocation14 + $0x8] sm:$0xff] }
 0x30a   : > { %v5006_v36 = vmul.f32 %v4978_v38, %v4978_v38 }
 0x30b   : > { %v4942_v5 = vadd.f32 %v4941_v60, %v4923_v22 }
 0x30c   : > { %v5022_v14 = vadd.f32 %v5006_v36, %v4990_v55  ;;  %v5046_v55 = vld [vmem:[#allocation14 + $0x18] sm:$0xff] }
 0x30d   : > { %v4960_v59 = vpop.f32.mrf.mxu2  ;;  %v4979_v20 = vpop.f32.mrf.mxu3 }
 0x30e   : > { %v4961_v53 = vadd.f32 %v4960_v59, %v4942_v5  ;;  %v4944_v47 = vpop.f32.mrf.mxu1  ;;  %v5045_v5 = vld [vmem:[#allocation14 + $0x10] sm:$0xff] }
 0x310   : > { %v4925_v32 = vpop.f32.mrf.mxu0  ;;  %v4980_v57 = vadd.f32 %v4979_v20, %v4961_v53 }
 0x311   : > { %v4926_v49 = vadd.f32 %v4925_v32, %v4907_v29 }
 0x312   : > { %v5010_v44 = vmul.f32 %v4980_v57, %v4980_v57 }
 0x313   : > { %v4945_v42 = vadd.f32 %v4944_v47, %v4926_v49 }
 0x314   : > { %v5026_v11 = vadd.f32 %v5010_v44, %v4994_v56 }
 0x315   : > { %v4963_v39 = vpop.f32.mrf.mxu2  ;;  %v4982_v48 = vpop.f32.mrf.mxu3 }
 0x316   : > { %v5038_v35 = vpack.c.bf16 %v5026_v11, %v5022_v14  ;;  %v4964_v62 = vadd.f32 %v4963_v39, %v4945_v42  ;;  %v4946_v8 = vpop.f32.mrf.mxu1 }
 0x318   : > { %v4927_v2 = vpop.f32.mrf.mxu0  ;;  %5368 = vmatmul.bf16.vlgmr.msra.gmra.mxu3 %v5038_v35  ;;  %v4983_v40 = vadd.f32 %v4982_v48, %v4964_v62 }
 0x319   : > { %v4928_v7 = vadd.f32 %v4927_v2, %v4909_v12 }
 0x31a   : > { %v5014_v3 = vmul.f32 %v4983_v40, %v4983_v40 }
 0x31b   : > { %v4947_v23 = vadd.f32 %v4946_v8, %v4928_v7 }
 0x31c   : > { %v5030_v10 = vadd.f32 %v5014_v3, %v4998_v6 }
 0x31d   : > { %v4965_v9 = vpop.f32.mrf.mxu2  ;;  %v4984_v41 = vpop.f32.mrf.mxu3 }
 0x31e   : > { %v4966_v61 = vadd.f32 %v4965_v9, %v4947_v23  ;;  %v5331_v16 = vpop.f32.mrf.mxu1 }
 0x320   : > { %v4985_v43 = vadd.f32 %v4984_v41, %v4966_v61  ;;  %v5312_v51 = vpop.f32.mrf.mxu0 }
 0x321   : > { %v5332_v0 = vadd.f32 %v5331_v16, %v5312_v51 }
 0x322   : > { %v5018_v1 = vmul.f32 %v4985_v43, %v4985_v43 }
 0x324   : > { %v5034_v19 = vadd.f32 %v5018_v1, %v5002_v17 }
 0x326   : > { %v5042_v58 = vpack.c.bf16 %v5034_v19, %v5030_v10  ;;  %v5333_v26 = vpop.f32.mrf.mxu1 }
 0x328   : > { %5373 = vmatmul.bf16.gmra.mxu3 %v5042_v58  ;;  %v5314_v28 = vpop.f32.mrf.mxu0 }
 0x329   : > { %v5334_v18 = vadd.f32 %v5333_v26, %v5314_v28 }
 0x32e   : > { %v5336_v50 = vpop.f32.mrf.mxu1 }
 0x330   : > { %v5317_v30 = vpop.f32.mrf.mxu0 }
 0x331   : > { %v5337_v63 = vadd.f32 %v5336_v50, %v5317_v30 }
 0x336   : > { %v5338_v32 = vpop.f32.mrf.mxu1 }
 0x338   : > { %v5319_v53 = vpop.f32.mrf.mxu0 }
 0x339   : > { %v5339_v36 = vadd.f32 %v5338_v32, %v5319_v53 }
 0x35b   : > { %v5350_v21 = vpop.f32.mrf.mxu2 }
 0x35c   : > { %v5351_v45 = vadd.f32 %v5350_v21, %v5332_v0 }
 0x363   : > { %v5352_v25 = vpop.f32.mrf.mxu2 }
 0x364   : > { %v5353_v13 = vadd.f32 %v5352_v25, %v5334_v18 }
 0x36b   : > { %v5355_v22 = vpop.f32.mrf.mxu2 }
 0x36c   : > { %v5356_v38 = vadd.f32 %v5355_v22, %v5337_v63 }
 0x373   : > { %v5357_v52 = vpop.f32.mrf.mxu2 }
 0x374   : > { %v5358_v57 = vadd.f32 %v5357_v52, %v5339_v36 }
 0x39b   : > { %v5369_v4 = vpop.f32.mrf.mxu3 }
 0x39c   : > { %v5370_v34 = vadd.f32 %v5369_v4, %v5351_v45 }
 0x39e   : > { %v5379_v31 = vadd.f32 %v5370_v34, %v5043_v27 }
 0x3a0   : > { %5383 = vst [vmem:[#allocation14] sm:$0xff] %v5379_v31 }
 0x3a3   : > { %v5371_v60 = vpop.f32.mrf.mxu3 }
 0x3a4   : > { %v5372_v33 = vadd.f32 %v5371_v60, %v5353_v13 }
 0x3a6   : > { %v5380_v37 = vadd.f32 %v5372_v33, %v5044_v24 }
 0x3a8   : > { %5384 = vst [vmem:[#allocation14 + $0x8] sm:$0xff] %v5380_v37 }
 0x3ab   : > { %v5374_v59 = vpop.f32.mrf.mxu3 }
 0x3ac   : > { %v5375_v20 = vadd.f32 %v5374_v59, %v5356_v38 }
 0x3ae   : > { %v5381_v29 = vadd.f32 %v5375_v20, %v5045_v5 }
 0x3b0   : > { %5385 = vst [vmem:[#allocation14 + $0x10] sm:$0xff] %v5381_v29 }
 0x3b3   : > { %v5376_v47 = vpop.f32.mrf.mxu3 }
 0x3b4   : > { %v5377_v56 = vadd.f32 %v5376_v47, %v5358_v57  ;;  %5390 = sbr.rel (%p8141_p1) target bundleno = 1449 (0x5a9), region = 92 }
 0x3b6   : > { %v5382_v46 = vadd.f32 %v5377_v56, %v5046_v55 }
 0x3b8   : > { %5386 = vst [vmem:[#allocation14 + $0x18] sm:$0xff] %v5382_v46 }
 0x3b9   : > { %v5391_v44 = vld [vmem:[#allocation14] sm:$0xff]  ;;  %v5392_v49 = vld [vmem:[#allocation14 + $0x8] sm:$0xff]  ;;  %v5393_v14 = vld [vmem:[#allocation14 + $0x10] sm:$0xff]  ;;  %v9337_v12 = vmov 0.6931472  }
 0x3ba   : > { %v5395_v39 = vmax.f32 %v5391_v44, 1e-10  ;;  %v5396_v48 = vmax.f32 %v5392_v49, 1e-10  ;;  %8951 = vrcp.f32 %v9337_v12  ;;  %v5397_v35 = vmax.f32 %v5393_v14, 1e-10 }
 0x3bb   : > { %v5609_v2 = vadd.f32 1e-06, %v5391_v44  ;;  %v5610_v62 = vadd.f32 1e-06, %v5392_v49  ;;  %v5611_v7 = vadd.f32 1e-06, %v5393_v14 }
 0x3bc   : > { %8953 = vlog2.f32 %v5395_v39  ;;  %v8799_v38 = vld [vmem:[#allocation10 + $0x38] sm:$0xff]  ;;  %v8798_v5 = vld [vmem:[#allocation10 + $0x30] sm:$0xff]  ;;  %v8797_v59 = vld [vmem:[#allocation10 + $0x28] sm:$0xff] }
 0x3bd   : > { %8955 = vlog2.f32 %v5396_v48  ;;  %5499 = vmatpush.bf16.msra.mxu0 %v8799_v38  ;;  %8808 = vmatpush.bf16.msra.mxu2 %v8799_v38  ;;  %v8796_v20 = vld [vmem:[#allocation10 + $0x20] sm:$0xff]  ;;  %v8795_v53 = vld [vmem:[#allocation10 + $0x18] sm:$0xff]  ;;  %v8794_v32 = vld [vmem:[#allocation10 + $0x10] sm:$0xff] }
 0x3be   : > { %8957 = vlog2.f32 %v5397_v35  ;;  %v8793_v46 = vld [vmem:[#allocation10 + $0x8] sm:$0xff]  ;;  %v8792_v44 = vld [vmem:[#allocation10] sm:$0xff]  ;;  %v8807_v49 = vld [vmem:[#allocation11 + $0x38] sm:$0xff] }
 0x3bf   : > { %v5394_v11 = vld [vmem:[#allocation14 + $0x18] sm:$0xff]  ;;  %5586 = vmatpush.bf16.msra.mxu1 %v8807_v49  ;;  %v8806_v14 = vld [vmem:[#allocation11 + $0x30] sm:$0xff]  ;;  %8816 = vmatpush.bf16.msra.mxu3 %v8807_v49  ;;  %v8803_v48 = vld [vmem:[#allocation11 + $0x18] sm:$0xff] }
 0x3c0   : > { %v5398_v42 = vmax.f32 %v5394_v11, 1e-10  ;;  %v5612_v8 = vadd.f32 1e-06, %v5394_v11  ;;  %v8952_v40 = vpop.eup %8951  ;;  %v8805_v11 = vld [vmem:[#allocation11 + $0x28] sm:$0xff]  ;;  %v8804_v39 = vld [vmem:[#allocation11 + $0x20] sm:$0xff] }
 0x3c1   : > { %v5622_v23 = vmul.f32 0.6931472, %v8952_v40  ;;  %vm5626_vm0 = vweird.f32 %v8952_v40  ;;  %5500 = vmatpush.bf16.msra.mxu0 %v8798_v5  ;;  %8809 = vmatpush.bf16.msra.mxu2 %v8798_v5 }
 0x3c2   : > { %8959 = vlog2.f32 %v5398_v42  ;;  %v8954_v9 = vpop.eup %8953 }
 0x3c3   : > { %8961 = vlog2.f32 %v5609_v2  ;;  %v8956_v61 = vpop.eup %8955  ;;  %v5400_v41 = vmul.f32 0.6931472, %v8954_v9  ;;  %v5623_v3 = vsub.f32 1.0, %v5622_v23  ;;  %5587 = vmatpush.bf16.msra.mxu1 %v8806_v14  ;;  %8817 = vmatpush.bf16.msra.mxu3 %v8806_v14  ;;  %v8801_v23 = vld [vmem:[#allocation11 + $0x8] sm:$0xff]  ;;  %v8800_v9 = vld [vmem:[#allocation11] sm:$0xff] }
 0x3c4   : > { %8963 = vlog2.f32 %v5610_v62  ;;  %v8958_v43 = vpop.eup %8957  ;;  %v5402_v54 = vmul.f32 0.6931472, %v8956_v61 }
 0x3c5   : > { %8965 = vlog2.f32 %v5611_v7  ;;  %v5404_v15 = vmul.f32 0.6931472, %v8958_v43  ;;  %v5407_v17 = vmul.f32 0.4342945, %v5400_v41  ;;  %v5624_v1 = vmul.f32 %v8952_v40, %v5623_v3  ;;  %5501 = vmatpush.bf16.msra.mxu0 %v8797_v59  ;;  %8810 = vmatpush.bf16.msra.mxu2 %v8797_v59 }
 0x3c6   : > { %8967 = vlog2.f32 %v5612_v8  ;;  %v5408_v58 = vmul.f32 0.4342945, %v5402_v54 }
 0x3c7   : > { %v5409_v16 = vmul.f32 0.4342945, %v5404_v15  ;;  %v11025_v21 = vmul.f32 10.0, %v5407_v17  ;;  %v5625_v28 = vadd.f32 %v8952_v40, %v5624_v1  ;;  %5588 = vmatpush.bf16.msra.mxu1 %v8805_v11  ;;  %8818 = vmatpush.bf16.msra.mxu3 %v8805_v11  ;;  %v8950_v15 = vld [vmem:[#allocation13] ss:$0 sm:$0xff] }
 0x3c8   : > { %v8960_v6 = vpop.eup %8959  ;;  %v11027_v25 = vmul.f32 10.0, %v5408_v58 }
 0x3c9   : > { %v8962_v10 = vpop.eup %8961  ;;  %v5406_v19 = vmul.f32 0.6931472, %v8960_v6  ;;  %v11029_v34 = vmul.f32 10.0, %v5409_v16  ;;  %v5627_v18 = vsel %vm5626_vm0, %v8952_v40, %v5625_v28  ;;  %5502 = vmatpush.bf16.msra.mxu0 %v8796_v20  ;;  %8811 = vmatpush.bf16.msra.mxu2 %v8796_v20  ;;  %v8802_v40 = vld [vmem:[#allocation11 + $0x10] sm:$0xff] }
 0x3ca   : > { %v8964_v51 = vpop.eup %8963  ;;  %v5614_v0 = vmul.f32 0.6931472, %v8962_v10  ;;  %v5415_v13 = vmax.f32 %v11025_v21, %v11027_v25 }
 0x3cb   : > { %v8966_v26 = vpop.eup %8965  ;;  %v5410_v45 = vmul.f32 0.4342945, %v5406_v19  ;;  %v5616_v27 = vmul.f32 0.6931472, %v8964_v51  ;;  %5589 = vmatpush.bf16.msra.mxu1 %v8804_v39  ;;  %8819 = vmatpush.bf16.msra.mxu3 %v8804_v39 }
 0x3cc   : > { %v8968_v4 = vpop.eup %8967  ;;  %v5618_v31 = vmul.f32 0.6931472, %v8966_v26  ;;  %v5628_v24 = vmul.f32 %v5627_v18, %v5614_v0 }
 0x3cd   : > { %v11031_v30 = vmul.f32 10.0, %v5410_v45  ;;  %v5620_v50 = vmul.f32 0.6931472, %v8968_v4  ;;  %v5629_v60 = vmul.f32 %v5627_v18, %v5616_v27  ;;  %5503 = vmatpush.bf16.msra.mxu0 %v8795_v53  ;;  %8812 = vmatpush.bf16.msra.mxu2 %v8795_v53 }
 0x3ce   : > { %v5630_v33 = vmul.f32 %v5627_v18, %v5618_v31  ;;  %5632 = vst [vmem:[#allocation14] sm:$0xff] %v5628_v24 }
 0x3cf   : > { %v5416_v22 = vmax.f32 %v11029_v34, %v11031_v30  ;;  %v5631_v37 = vmul.f32 %v5627_v18, %v5620_v50  ;;  %5633 = vst [vmem:[#allocation14 + $0x8] sm:$0xff] %v5629_v60  ;;  %5590 = vmatpush.bf16.msra.mxu1 %v8803_v48  ;;  %8820 = vmatpush.bf16.msra.mxu3 %v8803_v48 }
 0x3d0   : > { %5634 = vst [vmem:[#allocation14 + $0x10] sm:$0xff] %v5630_v33 }
 0x3d1   : > { %v5417_v63 = vmax.f32 %v5415_v13, %v5416_v22  ;;  %5635 = vst [vmem:[#allocation14 + $0x18] sm:$0xff] %v5631_v37  ;;  %5504 = vmatpush.bf16.msra.mxu0 %v8794_v32  ;;  %8813 = vmatpush.bf16.msra.mxu2 %v8794_v32 }
 0x3d3   : > { %5418 = vmax.xlane.f32.xlu0 %v5417_v63  ;;  %5591 = vmatpush.bf16.msra.mxu1 %v8802_v40 }
 0x3d4   : > { %8821 = vmatpush.bf16.msra.mxu3 %v8802_v40 }
 0x3d5   : > { %5505 = vmatpush.bf16.msra.mxu0 %v8793_v46  ;;  %8814 = vmatpush.bf16.msra.mxu2 %v8793_v46 }
 0x3d7   : > { %5592 = vmatpush.bf16.msra.mxu1 %v8801_v23 }
 0x3d8   : > { %8822 = vmatpush.bf16.msra.mxu3 %v8801_v23 }
 0x3d9   : > { %5506 = vmatpush.bf16.msra.mxu0 %v8792_v44  ;;  %8815 = vmatpush.bf16.msra.mxu2 %v8792_v44 }
 0x3db   : > { %5593 = vmatpush.bf16.msra.mxu1 %v8800_v9 }
 0x3dc   : > { %8823 = vmatpush.bf16.msra.mxu3 %v8800_v9 }
 0x446   : > { %v5419_v29 = vpop.xlane.xlu0 %5418 }
 0x447   : > { %v5420_v52 = vrot.slane %v5419_v29, 4 }
 0x449   : > { %v5421_v36 = vmax.f32 %v5419_v29, %v5420_v52 }
 0x44b   : > { %v5422_v57 = vrot.slane %v5421_v36, 2 }
 0x44d   : > { %v5423_v55 = vmax.f32 %v5421_v36, %v5422_v57 }
 0x44f   : > { %v5424_v47 = vrot.slane %v5423_v55, 1 }
 0x451   : > { %v5425_v56 = vmax.f32 %v5423_v55, %v5424_v47 }
 0x453   : > { %8824 = vpush %v5425_v56 }
 0x484   : > { %s8825_s14 = spop %8824 }
 0x485   : > { %s8142_s24 = sadd.f32 -80.0, %s8825_s14 }
 0x487   : > { %v5428_v12 = vstv %s8142_s24 }
 0x488   : > { %v5429_v35 = vmax.f32 %v11025_v21, %v5428_v12  ;;  %v5430_v42 = vmax.f32 %v11027_v25, %v5428_v12  ;;  %v5431_v2 = vmax.f32 %v11029_v34, %v5428_v12  ;;  %v5432_v62 = vmax.f32 %v11031_v30, %v5428_v12 }
 0x48a   : > { %v5433_v7 = vpack.c.bf16 %v5430_v42, %v5429_v35  ;;  %v5434_v8 = vpack.c.bf16 %v5432_v62, %v5431_v2 }
 0x48c   : > { %5507 = vmatmul.bf16.vlgmr.msra.gmra.mxu0 %v5433_v7  ;;  %5512 = vmatmul.bf16.vlgmr.msra.gmra.mxu2 %v5434_v8 }
 0x509   : > { %v5508_v61 = vpop.f32.mrf.mxu0 }
 0x50f   : > { %v5513_v41 = vpop.f32.mrf.mxu2 }
 0x511   : > { %v5510_v3 = vpop.f32.mrf.mxu0 }
 0x512   : > { %v5518_v43 = vpack.c.bf16 %v5510_v3, %v5508_v61 }
 0x514   : > { %5594 = vmatmul.bf16.vlgmr.msra.gmra.mxu1 %v5518_v43 }
 0x517   : > { %v5515_v54 = vpop.f32.mrf.mxu2 }
 0x518   : > { %v5519_v6 = vpack.c.bf16 %v5515_v54, %v5513_v41 }
 0x51a   : > { %5599 = vmatmul.bf16.vlgmr.msra.gmra.mxu3 %v5519_v6 }
 0x591   : > { %v5595_v17 = vpop.f32.mrf.mxu1 }
 0x592   : > { %v5596_v1 = vadd.f32 %v8950_v15, %v5595_v17 }
 0x594   : > { %5605 = vst [vmem:[#allocation15] sm:$0xff] %v5596_v1 }
 0x599   : > { %v5597_v10 = vpop.f32.mrf.mxu1 }
 0x59a   : > { %v5598_v19 = vadd.f32 %v8950_v15, %v5597_v10 }
 0x59c   : > { %5606 = vst [vmem:[#allocation15 + $0x8] sm:$0xff] %v5598_v19 }
 0x59d   : > { %v5600_v58 = vpop.f32.mrf.mxu3 }
 0x59e   : > { %v5601_v51 = vadd.f32 %v8950_v15, %v5600_v58 }
 0x5a0   : > { %5607 = vst [vmem:[#allocation15 + $0x10] sm:$0xff] %v5601_v51 }
 0x5a5   : > { %v5602_v16 = vpop.f32.mrf.mxu3 }
 0x5a6   : > { %v5603_v21 = vadd.f32 %v8950_v15, %v5602_v16 }
 0x5a8   : > { %5608 = vst [vmem:[#allocation15 + $0x18] sm:$0xff] %v5603_v21 }
 0x5a9 PF: > { %p8897_p4 = scmp.eq.s32.totalorder %s9411_s13, 1  ;;  %s9338_s22 = smov [#allocation14]  }
 0x5aa   : > { %s5641_s30 = sshll.u32 %s9338_s22, 4  ;;  %s11116_s17 = sld [smem:[#allocation31_spill]]  ;;  %s5642_s30 = int_to_ptr.vmem [resolvable:$true] %s5641_s30 }
 0x5ab   : > { %s9339_s1 = smov 128   ;;  %s9340_s15 = smov 8  }
 0x5ac   : > { %s11117_s12 = sld [smem:[#allocation32_spill]]  ;;  %s9341_s29 = smov [#allocation15]  }
 0x5ad   : > { %s5655_s26 = sshll.u32 %s9341_s29, 4  ;;  %s5656_s26 = int_to_ptr.vmem [resolvable:$true] %s5655_s26 }
 0x5b0   : > { %s5643_s2 = sshll.u32 %s11116_s17, 4  ;;  %s5644_s2 = int_to_ptr.hbm [resolvable:$true] %s5643_s2 }
 0x5b1   : > { %8853 = dma.vmem_to_hbm [thread:$0]  (%p8897_p4), %s5642_s30, 512, %s5644_s2, [#allocation4], %s9339_s1, %s9339_s1, %s9340_s15  }
 0x5b2   : > { %s5657_s9 = sshll.u32 %s11117_s12, 4  ;;  %s5658_s9 = int_to_ptr.hbm [resolvable:$true] %s5657_s9 }
 0x5b3   : > { %8855 = dma.vmem_to_hbm [thread:$0]  (%p8897_p4), %s5656_s26, 512, %s5658_s9, [#allocation16], %s9339_s1, %s9339_s1, %s9340_s15  }
 0x5b4   : > { %9302 = dma.done.wait (%p8897_p4), [#allocation4], 512  }
 0x5b5   : > { %9304 = vsyncadd (%p8897_p4), [#allocation4], 4294966784 }
 0x5b6   : > { %9306 = dma.done.wait (%p8897_p4), [#allocation16], 512  }
 0x5b7   : > { %9308 = vsyncadd (%p8897_p4), [#allocation16], 4294966784 }
 0x5b8 PF: > { %s11118_s12 = sld [smem:[#allocation24_spill]]  ;;  %s11120_s30 = smov %s9315_s10 }
 0x5b9   : > { %s11119_s27 = sld [smem:[#allocation25_spill]]  ;;  %s11121_s10 = smov %s9319_s11 }
 0x5be   : > { %p22_p5 = scmp.ge.s32.totalorder %s11118_s12, 4  }
 0x5bf   : > { %s11122_s11 = smov %s11119_s27 }
 0x5c0   :  { %24 = sbr.rel (!%p22_p5) target bundleno = 12 (0xc), region = 146 }
 0x5c5   :  { %5679 = vsyncpa [#allocation3], 1 }
 0x5c6   :  { %5681 = vsyncpa [#allocation3 + $0x1], 1 }
 0x5c7   :  { %5682 = vsyncpa [#allocation6], 1 }
 0x5c8   :  { %5683 = vsyncpa [#allocation12], 1 }
 0x5c9   :  { %5684 = vsyncpa [#allocation4], 1 }
 0x5ca   :  { %5686 = vsyncpa [#allocation4 + $0x1], 1 }
 0x5cb   :  { %5687 = vsyncpa [#allocation16], 1 }

</bundles_post_ra>
